<compile_context>
chip_gen: v7x
topology: tpu7x:2x2x1
jax: 0.10.0
libtpu: 0.0.40
codegen_flags: <defaults>
</compile_context>

<pallas_src>
import functools

import jax
import jax.numpy as jnp
from jax.experimental import pallas as pl
from jax.experimental.pallas import tpu as pltpu


# ----------------------------- fused Pallas kernel -----------------------------

def _fused_forward_kernel(
    patches1_ref, w1_ref, b1_ref, w2_ref, b2_ref, w3_ref, b3_ref,
    wih_ref, whh_ref, bl_ref,
    fc1w_hbm, fc1b_ref, fc2w_hbm, fc2b_ref, fc3w_ref, fc3b_ref,
    out_ref,
    fc1w_vmem, fc2w_vmem, fc_sem, conv2_ref, seq_ref,
    *, B, T2, T3, K2, S2, K3, S3, H, num_layers):
    """Whole CNN-LSTM-FC forward for one (padded) batch, all in VMEM/vregs.

    patches1: (T1*B, 7) time-major conv1 im2col rows (row = t*B + b).
    conv weights are per-tap (K, Cin, Cout) with BatchNorm folded in.
    LSTM weights are fused per layer: (L, H, 4H), gate order i, f, g, o along lanes.
    fc1_w / fc2_w arrive as raw HBM refs (bf16) and are DMA'd while conv+LSTM run.
    Output: (B, 128) lane-dense slab; the logit is broadcast across lanes.
    """
    f32 = jnp.float32
    bf16 = jnp.bfloat16

    # ---- kick off FC weight DMAs; they hide behind conv + LSTM compute --------
    cp1 = pltpu.make_async_copy(fc1w_hbm, fc1w_vmem, fc_sem.at[0])
    cp2 = pltpu.make_async_copy(fc2w_hbm, fc2w_vmem, fc_sem.at[1])
    cp1.start()
    cp2.start()

    # ---- conv1 + BN + ReLU: one matmul over all (time, batch) rows ------------
    y = jnp.dot(patches1_ref[...], w1_ref[...], preferred_element_type=f32) + b1_ref[...]
    y = jnp.maximum(y, 0.0)                                      # (T1*B, 32)

    # ---- conv2 / conv3 + BN + ReLU: tap-by-tap matmuls, scratch stores ---------
    def conv_bn_relu(y_in, w_ref, b_ref, acc_ref, K, S, T_out):
        Cout = w_ref.shape[-1]
        bias = b_ref[...]                                        # (1, Cout)
        rows = [jnp.broadcast_to(bias, (B, Cout))] * T_out
        for k in range(K):                                       # one tap live at a time
            tap = jnp.dot(y_in, w_ref[k], preferred_element_type=f32)   # (rows_in, Cout)
            rows = [rows[t] + tap[(S * t + k) * B:(S * t + k) * B + B]
                    for t in range(T_out)]
        for t in range(T_out):                                   # 8-aligned sublane stores
            acc_ref[pl.ds(t * B, B), :] = jnp.maximum(rows[t], 0.0)
        return acc_ref[...]

    y = conv_bn_relu(y, w2_ref, b2_ref, conv2_ref, K2, S2, T2)   # (T2*B, 64)
    conv_bn_relu(y, w3_ref, b3_ref, seq_ref, K3, S3, T3)         # seq_ref <- (T3*B, H)

    # ---- LSTM stack (PyTorch gate order i, f, g, o, fused along lanes) --------
    h = jnp.zeros((B, H), f32)
    for l in range(num_layers):
        # Input projection hoisted out of the recurrence: one lane-dense dot for
        # all gates over the whole sequence.
        xg = jnp.dot(seq_ref[...], wih_ref[l], preferred_element_type=f32) + bl_ref[l]
        h = jnp.zeros((B, H), f32)
        c = jnp.zeros((B, H), f32)
        for t in range(T3):                                      # static unroll, T3 known
            r = t * B
            # One (B,H)@(H,4H) MXU dot per step; gates live in one (B,128) vreg.
            gates = xg[r:r + B] + jnp.dot(h, whh_ref[l], preferred_element_type=f32)
            sig = jax.nn.sigmoid(gates)                          # one whole-vreg EUP push
            tnh = jnp.tanh(gates)                                # one whole-vreg EUP push
            i_g = sig[:, 0:H]
            f_g = sig[:, H:2 * H]
            g_g = tnh[:, 2 * H:3 * H]
            o_g = sig[:, 3 * H:4 * H]
            c = f_g * c + i_g * g_g
            h = o_g * jnp.tanh(c)
            if l + 1 < num_layers:
                # xg for this layer is already computed -> safe to overwrite the
                # consumed time slice with this layer's output for the next layer.
                seq_ref[pl.ds(r, B), :] = h
        # TODO(synk): inter-layer LSTM dropout omitted (eval-mode forward).

    # ---- FC head: fc1 -> ReLU -> fc2 -> ReLU -> fc3 folded as lane reduction ---
    cp1.wait()                                                   # weights arrived long ago
    cp2.wait()
    z = jnp.dot(h.astype(bf16), fc1w_vmem[...], preferred_element_type=f32) + fc1b_ref[...]
    z = jnp.maximum(z, 0.0)
    z = jnp.dot(z.astype(bf16), fc2w_vmem[...], preferred_element_type=f32) + fc2b_ref[...]
    z = jnp.maximum(z, 0.0)
    o = jnp.sum(z * fc3w_ref[...], axis=1, keepdims=True) + fc3b_ref[...]      # (B, 1)
    out_ref[...] = jnp.broadcast_to(o, out_ref.shape)            # lane-dense unmasked store


# ------------------------------ parameter prep (once, outside jit) -------------

def prepare_params(params):
    """Fold BatchNorm into conv weights, transpose, fuse LSTM gates.  Run once."""
    f32 = jnp.float32
    bf16 = jnp.bfloat16

    def fold_conv(c):
        scale = c["bn_gamma"] / jnp.sqrt(c["bn_var"] + 1e-5)                       # (Cout,)
        w = jnp.transpose(c["w"], (2, 1, 0)).astype(f32) * scale[None, None, :]    # (K, Cin, Cout)
        b = ((c["b"] - c["bn_mean"]) * scale + c["bn_beta"]).reshape(1, -1).astype(f32)
        return w, b

    w1, b1 = fold_conv(params["conv1"])       # (7, 1, 32)
    w2, b2 = fold_conv(params["conv2"])       # (5, 32, 64)
    w3, b3 = fold_conv(params["conv3"])       # (3, 64, H)
    H = params["conv3"]["w"].shape[0]

    # Fused-gate LSTM weights: x @ W_ih^T / h @ W_hh^T with gates i,f,g,o along lanes.
    wih = jnp.stack([lp["w_ih"].T for lp in params["lstm"]]).astype(f32)           # (L, H, 4H)
    whh = jnp.stack([lp["w_hh"].T for lp in params["lstm"]]).astype(f32)           # (L, H, 4H)
    bl = jnp.stack([(lp["b_ih"] + lp["b_hh"]).reshape(1, 4 * H)
                    for lp in params["lstm"]]).astype(f32)                         # (L, 1, 4H)

    return dict(
        conv1_w=w1.reshape(-1, w1.shape[-1]), conv1_b=b1,        # (7, 32)  [Cin = 1]
        conv2_w=w2, conv2_b=b2,
        conv3_w=w3, conv3_b=b3,
        lstm_wih=wih, lstm_whh=whh, lstm_b=bl,
        # fc1/fc2 weights as bf16: halves the (DMA-bound) HBM transfer; f32 accumulate.
        fc1_w=params["fc1_w"].T.astype(bf16), fc1_b=params["fc1_b"].reshape(1, -1).astype(f32),
        fc2_w=params["fc2_w"].T.astype(bf16), fc2_b=params["fc2_b"].reshape(1, -1).astype(f32),
        fc3_w=params["fc3_w"].reshape(1, -1).astype(f32),
        fc3_b=params["fc3_b"].reshape(1, 1).astype(f32),
    )


# ------------------------------ forward wrapper ---------------------------------

def cnn_lstm_forward(prep, x_bl):
    """x: (B, L) float32 -> logits (B,).  Matches PyTorch forward in eval mode."""
    B, L = x_bl.shape
    B_pad = ((B + 7) // 8) * 8                  # rows map to sublanes; pad to multiple of 8
    K1, S1 = 7, 5
    K2, S2 = 5, 3
    K3, S3 = 3, 1
    T1 = (L - K1) // S1 + 1
    T2 = (T1 - K2) // S2 + 1
    T3 = (T2 - K3) // S3 + 1
    H = prep["lstm_wih"].shape[1]
    num_layers = prep["lstm_wih"].shape[0]

    x = jnp.zeros((B_pad, L), jnp.float32).at[:B].set(x_bl.astype(jnp.float32))
    # conv1 im2col: one cheap gather in front of the single fused kernel.
    # Rows are time-major (row = t*B_pad + b) so in-kernel time slices are 8-aligned.
    idx = jnp.arange(T1)[:, None] * S1 + jnp.arange(K1)[None, :]          # (T1, K1)
    patches1 = jnp.transpose(x[:, idx], (1, 0, 2)).reshape(T1 * B_pad, K1)

    kernel = functools.partial(
        _fused_forward_kernel, B=B_pad, T2=T2, T3=T3,
        K2=K2, S2=S2, K3=K3, S3=S3, H=H, num_layers=num_layers)

    vmem = pl.BlockSpec(memory_space=pltpu.MemorySpace.VMEM)
    hbm = pl.BlockSpec(memory_space=pl.ANY)     # fc1_w / fc2_w: DMA'd manually in-kernel
    in_specs = [vmem] * 10 + [hbm, vmem, hbm, vmem, vmem, vmem]

    out = pl.pallas_call(
        kernel,
        out_shape=jax.ShapeDtypeStruct((B_pad, 128), jnp.float32),
        in_specs=in_specs,
        out_specs=vmem,
        scratch_shapes=[
            pltpu.VMEM(prep["fc1_w"].shape, prep["fc1_w"].dtype),   # fc1 weight landing buffer
            pltpu.VMEM(prep["fc2_w"].shape, prep["fc2_w"].dtype),   # fc2 weight landing buffer
            pltpu.SemaphoreType.DMA((2,)),
            pltpu.VMEM((T2 * B_pad, prep["conv2_w"].shape[-1]), jnp.float32),  # conv2 out
            pltpu.VMEM((T3 * B_pad, H), jnp.float32),                          # conv3 out / LSTM seq
        ],
    )(patches1,
      prep["conv1_w"], prep["conv1_b"],
      prep["conv2_w"], prep["conv2_b"],
      prep["conv3_w"], prep["conv3_b"],
      prep["lstm_wih"], prep["lstm_whh"], prep["lstm_b"],
      prep["fc1_w"], prep["fc1_b"],
      prep["fc2_w"], prep["fc2_b"],
      prep["fc3_w"], prep["fc3_b"])
    return out[:B, 0]                            # == fc(out[:, -1, :]).squeeze(1)


# ------------------------------ param init (PyTorch-shaped) ---------------------

def init_params(key, input_size, hidden_size, num_layers):
    assert input_size == 1, "forward() feeds a single-channel sequence to conv1"
    ks = iter(jax.random.split(key, 64))

    def nrm(shape, s=0.1):
        return s * jax.random.normal(next(ks), shape, jnp.float32)

    def pos(shape):
        return 0.5 + 0.5 * jax.random.uniform(next(ks), shape, dtype=jnp.float32)

    def conv_block(cin, cout, k):
        return dict(w=nrm((cout, cin, k)), b=nrm((cout,)),
                    bn_gamma=pos((cout,)), bn_beta=nrm((cout,)),
                    bn_mean=nrm((cout,)), bn_var=pos((cout,)))

    H = hidden_size
    return dict(
        conv1=conv_block(input_size, 32, 7),
        conv2=conv_block(32, 64, 5),
        conv3=conv_block(64, H, 3),
        lstm=[dict(w_ih=nrm((4 * H, H)), w_hh=nrm((4 * H, H)),
                   b_ih=nrm((4 * H,)), b_hh=nrm((4 * H,)))
              for _ in range(num_layers)],
        fc1_w=nrm((1024, H)), fc1_b=nrm((1024,)),
        fc2_w=nrm((128, 1024)), fc2_b=nrm((128,)),
        fc3_w=nrm((1, 128)), fc3_b=nrm((1,)),
    )


if __name__ == "__main__":
    B, L = 2, 128                       # L=128 -> conv lengths 25 -> 7 -> 5
    input_size, hidden_size, num_layers = 1, 32, 2
    key = jax.random.PRNGKey(0)
    kx, kp = jax.random.split(key)
    x = jax.random.normal(kx, (B, L), dtype=jnp.float32)
    params = init_params(kp, input_size, hidden_size, num_layers)

    prep = prepare_params(params)       # BN folding / transposes / gate fusion, outside jit
    fwd = jax.jit(cnn_lstm_forward)
    out = fwd(prep, x)
    jax.block_until_ready(out)
    assert out.shape == (B,), out.shape
    print("KERNEL_OK")
</pallas_src>

<mosaic_0001>
module attributes {stable_mosaic.version = 11 : i64} {
  func.func @_fused_forward_kernel(%arg0: memref<200x7xf32, #tpu.memory_space<vmem>>, %arg1: memref<7x32xf32, #tpu.memory_space<vmem>>, %arg2: memref<1x32xf32, #tpu.memory_space<vmem>>, %arg3: memref<5x32x64xf32, #tpu.memory_space<vmem>>, %arg4: memref<1x64xf32, #tpu.memory_space<vmem>>, %arg5: memref<3x64x32xf32, #tpu.memory_space<vmem>>, %arg6: memref<1x32xf32, #tpu.memory_space<vmem>>, %arg7: memref<2x32x128xf32, #tpu.memory_space<vmem>>, %arg8: memref<2x32x128xf32, #tpu.memory_space<vmem>>, %arg9: memref<2x1x128xf32, #tpu.memory_space<vmem>>, %arg10: memref<32x1024xbf16, #tpu.memory_space<any>>, %arg11: memref<1x1024xf32, #tpu.memory_space<vmem>>, %arg12: memref<1024x128xbf16, #tpu.memory_space<any>>, %arg13: memref<1x128xf32, #tpu.memory_space<vmem>>, %arg14: memref<1x128xf32, #tpu.memory_space<vmem>>, %arg15: memref<1x1xf32, #tpu.memory_space<vmem>>, %arg16: memref<8x128xf32, #tpu.memory_space<vmem>>, %arg17: memref<32x1024xbf16, #tpu.memory_space<vmem>>, %arg18: memref<1024x128xbf16, #tpu.memory_space<vmem>>, %arg19: memref<2x!tpu.dma_semaphore, #tpu.memory_space<semaphore_mem>>, %arg20: memref<56x64xf32, #tpu.memory_space<vmem>>, %arg21: memref<40x32xf32, #tpu.memory_space<vmem>>) attributes {dimension_semantics = [], scalar_prefetch = 0 : i64, scratch_operands = 5 : i64, tpu.core_type = #tpu.core_type<tc>} {
    %c0_i32 = arith.constant 0 : i32
    %0 = tpu.memref_slice %arg19[%c0_i32] : memref<2x!tpu.dma_semaphore, #tpu.memory_space<semaphore_mem>> -> memref<1x!tpu.dma_semaphore, #tpu.memory_space<semaphore_mem>>
    %1 = tpu.memref_squeeze %0 : memref<1x!tpu.dma_semaphore, #tpu.memory_space<semaphore_mem>> -> memref<!tpu.dma_semaphore, #tpu.memory_space<semaphore_mem>>
    tpu.enqueue_dma source(%arg10 : memref<32x1024xbf16, #tpu.memory_space<any>>) target(%arg17 : memref<32x1024xbf16, #tpu.memory_space<vmem>>) target_semaphore(%1 : memref<!tpu.dma_semaphore, #tpu.memory_space<semaphore_mem>>)
    %c1_i32 = arith.constant 1 : i32
    %2 = tpu.memref_slice %arg19[%c1_i32] : memref<2x!tpu.dma_semaphore, #tpu.memory_space<semaphore_mem>> -> memref<1x!tpu.dma_semaphore, #tpu.memory_space<semaphore_mem>>
    %3 = tpu.memref_squeeze %2 : memref<1x!tpu.dma_semaphore, #tpu.memory_space<semaphore_mem>> -> memref<!tpu.dma_semaphore, #tpu.memory_space<semaphore_mem>>
    tpu.enqueue_dma source(%arg12 : memref<1024x128xbf16, #tpu.memory_space<any>>) target(%arg18 : memref<1024x128xbf16, #tpu.memory_space<vmem>>) target_semaphore(%3 : memref<!tpu.dma_semaphore, #tpu.memory_space<semaphore_mem>>)
    %c0 = arith.constant 0 : index
    %c0_0 = arith.constant 0 : index
    %4 = vector.load %arg0[%c0, %c0_0] : memref<200x7xf32, #tpu.memory_space<vmem>>, vector<200x7xf32>
    %c0_1 = arith.constant 0 : index
    %c0_2 = arith.constant 0 : index
    %5 = vector.load %arg1[%c0_1, %c0_2] : memref<7x32xf32, #tpu.memory_space<vmem>>, vector<7x32xf32>
    %cst = arith.constant dense<0.000000e+00> : vector<200x32xf32>
    %6 = tpu.matmul %4, %5, %cst {dimension_numbers = #tpu.dot_dimension_numbers<[1], [0], [0], [1], [0, 0, 1, 1], [], []>} : vector<200x7xf32>, vector<7x32xf32>, vector<200x32xf32> -> vector<200x32xf32>
    %c0_3 = arith.constant 0 : index
    %c0_4 = arith.constant 0 : index
    %7 = vector.load %arg2[%c0_3, %c0_4] : memref<1x32xf32, #tpu.memory_space<vmem>>, vector<1x32xf32>
    %8 = vector.broadcast %7 : vector<1x32xf32> to vector<200x32xf32>
    %9 = arith.addf %6, %8 : vector<200x32xf32>
    %cst_5 = arith.constant 0.000000e+00 : f32
    %10 = vector.broadcast %cst_5 : f32 to vector<200x32xf32>
    %11 = arith.maximumf %9, %10 : vector<200x32xf32>
    %c0_6 = arith.constant 0 : index
    %c0_7 = arith.constant 0 : index
    %12 = vector.load %arg4[%c0_6, %c0_7] : memref<1x64xf32, #tpu.memory_space<vmem>>, vector<1x64xf32>
    %13 = vector.shape_cast %12 : vector<1x64xf32> to vector<1x64xf32>
    %14 = vector.broadcast %13 : vector<1x64xf32> to vector<8x64xf32>
    %c0_8 = arith.constant 0 : index
    %c0_9 = arith.constant 0 : index
    %c0_10 = arith.constant 0 : index
    %15 = vector.load %arg3[%c0_8, %c0_9, %c0_10] : memref<5x32x64xf32, #tpu.memory_space<vmem>>, vector<1x32x64xf32>
    %16 = vector.shape_cast %15 : vector<1x32x64xf32> to vector<32x64xf32>
    %cst_11 = arith.constant dense<0.000000e+00> : vector<200x64xf32>
    %17 = tpu.matmul %11, %16, %cst_11 {dimension_numbers = #tpu.dot_dimension_numbers<[1], [0], [0], [1], [0, 0, 1, 1], [], []>} : vector<200x32xf32>, vector<32x64xf32>, vector<200x64xf32> -> vector<200x64xf32>
    %18 = vector.extract_strided_slice %17 {offsets = [0, 0], sizes = [8, 64], strides = [1, 1]} : vector<200x64xf32> to vector<8x64xf32>
    %19 = arith.addf %14, %18 : vector<8x64xf32>
    %20 = vector.extract_strided_slice %17 {offsets = [24, 0], sizes = [8, 64], strides = [1, 1]} : vector<200x64xf32> to vector<8x64xf32>
    %21 = arith.addf %14, %20 : vector<8x64xf32>
    %22 = vector.extract_strided_slice %17 {offsets = [48, 0], sizes = [8, 64], strides = [1, 1]} : vector<200x64xf32> to vector<8x64xf32>
    %23 = arith.addf %14, %22 : vector<8x64xf32>
    %24 = vector.extract_strided_slice %17 {offsets = [72, 0], sizes = [8, 64], strides = [1, 1]} : vector<200x64xf32> to vector<8x64xf32>
    %25 = arith.addf %14, %24 : vector<8x64xf32>
    %26 = vector.extract_strided_slice %17 {offsets = [96, 0], sizes = [8, 64], strides = [1, 1]} : vector<200x64xf32> to vector<8x64xf32>
    %27 = arith.addf %14, %26 : vector<8x64xf32>
    %28 = vector.extract_strided_slice %17 {offsets = [120, 0], sizes = [8, 64], strides = [1, 1]} : vector<200x64xf32> to vector<8x64xf32>
    %29 = arith.addf %14, %28 : vector<8x64xf32>
    %30 = vector.extract_strided_slice %17 {offsets = [144, 0], sizes = [8, 64], strides = [1, 1]} : vector<200x64xf32> to vector<8x64xf32>
    %31 = arith.addf %14, %30 : vector<8x64xf32>
    %c1 = arith.constant 1 : index
    %c0_12 = arith.constant 0 : index
    %c0_13 = arith.constant 0 : index
    %32 = vector.load %arg3[%c1, %c0_12, %c0_13] : memref<5x32x64xf32, #tpu.memory_space<vmem>>, vector<1x32x64xf32>
    %33 = vector.shape_cast %32 : vector<1x32x64xf32> to vector<32x64xf32>
    %cst_14 = arith.constant dense<0.000000e+00> : vector<200x64xf32>
    %34 = tpu.matmul %11, %33, %cst_14 {dimension_numbers = #tpu.dot_dimension_numbers<[1], [0], [0], [1], [0, 0, 1, 1], [], []>} : vector<200x32xf32>, vector<32x64xf32>, vector<200x64xf32> -> vector<200x64xf32>
    %35 = vector.extract_strided_slice %34 {offsets = [8, 0], sizes = [8, 64], strides = [1, 1]} : vector<200x64xf32> to vector<8x64xf32>
    %36 = arith.addf %19, %35 : vector<8x64xf32>
    %37 = vector.extract_strided_slice %34 {offsets = [32, 0], sizes = [8, 64], strides = [1, 1]} : vector<200x64xf32> to vector<8x64xf32>
    %38 = arith.addf %21, %37 : vector<8x64xf32>
    %39 = vector.extract_strided_slice %34 {offsets = [56, 0], sizes = [8, 64], strides = [1, 1]} : vector<200x64xf32> to vector<8x64xf32>
    %40 = arith.addf %23, %39 : vector<8x64xf32>
    %41 = vector.extract_strided_slice %34 {offsets = [80, 0], sizes = [8, 64], strides = [1, 1]} : vector<200x64xf32> to vector<8x64xf32>
    %42 = arith.addf %25, %41 : vector<8x64xf32>
    %43 = vector.extract_strided_slice %34 {offsets = [104, 0], sizes = [8, 64], strides = [1, 1]} : vector<200x64xf32> to vector<8x64xf32>
    %44 = arith.addf %27, %43 : vector<8x64xf32>
    %45 = vector.extract_strided_slice %34 {offsets = [128, 0], sizes = [8, 64], strides = [1, 1]} : vector<200x64xf32> to vector<8x64xf32>
    %46 = arith.addf %29, %45 : vector<8x64xf32>
    %47 = vector.extract_strided_slice %34 {offsets = [152, 0], sizes = [8, 64], strides = [1, 1]} : vector<200x64xf32> to vector<8x64xf32>
    %48 = arith.addf %31, %47 : vector<8x64xf32>
    %c2 = arith.constant 2 : index
    %c0_15 = arith.constant 0 : index
    %c0_16 = arith.constant 0 : index
    %49 = vector.load %arg3[%c2, %c0_15, %c0_16] : memref<5x32x64xf32, #tpu.memory_space<vmem>>, vector<1x32x64xf32>
    %50 = vector.shape_cast %49 : vector<1x32x64xf32> to vector<32x64xf32>
    %cst_17 = arith.constant dense<0.000000e+00> : vector<200x64xf32>
    %51 = tpu.matmul %11, %50, %cst_17 {dimension_numbers = #tpu.dot_dimension_numbers<[1], [0], [0], [1], [0, 0, 1, 1], [], []>} : vector<200x32xf32>, vector<32x64xf32>, vector<200x64xf32> -> vector<200x64xf32>
    %52 = vector.extract_strided_slice %51 {offsets = [16, 0], sizes = [8, 64], strides = [1, 1]} : vector<200x64xf32> to vector<8x64xf32>
    %53 = arith.addf %36, %52 : vector<8x64xf32>
    %54 = vector.extract_strided_slice %51 {offsets = [40, 0], sizes = [8, 64], strides = [1, 1]} : vector<200x64xf32> to vector<8x64xf32>
    %55 = arith.addf %38, %54 : vector<8x64xf32>
    %56 = vector.extract_strided_slice %51 {offsets = [64, 0], sizes = [8, 64], strides = [1, 1]} : vector<200x64xf32> to vector<8x64xf32>
    %57 = arith.addf %40, %56 : vector<8x64xf32>
    %58 = vector.extract_strided_slice %51 {offsets = [88, 0], sizes = [8, 64], strides = [1, 1]} : vector<200x64xf32> to vector<8x64xf32>
    %59 = arith.addf %42, %58 : vector<8x64xf32>
    %60 = vector.extract_strided_slice %51 {offsets = [112, 0], sizes = [8, 64], strides = [1, 1]} : vector<200x64xf32> to vector<8x64xf32>
    %61 = arith.addf %44, %60 : vector<8x64xf32>
    %62 = vector.extract_strided_slice %51 {offsets = [136, 0], sizes = [8, 64], strides = [1, 1]} : vector<200x64xf32> to vector<8x64xf32>
    %63 = arith.addf %46, %62 : vector<8x64xf32>
    %64 = vector.extract_strided_slice %51 {offsets = [160, 0], sizes = [8, 64], strides = [1, 1]} : vector<200x64xf32> to vector<8x64xf32>
    %65 = arith.addf %48, %64 : vector<8x64xf32>
    %c3 = arith.constant 3 : index
    %c0_18 = arith.constant 0 : index
    %c0_19 = arith.constant 0 : index
    %66 = vector.load %arg3[%c3, %c0_18, %c0_19] : memref<5x32x64xf32, #tpu.memory_space<vmem>>, vector<1x32x64xf32>
    %67 = vector.shape_cast %66 : vector<1x32x64xf32> to vector<32x64xf32>
    %cst_20 = arith.constant dense<0.000000e+00> : vector<200x64xf32>
    %68 = tpu.matmul %11, %67, %cst_20 {dimension_numbers = #tpu.dot_dimension_numbers<[1], [0], [0], [1], [0, 0, 1, 1], [], []>} : vector<200x32xf32>, vector<32x64xf32>, vector<200x64xf32> -> vector<200x64xf32>
    %69 = vector.extract_strided_slice %68 {offsets = [24, 0], sizes = [8, 64], strides = [1, 1]} : vector<200x64xf32> to vector<8x64xf32>
    %70 = arith.addf %53, %69 : vector<8x64xf32>
    %71 = vector.extract_strided_slice %68 {offsets = [48, 0], sizes = [8, 64], strides = [1, 1]} : vector<200x64xf32> to vector<8x64xf32>
    %72 = arith.addf %55, %71 : vector<8x64xf32>
    %73 = vector.extract_strided_slice %68 {offsets = [72, 0], sizes = [8, 64], strides = [1, 1]} : vector<200x64xf32> to vector<8x64xf32>
    %74 = arith.addf %57, %73 : vector<8x64xf32>
    %75 = vector.extract_strided_slice %68 {offsets = [96, 0], sizes = [8, 64], strides = [1, 1]} : vector<200x64xf32> to vector<8x64xf32>
    %76 = arith.addf %59, %75 : vector<8x64xf32>
    %77 = vector.extract_strided_slice %68 {offsets = [120, 0], sizes = [8, 64], strides = [1, 1]} : vector<200x64xf32> to vector<8x64xf32>
    %78 = arith.addf %61, %77 : vector<8x64xf32>
    %79 = vector.extract_strided_slice %68 {offsets = [144, 0], sizes = [8, 64], strides = [1, 1]} : vector<200x64xf32> to vector<8x64xf32>
    %80 = arith.addf %63, %79 : vector<8x64xf32>
    %81 = vector.extract_strided_slice %68 {offsets = [168, 0], sizes = [8, 64], strides = [1, 1]} : vector<200x64xf32> to vector<8x64xf32>
    %82 = arith.addf %65, %81 : vector<8x64xf32>
    %c4 = arith.constant 4 : index
    %c0_21 = arith.constant 0 : index
    %c0_22 = arith.constant 0 : index
    %83 = vector.load %arg3[%c4, %c0_21, %c0_22] : memref<5x32x64xf32, #tpu.memory_space<vmem>>, vector<1x32x64xf32>
    %84 = vector.shape_cast %83 : vector<1x32x64xf32> to vector<32x64xf32>
    %cst_23 = arith.constant dense<0.000000e+00> : vector<200x64xf32>
    %85 = tpu.matmul %11, %84, %cst_23 {dimension_numbers = #tpu.dot_dimension_numbers<[1], [0], [0], [1], [0, 0, 1, 1], [], []>} : vector<200x32xf32>, vector<32x64xf32>, vector<200x64xf32> -> vector<200x64xf32>
    %86 = vector.extract_strided_slice %85 {offsets = [32, 0], sizes = [8, 64], strides = [1, 1]} : vector<200x64xf32> to vector<8x64xf32>
    %87 = arith.addf %70, %86 : vector<8x64xf32>
    %88 = vector.extract_strided_slice %85 {offsets = [56, 0], sizes = [8, 64], strides = [1, 1]} : vector<200x64xf32> to vector<8x64xf32>
    %89 = arith.addf %72, %88 : vector<8x64xf32>
    %90 = vector.extract_strided_slice %85 {offsets = [80, 0], sizes = [8, 64], strides = [1, 1]} : vector<200x64xf32> to vector<8x64xf32>
    %91 = arith.addf %74, %90 : vector<8x64xf32>
    %92 = vector.extract_strided_slice %85 {offsets = [104, 0], sizes = [8, 64], strides = [1, 1]} : vector<200x64xf32> to vector<8x64xf32>
    %93 = arith.addf %76, %92 : vector<8x64xf32>
    %94 = vector.extract_strided_slice %85 {offsets = [128, 0], sizes = [8, 64], strides = [1, 1]} : vector<200x64xf32> to vector<8x64xf32>
    %95 = arith.addf %78, %94 : vector<8x64xf32>
    %96 = vector.extract_strided_slice %85 {offsets = [152, 0], sizes = [8, 64], strides = [1, 1]} : vector<200x64xf32> to vector<8x64xf32>
    %97 = arith.addf %80, %96 : vector<8x64xf32>
    %98 = vector.extract_strided_slice %85 {offsets = [176, 0], sizes = [8, 64], strides = [1, 1]} : vector<200x64xf32> to vector<8x64xf32>
    %99 = arith.addf %82, %98 : vector<8x64xf32>
    %cst_24 = arith.constant 0.000000e+00 : f32
    %100 = vector.broadcast %cst_24 : f32 to vector<8x64xf32>
    %101 = arith.maximumf %87, %100 : vector<8x64xf32>
    %c0_25 = arith.constant 0 : index
    %c0_26 = arith.constant 0 : index
    %102 = vector.load %arg20[%c0_25, %c0_26] : memref<56x64xf32, #tpu.memory_space<vmem>>, vector<8x64xf32>
    tpu.vector_store %arg20[%c0_25, %c0_26], %101 {strides = array<i32>} : memref<56x64xf32, #tpu.memory_space<vmem>>, vector<8x64xf32>,
    %cst_27 = arith.constant 0.000000e+00 : f32
    %103 = vector.broadcast %cst_27 : f32 to vector<8x64xf32>
    %104 = arith.maximumf %89, %103 : vector<8x64xf32>
    %c8 = arith.constant 8 : index
    %c0_28 = arith.constant 0 : index
    %105 = vector.load %arg20[%c8, %c0_28] : memref<56x64xf32, #tpu.memory_space<vmem>>, vector<8x64xf32>
    tpu.vector_store %arg20[%c8, %c0_28], %104 {strides = array<i32>} : memref<56x64xf32, #tpu.memory_space<vmem>>, vector<8x64xf32>,
    %cst_29 = arith.constant 0.000000e+00 : f32
    %106 = vector.broadcast %cst_29 : f32 to vector<8x64xf32>
    %107 = arith.maximumf %91, %106 : vector<8x64xf32>
    %c16 = arith.constant 16 : index
    %c0_30 = arith.constant 0 : index
    %108 = vector.load %arg20[%c16, %c0_30] : memref<56x64xf32, #tpu.memory_space<vmem>>, vector<8x64xf32>
    tpu.vector_store %arg20[%c16, %c0_30], %107 {strides = array<i32>} : memref<56x64xf32, #tpu.memory_space<vmem>>, vector<8x64xf32>,
    %cst_31 = arith.constant 0.000000e+00 : f32
    %109 = vector.broadcast %cst_31 : f32 to vector<8x64xf32>
    %110 = arith.maximumf %93, %109 : vector<8x64xf32>
    %c24 = arith.constant 24 : index
    %c0_32 = arith.constant 0 : index
    %111 = vector.load %arg20[%c24, %c0_32] : memref<56x64xf32, #tpu.memory_space<vmem>>, vector<8x64xf32>
    tpu.vector_store %arg20[%c24, %c0_32], %110 {strides = array<i32>} : memref<56x64xf32, #tpu.memory_space<vmem>>, vector<8x64xf32>,
    %cst_33 = arith.constant 0.000000e+00 : f32
    %112 = vector.broadcast %cst_33 : f32 to vector<8x64xf32>
    %113 = arith.maximumf %95, %112 : vector<8x64xf32>
    %c32 = arith.constant 32 : index
    %c0_34 = arith.constant 0 : index
    %114 = vector.load %arg20[%c32, %c0_34] : memref<56x64xf32, #tpu.memory_space<vmem>>, vector<8x64xf32>
    tpu.vector_store %arg20[%c32, %c0_34], %113 {strides = array<i32>} : memref<56x64xf32, #tpu.memory_space<vmem>>, vector<8x64xf32>,
    %cst_35 = arith.constant 0.000000e+00 : f32
    %115 = vector.broadcast %cst_35 : f32 to vector<8x64xf32>
    %116 = arith.maximumf %97, %115 : vector<8x64xf32>
    %c40 = arith.constant 40 : index
    %c0_36 = arith.constant 0 : index
    %117 = vector.load %arg20[%c40, %c0_36] : memref<56x64xf32, #tpu.memory_space<vmem>>, vector<8x64xf32>
    tpu.vector_store %arg20[%c40, %c0_36], %116 {strides = array<i32>} : memref<56x64xf32, #tpu.memory_space<vmem>>, vector<8x64xf32>,
    %cst_37 = arith.constant 0.000000e+00 : f32
    %118 = vector.broadcast %cst_37 : f32 to vector<8x64xf32>
    %119 = arith.maximumf %99, %118 : vector<8x64xf32>
    %c48 = arith.constant 48 : index
    %c0_38 = arith.constant 0 : index
    %120 = vector.load %arg20[%c48, %c0_38] : memref<56x64xf32, #tpu.memory_space<vmem>>, vector<8x64xf32>
    tpu.vector_store %arg20[%c48, %c0_38], %119 {strides = array<i32>} : memref<56x64xf32, #tpu.memory_space<vmem>>, vector<8x64xf32>,
    %c0_39 = arith.constant 0 : index
    %c0_40 = arith.constant 0 : index
    %121 = vector.load %arg20[%c0_39, %c0_40] : memref<56x64xf32, #tpu.memory_space<vmem>>, vector<56x64xf32>
    %c0_41 = arith.constant 0 : index
    %c0_42 = arith.constant 0 : index
    %122 = vector.load %arg6[%c0_41, %c0_42] : memref<1x32xf32, #tpu.memory_space<vmem>>, vector<1x32xf32>
    %123 = vector.shape_cast %122 : vector<1x32xf32> to vector<1x32xf32>
    %124 = vector.broadcast %123 : vector<1x32xf32> to vector<8x32xf32>
    %c0_43 = arith.constant 0 : index
    %c0_44 = arith.constant 0 : index
    %c0_45 = arith.constant 0 : index
    %125 = vector.load %arg5[%c0_43, %c0_44, %c0_45] : memref<3x64x32xf32, #tpu.memory_space<vmem>>, vector<1x64x32xf32>
    %126 = vector.shape_cast %125 : vector<1x64x32xf32> to vector<64x32xf32>
    %cst_46 = arith.constant dense<0.000000e+00> : vector<56x32xf32>
    %127 = tpu.matmul %121, %126, %cst_46 {dimension_numbers = #tpu.dot_dimension_numbers<[1], [0], [0], [1], [0, 0, 1, 1], [], []>} : vector<56x64xf32>, vector<64x32xf32>, vector<56x32xf32> -> vector<56x32xf32>
    %128 = vector.extract_strided_slice %127 {offsets = [0, 0], sizes = [8, 32], strides = [1, 1]} : vector<56x32xf32> to vector<8x32xf32>
    %129 = arith.addf %124, %128 : vector<8x32xf32>
    %130 = vector.extract_strided_slice %127 {offsets = [8, 0], sizes = [8, 32], strides = [1, 1]} : vector<56x32xf32> to vector<8x32xf32>
    %131 = arith.addf %124, %130 : vector<8x32xf32>
    %132 = vector.extract_strided_slice %127 {offsets = [16, 0], sizes = [8, 32], strides = [1, 1]} : vector<56x32xf32> to vector<8x32xf32>
    %133 = arith.addf %124, %132 : vector<8x32xf32>
    %134 = vector.extract_strided_slice %127 {offsets = [24, 0], sizes = [8, 32], strides = [1, 1]} : vector<56x32xf32> to vector<8x32xf32>
    %135 = arith.addf %124, %134 : vector<8x32xf32>
    %136 = vector.extract_strided_slice %127 {offsets = [32, 0], sizes = [8, 32], strides = [1, 1]} : vector<56x32xf32> to vector<8x32xf32>
    %137 = arith.addf %124, %136 : vector<8x32xf32>
    %c1_47 = arith.constant 1 : index
    %c0_48 = arith.constant 0 : index
    %c0_49 = arith.constant 0 : index
    %138 = vector.load %arg5[%c1_47, %c0_48, %c0_49] : memref<3x64x32xf32, #tpu.memory_space<vmem>>, vector<1x64x32xf32>
    %139 = vector.shape_cast %138 : vector<1x64x32xf32> to vector<64x32xf32>
    %cst_50 = arith.constant dense<0.000000e+00> : vector<56x32xf32>
    %140 = tpu.matmul %121, %139, %cst_50 {dimension_numbers = #tpu.dot_dimension_numbers<[1], [0], [0], [1], [0, 0, 1, 1], [], []>} : vector<56x64xf32>, vector<64x32xf32>, vector<56x32xf32> -> vector<56x32xf32>
    %141 = vector.extract_strided_slice %140 {offsets = [8, 0], sizes = [8, 32], strides = [1, 1]} : vector<56x32xf32> to vector<8x32xf32>
    %142 = arith.addf %129, %141 : vector<8x32xf32>
    %143 = vector.extract_strided_slice %140 {offsets = [16, 0], sizes = [8, 32], strides = [1, 1]} : vector<56x32xf32> to vector<8x32xf32>
    %144 = arith.addf %131, %143 : vector<8x32xf32>
    %145 = vector.extract_strided_slice %140 {offsets = [24, 0], sizes = [8, 32], strides = [1, 1]} : vector<56x32xf32> to vector<8x32xf32>
    %146 = arith.addf %133, %145 : vector<8x32xf32>
    %147 = vector.extract_strided_slice %140 {offsets = [32, 0], sizes = [8, 32], strides = [1, 1]} : vector<56x32xf32> to vector<8x32xf32>
    %148 = arith.addf %135, %147 : vector<8x32xf32>
    %149 = vector.extract_strided_slice %140 {offsets = [40, 0], sizes = [8, 32], strides = [1, 1]} : vector<56x32xf32> to vector<8x32xf32>
    %150 = arith.addf %137, %149 : vector<8x32xf32>
    %c2_51 = arith.constant 2 : index
    %c0_52 = arith.constant 0 : index
    %c0_53 = arith.constant 0 : index
    %151 = vector.load %arg5[%c2_51, %c0_52, %c0_53] : memref<3x64x32xf32, #tpu.memory_space<vmem>>, vector<1x64x32xf32>
    %152 = vector.shape_cast %151 : vector<1x64x32xf32> to vector<64x32xf32>
    %cst_54 = arith.constant dense<0.000000e+00> : vector<56x32xf32>
    %153 = tpu.matmul %121, %152, %cst_54 {dimension_numbers = #tpu.dot_dimension_numbers<[1], [0], [0], [1], [0, 0, 1, 1], [], []>} : vector<56x64xf32>, vector<64x32xf32>, vector<56x32xf32> -> vector<56x32xf32>
    %154 = vector.extract_strided_slice %153 {offsets = [16, 0], sizes = [8, 32], strides = [1, 1]} : vector<56x32xf32> to vector<8x32xf32>
    %155 = arith.addf %142, %154 : vector<8x32xf32>
    %156 = vector.extract_strided_slice %153 {offsets = [24, 0], sizes = [8, 32], strides = [1, 1]} : vector<56x32xf32> to vector<8x32xf32>
    %157 = arith.addf %144, %156 : vector<8x32xf32>
    %158 = vector.extract_strided_slice %153 {offsets = [32, 0], sizes = [8, 32], strides = [1, 1]} : vector<56x32xf32> to vector<8x32xf32>
    %159 = arith.addf %146, %158 : vector<8x32xf32>
    %160 = vector.extract_strided_slice %153 {offsets = [40, 0], sizes = [8, 32], strides = [1, 1]} : vector<56x32xf32> to vector<8x32xf32>
    %161 = arith.addf %148, %160 : vector<8x32xf32>
    %162 = vector.extract_strided_slice %153 {offsets = [48, 0], sizes = [8, 32], strides = [1, 1]} : vector<56x32xf32> to vector<8x32xf32>
    %163 = arith.addf %150, %162 : vector<8x32xf32>
    %cst_55 = arith.constant 0.000000e+00 : f32
    %164 = vector.broadcast %cst_55 : f32 to vector<8x32xf32>
    %165 = arith.maximumf %155, %164 : vector<8x32xf32>
    %c0_56 = arith.constant 0 : index
    %c0_57 = arith.constant 0 : index
    %166 = vector.load %arg21[%c0_56, %c0_57] : memref<40x32xf32, #tpu.memory_space<vmem>>, vector<8x32xf32>
    tpu.vector_store %arg21[%c0_56, %c0_57], %165 {strides = array<i32>} : memref<40x32xf32, #tpu.memory_space<vmem>>, vector<8x32xf32>,
    %cst_58 = arith.constant 0.000000e+00 : f32
    %167 = vector.broadcast %cst_58 : f32 to vector<8x32xf32>
    %168 = arith.maximumf %157, %167 : vector<8x32xf32>
    %c8_59 = arith.constant 8 : index
    %c0_60 = arith.constant 0 : index
    %169 = vector.load %arg21[%c8_59, %c0_60] : memref<40x32xf32, #tpu.memory_space<vmem>>, vector<8x32xf32>
    tpu.vector_store %arg21[%c8_59, %c0_60], %168 {strides = array<i32>} : memref<40x32xf32, #tpu.memory_space<vmem>>, vector<8x32xf32>,
    %cst_61 = arith.constant 0.000000e+00 : f32
    %170 = vector.broadcast %cst_61 : f32 to vector<8x32xf32>
    %171 = arith.maximumf %159, %170 : vector<8x32xf32>
    %c16_62 = arith.constant 16 : index
    %c0_63 = arith.constant 0 : index
    %172 = vector.load %arg21[%c16_62, %c0_63] : memref<40x32xf32, #tpu.memory_space<vmem>>, vector<8x32xf32>
    tpu.vector_store %arg21[%c16_62, %c0_63], %171 {strides = array<i32>} : memref<40x32xf32, #tpu.memory_space<vmem>>, vector<8x32xf32>,
    %cst_64 = arith.constant 0.000000e+00 : f32
    %173 = vector.broadcast %cst_64 : f32 to vector<8x32xf32>
    %174 = arith.maximumf %161, %173 : vector<8x32xf32>
    %c24_65 = arith.constant 24 : index
    %c0_66 = arith.constant 0 : index
    %175 = vector.load %arg21[%c24_65, %c0_66] : memref<40x32xf32, #tpu.memory_space<vmem>>, vector<8x32xf32>
    tpu.vector_store %arg21[%c24_65, %c0_66], %174 {strides = array<i32>} : memref<40x32xf32, #tpu.memory_space<vmem>>, vector<8x32xf32>,
    %cst_67 = arith.constant 0.000000e+00 : f32
    %176 = vector.broadcast %cst_67 : f32 to vector<8x32xf32>
    %177 = arith.maximumf %163, %176 : vector<8x32xf32>
    %c32_68 = arith.constant 32 : index
    %c0_69 = arith.constant 0 : index
    %178 = vector.load %arg21[%c32_68, %c0_69] : memref<40x32xf32, #tpu.memory_space<vmem>>, vector<8x32xf32>
    tpu.vector_store %arg21[%c32_68, %c0_69], %177 {strides = array<i32>} : memref<40x32xf32, #tpu.memory_space<vmem>>, vector<8x32xf32>,
    %c0_70 = arith.constant 0 : index
    %c0_71 = arith.constant 0 : index
    %179 = vector.load %arg21[%c0_70, %c0_71] : memref<40x32xf32, #tpu.memory_space<vmem>>, vector<40x32xf32>
    %c0_72 = arith.constant 0 : index
    %c0_73 = arith.constant 0 : index
    %c0_74 = arith.constant 0 : index
    %180 = vector.load %arg7[%c0_72, %c0_73, %c0_74] : memref<2x32x128xf32, #tpu.memory_space<vmem>>, vector<1x32x128xf32>
    %181 = vector.shape_cast %180 : vector<1x32x128xf32> to vector<32x128xf32>
    %cst_75 = arith.constant dense<0.000000e+00> : vector<40x128xf32>
    %182 = tpu.matmul %179, %181, %cst_75 {dimension_numbers = #tpu.dot_dimension_numbers<[1], [0], [0], [1], [0, 0, 1, 1], [], []>} : vector<40x32xf32>, vector<32x128xf32>, vector<40x128xf32> -> vector<40x128xf32>
    %c0_76 = arith.constant 0 : index
    %c0_77 = arith.constant 0 : index
    %c0_78 = arith.constant 0 : index
    %183 = vector.load %arg9[%c0_76, %c0_77, %c0_78] : memref<2x1x128xf32, #tpu.memory_space<vmem>>, vector<1x1x128xf32>
    %184 = vector.shape_cast %183 : vector<1x1x128xf32> to vector<1x128xf32>
    %185 = vector.broadcast %184 : vector<1x128xf32> to vector<40x128xf32>
    %186 = arith.addf %182, %185 : vector<40x128xf32>
    %cst_79 = arith.constant 0.000000e+00 : f32
    %187 = vector.broadcast %cst_79 : f32 to vector<8x32xf32>
    %cst_80 = arith.constant 0.000000e+00 : f32
    %188 = vector.broadcast %cst_80 : f32 to vector<8x32xf32>
    %189 = vector.extract_strided_slice %186 {offsets = [0, 0], sizes = [8, 128], strides = [1, 1]} : vector<40x128xf32> to vector<8x128xf32>
    %c0_81 = arith.constant 0 : index
    %c0_82 = arith.constant 0 : index
    %c0_83 = arith.constant 0 : index
    %190 = vector.load %arg8[%c0_81, %c0_82, %c0_83] : memref<2x32x128xf32, #tpu.memory_space<vmem>>, vector<1x32x128xf32>
    %191 = vector.shape_cast %190 : vector<1x32x128xf32> to vector<32x128xf32>
    %cst_84 = arith.constant dense<0.000000e+00> : vector<8x128xf32>
    %192 = tpu.matmul %187, %191, %cst_84 {dimension_numbers = #tpu.dot_dimension_numbers<[1], [0], [0], [1], [0, 0, 1, 1], [], []>} : vector<8x32xf32>, vector<32x128xf32>, vector<8x128xf32> -> vector<8x128xf32>
    %193 = arith.addf %189, %192 : vector<8x128xf32>
    %194 = arith.negf %193 : vector<8x128xf32>
    %195 = math.exp %194 : vector<8x128xf32>
    %cst_85 = arith.constant 1.000000e+00 : f32
    %196 = vector.broadcast %cst_85 : f32 to vector<8x128xf32>
    %197 = arith.addf %196, %195 : vector<8x128xf32>
    %198 = arith.divf %196, %197 : vector<8x128xf32>
    %199 = math.tanh %193 : vector<8x128xf32>
    %200 = vector.extract_strided_slice %198 {offsets = [0, 0], sizes = [8, 32], strides = [1, 1]} : vector<8x128xf32> to vector<8x32xf32>
    %201 = vector.extract_strided_slice %198 {offsets = [0, 32], sizes = [8, 32], strides = [1, 1]} : vector<8x128xf32> to vector<8x32xf32>
    %202 = vector.extract_strided_slice %199 {offsets = [0, 64], sizes = [8, 32], strides = [1, 1]} : vector<8x128xf32> to vector<8x32xf32>
    %203 = vector.extract_strided_slice %198 {offsets = [0, 96], sizes = [8, 32], strides = [1, 1]} : vector<8x128xf32> to vector<8x32xf32>
    %204 = arith.mulf %201, %188 : vector<8x32xf32>
    %205 = arith.mulf %200, %202 : vector<8x32xf32>
    %206 = arith.addf %204, %205 : vector<8x32xf32>
    %207 = math.tanh %206 : vector<8x32xf32>
    %208 = arith.mulf %203, %207 : vector<8x32xf32>
    %c0_86 = arith.constant 0 : index
    %c0_87 = arith.constant 0 : index
    %209 = vector.load %arg21[%c0_86, %c0_87] : memref<40x32xf32, #tpu.memory_space<vmem>>, vector<8x32xf32>
    tpu.vector_store %arg21[%c0_86, %c0_87], %208 {strides = array<i32>} : memref<40x32xf32, #tpu.memory_space<vmem>>, vector<8x32xf32>,
    %210 = vector.extract_strided_slice %186 {offsets = [8, 0], sizes = [8, 128], strides = [1, 1]} : vector<40x128xf32> to vector<8x128xf32>
    %c0_88 = arith.constant 0 : index
    %c0_89 = arith.constant 0 : index
    %c0_90 = arith.constant 0 : index
    %211 = vector.load %arg8[%c0_88, %c0_89, %c0_90] : memref<2x32x128xf32, #tpu.memory_space<vmem>>, vector<1x32x128xf32>
    %212 = vector.shape_cast %211 : vector<1x32x128xf32> to vector<32x128xf32>
    %cst_91 = arith.constant dense<0.000000e+00> : vector<8x128xf32>
    %213 = tpu.matmul %208, %212, %cst_91 {dimension_numbers = #tpu.dot_dimension_numbers<[1], [0], [0], [1], [0, 0, 1, 1], [], []>} : vector<8x32xf32>, vector<32x128xf32>, vector<8x128xf32> -> vector<8x128xf32>
    %214 = arith.addf %210, %213 : vector<8x128xf32>
    %215 = arith.negf %214 : vector<8x128xf32>
    %216 = math.exp %215 : vector<8x128xf32>
    %cst_92 = arith.constant 1.000000e+00 : f32
    %217 = vector.broadcast %cst_92 : f32 to vector<8x128xf32>
    %218 = arith.addf %217, %216 : vector<8x128xf32>
    %219 = arith.divf %217, %218 : vector<8x128xf32>
    %220 = math.tanh %214 : vector<8x128xf32>
    %221 = vector.extract_strided_slice %219 {offsets = [0, 0], sizes = [8, 32], strides = [1, 1]} : vector<8x128xf32> to vector<8x32xf32>
    %222 = vector.extract_strided_slice %219 {offsets = [0, 32], sizes = [8, 32], strides = [1, 1]} : vector<8x128xf32> to vector<8x32xf32>
    %223 = vector.extract_strided_slice %220 {offsets = [0, 64], sizes = [8, 32], strides = [1, 1]} : vector<8x128xf32> to vector<8x32xf32>
    %224 = vector.extract_strided_slice %219 {offsets = [0, 96], sizes = [8, 32], strides = [1, 1]} : vector<8x128xf32> to vector<8x32xf32>
    %225 = arith.mulf %222, %206 : vector<8x32xf32>
    %226 = arith.mulf %221, %223 : vector<8x32xf32>
    %227 = arith.addf %225, %226 : vector<8x32xf32>
    %228 = math.tanh %227 : vector<8x32xf32>
    %229 = arith.mulf %224, %228 : vector<8x32xf32>
    %c8_93 = arith.constant 8 : index
    %c0_94 = arith.constant 0 : index
    %230 = vector.load %arg21[%c8_93, %c0_94] : memref<40x32xf32, #tpu.memory_space<vmem>>, vector<8x32xf32>
    tpu.vector_store %arg21[%c8_93, %c0_94], %229 {strides = array<i32>} : memref<40x32xf32, #tpu.memory_space<vmem>>, vector<8x32xf32>,
    %231 = vector.extract_strided_slice %186 {offsets = [16, 0], sizes = [8, 128], strides = [1, 1]} : vector<40x128xf32> to vector<8x128xf32>
    %c0_95 = arith.constant 0 : index
    %c0_96 = arith.constant 0 : index
    %c0_97 = arith.constant 0 : index
    %232 = vector.load %arg8[%c0_95, %c0_96, %c0_97] : memref<2x32x128xf32, #tpu.memory_space<vmem>>, vector<1x32x128xf32>
    %233 = vector.shape_cast %232 : vector<1x32x128xf32> to vector<32x128xf32>
    %cst_98 = arith.constant dense<0.000000e+00> : vector<8x128xf32>
    %234 = tpu.matmul %229, %233, %cst_98 {dimension_numbers = #tpu.dot_dimension_numbers<[1], [0], [0], [1], [0, 0, 1, 1], [], []>} : vector<8x32xf32>, vector<32x128xf32>, vector<8x128xf32> -> vector<8x128xf32>
    %235 = arith.addf %231, %234 : vector<8x128xf32>
    %236 = arith.negf %235 : vector<8x128xf32>
    %237 = math.exp %236 : vector<8x128xf32>
    %cst_99 = arith.constant 1.000000e+00 : f32
    %238 = vector.broadcast %cst_99 : f32 to vector<8x128xf32>
    %239 = arith.addf %238, %237 : vector<8x128xf32>
    %240 = arith.divf %238, %239 : vector<8x128xf32>
    %241 = math.tanh %235 : vector<8x128xf32>
    %242 = vector.extract_strided_slice %240 {offsets = [0, 0], sizes = [8, 32], strides = [1, 1]} : vector<8x128xf32> to vector<8x32xf32>
    %243 = vector.extract_strided_slice %240 {offsets = [0, 32], sizes = [8, 32], strides = [1, 1]} : vector<8x128xf32> to vector<8x32xf32>
    %244 = vector.extract_strided_slice %241 {offsets = [0, 64], sizes = [8, 32], strides = [1, 1]} : vector<8x128xf32> to vector<8x32xf32>
    %245 = vector.extract_strided_slice %240 {offsets = [0, 96], sizes = [8, 32], strides = [1, 1]} : vector<8x128xf32> to vector<8x32xf32>
    %246 = arith.mulf %243, %227 : vector<8x32xf32>
    %247 = arith.mulf %242, %244 : vector<8x32xf32>
    %248 = arith.addf %246, %247 : vector<8x32xf32>
    %249 = math.tanh %248 : vector<8x32xf32>
    %250 = arith.mulf %245, %249 : vector<8x32xf32>
    %c16_100 = arith.constant 16 : index
    %c0_101 = arith.constant 0 : index
    %251 = vector.load %arg21[%c16_100, %c0_101] : memref<40x32xf32, #tpu.memory_space<vmem>>, vector<8x32xf32>
    tpu.vector_store %arg21[%c16_100, %c0_101], %250 {strides = array<i32>} : memref<40x32xf32, #tpu.memory_space<vmem>>, vector<8x32xf32>,
    %252 = vector.extract_strided_slice %186 {offsets = [24, 0], sizes = [8, 128], strides = [1, 1]} : vector<40x128xf32> to vector<8x128xf32>
    %c0_102 = arith.constant 0 : index
    %c0_103 = arith.constant 0 : index
    %c0_104 = arith.constant 0 : index
    %253 = vector.load %arg8[%c0_102, %c0_103, %c0_104] : memref<2x32x128xf32, #tpu.memory_space<vmem>>, vector<1x32x128xf32>
    %254 = vector.shape_cast %253 : vector<1x32x128xf32> to vector<32x128xf32>
    %cst_105 = arith.constant dense<0.000000e+00> : vector<8x128xf32>
    %255 = tpu.matmul %250, %254, %cst_105 {dimension_numbers = #tpu.dot_dimension_numbers<[1], [0], [0], [1], [0, 0, 1, 1], [], []>} : vector<8x32xf32>, vector<32x128xf32>, vector<8x128xf32> -> vector<8x128xf32>
    %256 = arith.addf %252, %255 : vector<8x128xf32>
    %257 = arith.negf %256 : vector<8x128xf32>
    %258 = math.exp %257 : vector<8x128xf32>
    %cst_106 = arith.constant 1.000000e+00 : f32
    %259 = vector.broadcast %cst_106 : f32 to vector<8x128xf32>
    %260 = arith.addf %259, %258 : vector<8x128xf32>
    %261 = arith.divf %259, %260 : vector<8x128xf32>
    %262 = math.tanh %256 : vector<8x128xf32>
    %263 = vector.extract_strided_slice %261 {offsets = [0, 0], sizes = [8, 32], strides = [1, 1]} : vector<8x128xf32> to vector<8x32xf32>
    %264 = vector.extract_strided_slice %261 {offsets = [0, 32], sizes = [8, 32], strides = [1, 1]} : vector<8x128xf32> to vector<8x32xf32>
    %265 = vector.extract_strided_slice %262 {offsets = [0, 64], sizes = [8, 32], strides = [1, 1]} : vector<8x128xf32> to vector<8x32xf32>
    %266 = vector.extract_strided_slice %261 {offsets = [0, 96], sizes = [8, 32], strides = [1, 1]} : vector<8x128xf32> to vector<8x32xf32>
    %267 = arith.mulf %264, %248 : vector<8x32xf32>
    %268 = arith.mulf %263, %265 : vector<8x32xf32>
    %269 = arith.addf %267, %268 : vector<8x32xf32>
    %270 = math.tanh %269 : vector<8x32xf32>
    %271 = arith.mulf %266, %270 : vector<8x32xf32>
    %c24_107 = arith.constant 24 : index
    %c0_108 = arith.constant 0 : index
    %272 = vector.load %arg21[%c24_107, %c0_108] : memref<40x32xf32, #tpu.memory_space<vmem>>, vector<8x32xf32>
    tpu.vector_store %arg21[%c24_107, %c0_108], %271 {strides = array<i32>} : memref<40x32xf32, #tpu.memory_space<vmem>>, vector<8x32xf32>,
    %273 = vector.extract_strided_slice %186 {offsets = [32, 0], sizes = [8, 128], strides = [1, 1]} : vector<40x128xf32> to vector<8x128xf32>
    %c0_109 = arith.constant 0 : index
    %c0_110 = arith.constant 0 : index
    %c0_111 = arith.constant 0 : index
    %274 = vector.load %arg8[%c0_109, %c0_110, %c0_111] : memref<2x32x128xf32, #tpu.memory_space<vmem>>, vector<1x32x128xf32>
    %275 = vector.shape_cast %274 : vector<1x32x128xf32> to vector<32x128xf32>
    %cst_112 = arith.constant dense<0.000000e+00> : vector<8x128xf32>
    %276 = tpu.matmul %271, %275, %cst_112 {dimension_numbers = #tpu.dot_dimension_numbers<[1], [0], [0], [1], [0, 0, 1, 1], [], []>} : vector<8x32xf32>, vector<32x128xf32>, vector<8x128xf32> -> vector<8x128xf32>
    %277 = arith.addf %273, %276 : vector<8x128xf32>
    %278 = arith.negf %277 : vector<8x128xf32>
    %279 = math.exp %278 : vector<8x128xf32>
    %cst_113 = arith.constant 1.000000e+00 : f32
    %280 = vector.broadcast %cst_113 : f32 to vector<8x128xf32>
    %281 = arith.addf %280, %279 : vector<8x128xf32>
    %282 = arith.divf %280, %281 : vector<8x128xf32>
    %283 = math.tanh %277 : vector<8x128xf32>
    %284 = vector.extract_strided_slice %282 {offsets = [0, 0], sizes = [8, 32], strides = [1, 1]} : vector<8x128xf32> to vector<8x32xf32>
    %285 = vector.extract_strided_slice %282 {offsets = [0, 32], sizes = [8, 32], strides = [1, 1]} : vector<8x128xf32> to vector<8x32xf32>
    %286 = vector.extract_strided_slice %283 {offsets = [0, 64], sizes = [8, 32], strides = [1, 1]} : vector<8x128xf32> to vector<8x32xf32>
    %287 = vector.extract_strided_slice %282 {offsets = [0, 96], sizes = [8, 32], strides = [1, 1]} : vector<8x128xf32> to vector<8x32xf32>
    %288 = arith.mulf %285, %269 : vector<8x32xf32>
    %289 = arith.mulf %284, %286 : vector<8x32xf32>
    %290 = arith.addf %288, %289 : vector<8x32xf32>
    %291 = math.tanh %290 : vector<8x32xf32>
    %292 = arith.mulf %287, %291 : vector<8x32xf32>
    %c32_114 = arith.constant 32 : index
    %c0_115 = arith.constant 0 : index
    %293 = vector.load %arg21[%c32_114, %c0_115] : memref<40x32xf32, #tpu.memory_space<vmem>>, vector<8x32xf32>
    tpu.vector_store %arg21[%c32_114, %c0_115], %292 {strides = array<i32>} : memref<40x32xf32, #tpu.memory_space<vmem>>, vector<8x32xf32>,
    %c0_116 = arith.constant 0 : index
    %c0_117 = arith.constant 0 : index
    %294 = vector.load %arg21[%c0_116, %c0_117] : memref<40x32xf32, #tpu.memory_space<vmem>>, vector<40x32xf32>
    %c1_118 = arith.constant 1 : index
    %c0_119 = arith.constant 0 : index
    %c0_120 = arith.constant 0 : index
    %295 = vector.load %arg7[%c1_118, %c0_119, %c0_120] : memref<2x32x128xf32, #tpu.memory_space<vmem>>, vector<1x32x128xf32>
    %296 = vector.shape_cast %295 : vector<1x32x128xf32> to vector<32x128xf32>
    %cst_121 = arith.constant dense<0.000000e+00> : vector<40x128xf32>
    %297 = tpu.matmul %294, %296, %cst_121 {dimension_numbers = #tpu.dot_dimension_numbers<[1], [0], [0], [1], [0, 0, 1, 1], [], []>} : vector<40x32xf32>, vector<32x128xf32>, vector<40x128xf32> -> vector<40x128xf32>
    %c1_122 = arith.constant 1 : index
    %c0_123 = arith.constant 0 : index
    %c0_124 = arith.constant 0 : index
    %298 = vector.load %arg9[%c1_122, %c0_123, %c0_124] : memref<2x1x128xf32, #tpu.memory_space<vmem>>, vector<1x1x128xf32>
    %299 = vector.shape_cast %298 : vector<1x1x128xf32> to vector<1x128xf32>
    %300 = vector.broadcast %299 : vector<1x128xf32> to vector<40x128xf32>
    %301 = arith.addf %297, %300 : vector<40x128xf32>
    %cst_125 = arith.constant 0.000000e+00 : f32
    %302 = vector.broadcast %cst_125 : f32 to vector<8x32xf32>
    %cst_126 = arith.constant 0.000000e+00 : f32
    %303 = vector.broadcast %cst_126 : f32 to vector<8x32xf32>
    %304 = vector.extract_strided_slice %301 {offsets = [0, 0], sizes = [8, 128], strides = [1, 1]} : vector<40x128xf32> to vector<8x128xf32>
    %c1_127 = arith.constant 1 : index
    %c0_128 = arith.constant 0 : index
    %c0_129 = arith.constant 0 : index
    %305 = vector.load %arg8[%c1_127, %c0_128, %c0_129] : memref<2x32x128xf32, #tpu.memory_space<vmem>>, vector<1x32x128xf32>
    %306 = vector.shape_cast %305 : vector<1x32x128xf32> to vector<32x128xf32>
    %cst_130 = arith.constant dense<0.000000e+00> : vector<8x128xf32>
    %307 = tpu.matmul %302, %306, %cst_130 {dimension_numbers = #tpu.dot_dimension_numbers<[1], [0], [0], [1], [0, 0, 1, 1], [], []>} : vector<8x32xf32>, vector<32x128xf32>, vector<8x128xf32> -> vector<8x128xf32>
    %308 = arith.addf %304, %307 : vector<8x128xf32>
    %309 = arith.negf %308 : vector<8x128xf32>
    %310 = math.exp %309 : vector<8x128xf32>
    %cst_131 = arith.constant 1.000000e+00 : f32
    %311 = vector.broadcast %cst_131 : f32 to vector<8x128xf32>
    %312 = arith.addf %311, %310 : vector<8x128xf32>
    %313 = arith.divf %311, %312 : vector<8x128xf32>
    %314 = math.tanh %308 : vector<8x128xf32>
    %315 = vector.extract_strided_slice %313 {offsets = [0, 0], sizes = [8, 32], strides = [1, 1]} : vector<8x128xf32> to vector<8x32xf32>
    %316 = vector.extract_strided_slice %313 {offsets = [0, 32], sizes = [8, 32], strides = [1, 1]} : vector<8x128xf32> to vector<8x32xf32>
    %317 = vector.extract_strided_slice %314 {offsets = [0, 64], sizes = [8, 32], strides = [1, 1]} : vector<8x128xf32> to vector<8x32xf32>
    %318 = vector.extract_strided_slice %313 {offsets = [0, 96], sizes = [8, 32], strides = [1, 1]} : vector<8x128xf32> to vector<8x32xf32>
    %319 = arith.mulf %316, %303 : vector<8x32xf32>
    %320 = arith.mulf %315, %317 : vector<8x32xf32>
    %321 = arith.addf %319, %320 : vector<8x32xf32>
    %322 = math.tanh %321 : vector<8x32xf32>
    %323 = arith.mulf %318, %322 : vector<8x32xf32>
    %324 = vector.extract_strided_slice %301 {offsets = [8, 0], sizes = [8, 128], strides = [1, 1]} : vector<40x128xf32> to vector<8x128xf32>
    %c1_132 = arith.constant 1 : index
    %c0_133 = arith.constant 0 : index
    %c0_134 = arith.constant 0 : index
    %325 = vector.load %arg8[%c1_132, %c0_133, %c0_134] : memref<2x32x128xf32, #tpu.memory_space<vmem>>, vector<1x32x128xf32>
    %326 = vector.shape_cast %325 : vector<1x32x128xf32> to vector<32x128xf32>
    %cst_135 = arith.constant dense<0.000000e+00> : vector<8x128xf32>
    %327 = tpu.matmul %323, %326, %cst_135 {dimension_numbers = #tpu.dot_dimension_numbers<[1], [0], [0], [1], [0, 0, 1, 1], [], []>} : vector<8x32xf32>, vector<32x128xf32>, vector<8x128xf32> -> vector<8x128xf32>
    %328 = arith.addf %324, %327 : vector<8x128xf32>
    %329 = arith.negf %328 : vector<8x128xf32>
    %330 = math.exp %329 : vector<8x128xf32>
    %cst_136 = arith.constant 1.000000e+00 : f32
    %331 = vector.broadcast %cst_136 : f32 to vector<8x128xf32>
    %332 = arith.addf %331, %330 : vector<8x128xf32>
    %333 = arith.divf %331, %332 : vector<8x128xf32>
    %334 = math.tanh %328 : vector<8x128xf32>
    %335 = vector.extract_strided_slice %333 {offsets = [0, 0], sizes = [8, 32], strides = [1, 1]} : vector<8x128xf32> to vector<8x32xf32>
    %336 = vector.extract_strided_slice %333 {offsets = [0, 32], sizes = [8, 32], strides = [1, 1]} : vector<8x128xf32> to vector<8x32xf32>
    %337 = vector.extract_strided_slice %334 {offsets = [0, 64], sizes = [8, 32], strides = [1, 1]} : vector<8x128xf32> to vector<8x32xf32>
    %338 = vector.extract_strided_slice %333 {offsets = [0, 96], sizes = [8, 32], strides = [1, 1]} : vector<8x128xf32> to vector<8x32xf32>
    %339 = arith.mulf %336, %321 : vector<8x32xf32>
    %340 = arith.mulf %335, %337 : vector<8x32xf32>
    %341 = arith.addf %339, %340 : vector<8x32xf32>
    %342 = math.tanh %341 : vector<8x32xf32>
    %343 = arith.mulf %338, %342 : vector<8x32xf32>
    %344 = vector.extract_strided_slice %301 {offsets = [16, 0], sizes = [8, 128], strides = [1, 1]} : vector<40x128xf32> to vector<8x128xf32>
    %c1_137 = arith.constant 1 : index
    %c0_138 = arith.constant 0 : index
    %c0_139 = arith.constant 0 : index
    %345 = vector.load %arg8[%c1_137, %c0_138, %c0_139] : memref<2x32x128xf32, #tpu.memory_space<vmem>>, vector<1x32x128xf32>
    %346 = vector.shape_cast %345 : vector<1x32x128xf32> to vector<32x128xf32>
    %cst_140 = arith.constant dense<0.000000e+00> : vector<8x128xf32>
    %347 = tpu.matmul %343, %346, %cst_140 {dimension_numbers = #tpu.dot_dimension_numbers<[1], [0], [0], [1], [0, 0, 1, 1], [], []>} : vector<8x32xf32>, vector<32x128xf32>, vector<8x128xf32> -> vector<8x128xf32>
    %348 = arith.addf %344, %347 : vector<8x128xf32>
    %349 = arith.negf %348 : vector<8x128xf32>
    %350 = math.exp %349 : vector<8x128xf32>
    %cst_141 = arith.constant 1.000000e+00 : f32
    %351 = vector.broadcast %cst_141 : f32 to vector<8x128xf32>
    %352 = arith.addf %351, %350 : vector<8x128xf32>
    %353 = arith.divf %351, %352 : vector<8x128xf32>
    %354 = math.tanh %348 : vector<8x128xf32>
    %355 = vector.extract_strided_slice %353 {offsets = [0, 0], sizes = [8, 32], strides = [1, 1]} : vector<8x128xf32> to vector<8x32xf32>
    %356 = vector.extract_strided_slice %353 {offsets = [0, 32], sizes = [8, 32], strides = [1, 1]} : vector<8x128xf32> to vector<8x32xf32>
    %357 = vector.extract_strided_slice %354 {offsets = [0, 64], sizes = [8, 32], strides = [1, 1]} : vector<8x128xf32> to vector<8x32xf32>
    %358 = vector.extract_strided_slice %353 {offsets = [0, 96], sizes = [8, 32], strides = [1, 1]} : vector<8x128xf32> to vector<8x32xf32>
    %359 = arith.mulf %356, %341 : vector<8x32xf32>
    %360 = arith.mulf %355, %357 : vector<8x32xf32>
    %361 = arith.addf %359, %360 : vector<8x32xf32>
    %362 = math.tanh %361 : vector<8x32xf32>
    %363 = arith.mulf %358, %362 : vector<8x32xf32>
    %364 = vector.extract_strided_slice %301 {offsets = [24, 0], sizes = [8, 128], strides = [1, 1]} : vector<40x128xf32> to vector<8x128xf32>
    %c1_142 = arith.constant 1 : index
    %c0_143 = arith.constant 0 : index
    %c0_144 = arith.constant 0 : index
    %365 = vector.load %arg8[%c1_142, %c0_143, %c0_144] : memref<2x32x128xf32, #tpu.memory_space<vmem>>, vector<1x32x128xf32>
    %366 = vector.shape_cast %365 : vector<1x32x128xf32> to vector<32x128xf32>
    %cst_145 = arith.constant dense<0.000000e+00> : vector<8x128xf32>
    %367 = tpu.matmul %363, %366, %cst_145 {dimension_numbers = #tpu.dot_dimension_numbers<[1], [0], [0], [1], [0, 0, 1, 1], [], []>} : vector<8x32xf32>, vector<32x128xf32>, vector<8x128xf32> -> vector<8x128xf32>
    %368 = arith.addf %364, %367 : vector<8x128xf32>
    %369 = arith.negf %368 : vector<8x128xf32>
    %370 = math.exp %369 : vector<8x128xf32>
    %cst_146 = arith.constant 1.000000e+00 : f32
    %371 = vector.broadcast %cst_146 : f32 to vector<8x128xf32>
    %372 = arith.addf %371, %370 : vector<8x128xf32>
    %373 = arith.divf %371, %372 : vector<8x128xf32>
    %374 = math.tanh %368 : vector<8x128xf32>
    %375 = vector.extract_strided_slice %373 {offsets = [0, 0], sizes = [8, 32], strides = [1, 1]} : vector<8x128xf32> to vector<8x32xf32>
    %376 = vector.extract_strided_slice %373 {offsets = [0, 32], sizes = [8, 32], strides = [1, 1]} : vector<8x128xf32> to vector<8x32xf32>
    %377 = vector.extract_strided_slice %374 {offsets = [0, 64], sizes = [8, 32], strides = [1, 1]} : vector<8x128xf32> to vector<8x32xf32>
    %378 = vector.extract_strided_slice %373 {offsets = [0, 96], sizes = [8, 32], strides = [1, 1]} : vector<8x128xf32> to vector<8x32xf32>
    %379 = arith.mulf %376, %361 : vector<8x32xf32>
    %380 = arith.mulf %375, %377 : vector<8x32xf32>
    %381 = arith.addf %379, %380 : vector<8x32xf32>
    %382 = math.tanh %381 : vector<8x32xf32>
    %383 = arith.mulf %378, %382 : vector<8x32xf32>
    %384 = vector.extract_strided_slice %301 {offsets = [32, 0], sizes = [8, 128], strides = [1, 1]} : vector<40x128xf32> to vector<8x128xf32>
    %c1_147 = arith.constant 1 : index
    %c0_148 = arith.constant 0 : index
    %c0_149 = arith.constant 0 : index
    %385 = vector.load %arg8[%c1_147, %c0_148, %c0_149] : memref<2x32x128xf32, #tpu.memory_space<vmem>>, vector<1x32x128xf32>
    %386 = vector.shape_cast %385 : vector<1x32x128xf32> to vector<32x128xf32>
    %cst_150 = arith.constant dense<0.000000e+00> : vector<8x128xf32>
    %387 = tpu.matmul %383, %386, %cst_150 {dimension_numbers = #tpu.dot_dimension_numbers<[1], [0], [0], [1], [0, 0, 1, 1], [], []>} : vector<8x32xf32>, vector<32x128xf32>, vector<8x128xf32> -> vector<8x128xf32>
    %388 = arith.addf %384, %387 : vector<8x128xf32>
    %389 = arith.negf %388 : vector<8x128xf32>
    %390 = math.exp %389 : vector<8x128xf32>
    %cst_151 = arith.constant 1.000000e+00 : f32
    %391 = vector.broadcast %cst_151 : f32 to vector<8x128xf32>
    %392 = arith.addf %391, %390 : vector<8x128xf32>
    %393 = arith.divf %391, %392 : vector<8x128xf32>
    %394 = math.tanh %388 : vector<8x128xf32>
    %395 = vector.extract_strided_slice %393 {offsets = [0, 0], sizes = [8, 32], strides = [1, 1]} : vector<8x128xf32> to vector<8x32xf32>
    %396 = vector.extract_strided_slice %393 {offsets = [0, 32], sizes = [8, 32], strides = [1, 1]} : vector<8x128xf32> to vector<8x32xf32>
    %397 = vector.extract_strided_slice %394 {offsets = [0, 64], sizes = [8, 32], strides = [1, 1]} : vector<8x128xf32> to vector<8x32xf32>
    %398 = vector.extract_strided_slice %393 {offsets = [0, 96], sizes = [8, 32], strides = [1, 1]} : vector<8x128xf32> to vector<8x32xf32>
    %399 = arith.mulf %396, %381 : vector<8x32xf32>
    %400 = arith.mulf %395, %397 : vector<8x32xf32>
    %401 = arith.addf %399, %400 : vector<8x32xf32>
    %402 = math.tanh %401 : vector<8x32xf32>
    %403 = arith.mulf %398, %402 : vector<8x32xf32>
    %c0_i32_152 = arith.constant 0 : i32
    %404 = tpu.memref_slice %arg19[%c0_i32_152] : memref<2x!tpu.dma_semaphore, #tpu.memory_space<semaphore_mem>> -> memref<1x!tpu.dma_semaphore, #tpu.memory_space<semaphore_mem>>
    %405 = tpu.memref_squeeze %404 : memref<1x!tpu.dma_semaphore, #tpu.memory_space<semaphore_mem>> -> memref<!tpu.dma_semaphore, #tpu.memory_space<semaphore_mem>>
    tpu.wait_dma2 semaphore(%405 : memref<!tpu.dma_semaphore, #tpu.memory_space<semaphore_mem>>) src(%arg10 : memref<32x1024xbf16, #tpu.memory_space<any>>) dst(%arg17 : memref<32x1024xbf16, #tpu.memory_space<vmem>>)
    %c1_i32_153 = arith.constant 1 : i32
    %406 = tpu.memref_slice %arg19[%c1_i32_153] : memref<2x!tpu.dma_semaphore, #tpu.memory_space<semaphore_mem>> -> memref<1x!tpu.dma_semaphore, #tpu.memory_space<semaphore_mem>>
    %407 = tpu.memref_squeeze %406 : memref<1x!tpu.dma_semaphore, #tpu.memory_space<semaphore_mem>> -> memref<!tpu.dma_semaphore, #tpu.memory_space<semaphore_mem>>
    tpu.wait_dma2 semaphore(%407 : memref<!tpu.dma_semaphore, #tpu.memory_space<semaphore_mem>>) src(%arg12 : memref<1024x128xbf16, #tpu.memory_space<any>>) dst(%arg18 : memref<1024x128xbf16, #tpu.memory_space<vmem>>)
    %408 = arith.truncf %403 : vector<8x32xf32> to vector<8x32xbf16>
    %c0_154 = arith.constant 0 : index
    %c0_155 = arith.constant 0 : index
    %409 = vector.load %arg17[%c0_154, %c0_155] : memref<32x1024xbf16, #tpu.memory_space<vmem>>, vector<32x1024xbf16>
    %cst_156 = arith.constant dense<0.000000e+00> : vector<8x1024xf32>
    %410 = tpu.matmul %408, %409, %cst_156 {dimension_numbers = #tpu.dot_dimension_numbers<[1], [0], [0], [1], [0, 0, 1, 1], [], []>} : vector<8x32xbf16>, vector<32x1024xbf16>, vector<8x1024xf32> -> vector<8x1024xf32>
    %c0_157 = arith.constant 0 : index
    %c0_158 = arith.constant 0 : index
    %411 = vector.load %arg11[%c0_157, %c0_158] : memref<1x1024xf32, #tpu.memory_space<vmem>>, vector<1x1024xf32>
    %412 = vector.broadcast %411 : vector<1x1024xf32> to vector<8x1024xf32>
    %413 = arith.addf %410, %412 : vector<8x1024xf32>
    %cst_159 = arith.constant 0.000000e+00 : f32
    %414 = vector.broadcast %cst_159 : f32 to vector<8x1024xf32>
    %415 = arith.maximumf %413, %414 : vector<8x1024xf32>
    %416 = arith.truncf %415 : vector<8x1024xf32> to vector<8x1024xbf16>
    %c0_160 = arith.constant 0 : index
    %c0_161 = arith.constant 0 : index
    %417 = vector.load %arg18[%c0_160, %c0_161] : memref<1024x128xbf16, #tpu.memory_space<vmem>>, vector<1024x128xbf16>
    %cst_162 = arith.constant dense<0.000000e+00> : vector<8x128xf32>
    %418 = tpu.matmul %416, %417, %cst_162 {dimension_numbers = #tpu.dot_dimension_numbers<[1], [0], [0], [1], [0, 0, 1, 1], [], []>} : vector<8x1024xbf16>, vector<1024x128xbf16>, vector<8x128xf32> -> vector<8x128xf32>
    %c0_163 = arith.constant 0 : index
    %c0_164 = arith.constant 0 : index
    %419 = vector.load %arg13[%c0_163, %c0_164] : memref<1x128xf32, #tpu.memory_space<vmem>>, vector<1x128xf32>
    %420 = vector.broadcast %419 : vector<1x128xf32> to vector<8x128xf32>
    %421 = arith.addf %418, %420 : vector<8x128xf32>
    %cst_165 = arith.constant 0.000000e+00 : f32
    %422 = vector.broadcast %cst_165 : f32 to vector<8x128xf32>
    %423 = arith.maximumf %421, %422 : vector<8x128xf32>
    %c0_166 = arith.constant 0 : index
    %c0_167 = arith.constant 0 : index
    %424 = vector.load %arg14[%c0_166, %c0_167] : memref<1x128xf32, #tpu.memory_space<vmem>>, vector<1x128xf32>
    %425 = vector.broadcast %424 : vector<1x128xf32> to vector<8x128xf32>
    %426 = arith.mulf %423, %425 : vector<8x128xf32>
    %cst_168 = arith.constant dense<0.000000e+00> : vector<8xf32>
    %427 = vector.multi_reduction <add>, %426, %cst_168 [1] : vector<8x128xf32> to vector<8xf32>
    %428 = vector.shape_cast %427 : vector<8xf32> to vector<8x1xf32>
    %c0_169 = arith.constant 0 : index
    %c0_170 = arith.constant 0 : index
    %429 = vector.load %arg15[%c0_169, %c0_170] : memref<1x1xf32, #tpu.memory_space<vmem>>, vector<1x1xf32>
    %430 = vector.broadcast %429 : vector<1x1xf32> to vector<8x1xf32>
    %431 = arith.addf %428, %430 : vector<8x1xf32>
    %432 = vector.shape_cast %431 : vector<8x1xf32> to vector<8x1xf32>
    %433 = vector.broadcast %432 : vector<8x1xf32> to vector<8x128xf32>
    %c0_171 = arith.constant 0 : index
    %c0_172 = arith.constant 0 : index
    %434 = vector.load %arg16[%c0_171, %c0_172] : memref<8x128xf32, #tpu.memory_space<vmem>>, vector<8x128xf32>
    tpu.vector_store %arg16[%c0_171, %c0_172], %433 {strides = array<i32>} : memref<8x128xf32, #tpu.memory_space<vmem>>, vector<8x128xf32>,
    return
  }
}

</mosaic_0001>

<bundles_post_ra>
// kernel: cnn_lstm_forward.1
= control target key start
LH: loop header
LB: loop body
LE: loop exit
PB: predicated region body
PF: predicated region fallthrough
CT: control target
= control target key end

     0   :  { %s7527_s0 = inlined_call_operand.vmem [shape: f32[200,7], index: 0, kind: input, shape index: {}]   ;;  %s7528_s1 = inlined_call_operand.vmem [shape: f32[7,32], index: 1, kind: input, shape index: {}]   ;;  %s7529_s2 = inlined_call_operand.vmem [shape: f32[1,32], index: 2, kind: input, shape index: {}]   ;;  %s7530_s3 = inlined_call_operand.vmem [shape: f32[5,32,64], index: 3, kind: input, shape index: {}]   ;;  %s7531_s4 = inlined_call_operand.vmem [shape: f32[1,64], index: 4, kind: input, shape index: {}]   ;;  %s7532_s5 = inlined_call_operand.vmem [shape: f32[3,64,32], index: 5, kind: input, shape index: {}]   ;;  %s7533_s6 = inlined_call_operand.vmem [shape: f32[1,32], index: 6, kind: input, shape index: {}]   ;;  %s7534_s7 = inlined_call_operand.vmem [shape: f32[2,32,128], index: 7, kind: input, shape index: {}]   ;;  %s7535_s8 = inlined_call_operand.vmem [shape: f32[2,32,128], index: 8, kind: input, shape index: {}]   ;;  %s7536_s9 = inlined_call_operand.vmem [shape: f32[2,1,128], index: 9, kind: input, shape index: {}]   ;;  %s7537_s11 = inlined_call_operand.vmem [shape: f32[1,1024], index: 11, kind: input, shape index: {}]   ;;  %s7538_s12 = inlined_call_operand.vmem [shape: bf16[1024,128], index: 12, kind: input, shape index: {}]   ;;  %s7539_s13 = inlined_call_operand.vmem [shape: f32[1,128], index: 13, kind: input, shape index: {}]   ;;  %s7540_s14 = inlined_call_operand.vmem [shape: f32[1,128], index: 14, kind: input, shape index: {}]   ;;  %s7541_s15 = inlined_call_operand.<no memory space> [shape: f32[1,1], index: 15, kind: input, shape index: {}]   ;;  %s7542_s16 = inlined_call_operand.vmem [shape: f32[8,128], index: 16, kind: output, shape index: {}]   ;;  %s7543_s10 = inlined_call_operand.vmem [shape: bf16[32,1024], index: 10, kind: input, shape index: {}]  }
   0x1   :  { %7547 = sst [smem:[#allocation50_spill]] %s7527_s0  ;;  %v21_v0 = vstv %s7541_s15  ;;  %v69_v1 = vld [vmem:[%s7543_s10] sm:$0xf]  ;;  %v73_v3 = vld [vmem:[%s7543_s10 + $0x4] sm:$0xf] }
   0x2   :  { %v71_v2 = vld [vmem:[%s7543_s10 + $0x20] sm:$0xf]  ;;  %22 = vst [vmem:[#allocation7] sm:$0x1] %v21_v0  ;;  %70 = vst [vmem:[#allocation2] sm:$0xf] %v69_v1 }
   0x3   :  { %72 = vst [vmem:[#allocation2 + $0x4] sm:$0xf] %v71_v2  ;;  %74 = vst [vmem:[#allocation2 + $0x8] sm:$0xf] %v73_v3  ;;  %v75_v4 = vld [vmem:[%s7543_s10 + $0x24] sm:$0xf] }
   0x4   :  { %v77_v5 = vld [vmem:[%s7543_s10 + $0x8] sm:$0xf]  ;;  %76 = vst [vmem:[#allocation2 + $0xc] sm:$0xf] %v75_v4  ;;  %v81_v7 = vld [vmem:[%s7543_s10 + $0xc] sm:$0xf] }
   0x5   :  { %v79_v6 = vld [vmem:[%s7543_s10 + $0x28] sm:$0xf]  ;;  %78 = vst [vmem:[#allocation2 + $0x10] sm:$0xf] %v77_v5  ;;  %v83_v8 = vld [vmem:[%s7543_s10 + $0x2c] sm:$0xf] }
   0x6   :  { %80 = vst [vmem:[#allocation2 + $0x14] sm:$0xf] %v79_v6  ;;  %v85_v9 = vld [vmem:[%s7543_s10 + $0x10] sm:$0xf]  ;;  %82 = vst [vmem:[#allocation2 + $0x18] sm:$0xf] %v81_v7 }
   0x7   :  { %84 = vst [vmem:[#allocation2 + $0x1c] sm:$0xf] %v83_v8  ;;  %86 = vst [vmem:[#allocation2 + $0x20] sm:$0xf] %v85_v9  ;;  %v87_v10 = vld [vmem:[%s7543_s10 + $0x30] sm:$0xf] }
   0x8   :  { %v89_v11 = vld [vmem:[%s7543_s10 + $0x14] sm:$0xf]  ;;  %88 = vst [vmem:[#allocation2 + $0x24] sm:$0xf] %v87_v10  ;;  %v93_v13 = vld [vmem:[%s7543_s10 + $0x18] sm:$0xf] }
   0x9   :  { %v91_v12 = vld [vmem:[%s7543_s10 + $0x34] sm:$0xf]  ;;  %90 = vst [vmem:[#allocation2 + $0x28] sm:$0xf] %v89_v11  ;;  %v95_v14 = vld [vmem:[%s7543_s10 + $0x38] sm:$0xf] }
   0xa   :  { %92 = vst [vmem:[#allocation2 + $0x2c] sm:$0xf] %v91_v12  ;;  %v97_v15 = vld [vmem:[%s7543_s10 + $0x1c] sm:$0xf]  ;;  %94 = vst [vmem:[#allocation2 + $0x30] sm:$0xf] %v93_v13 }
   0xb   :  { %96 = vst [vmem:[#allocation2 + $0x34] sm:$0xf] %v95_v14  ;;  %98 = vst [vmem:[#allocation2 + $0x38] sm:$0xf] %v97_v15  ;;  %v99_v16 = vld [vmem:[%s7543_s10 + $0x3c] sm:$0xff]  }
   0xc   :  { %v103_v17 = vld [vmem:[%s7543_s10 + $0x60] sm:$0xf]  ;;  %v105_v18 = vld [vmem:[%s7543_s10 + $0x44] sm:$0xf]  ;;  %100 = vst [vmem:[#allocation2 + $0x3c] sm:$0xff] %v99_v16  }
   0xd   :  { %104 = vst [vmem:[#allocation2 + $0x44] sm:$0xf] %v103_v17  ;;  %106 = vst [vmem:[#allocation2 + $0x48] sm:$0xf] %v105_v18  ;;  %v107_v19 = vld [vmem:[%s7543_s10 + $0x64] sm:$0xf] }
   0xe   :  { %v109_v20 = vld [vmem:[%s7543_s10 + $0x48] sm:$0xf]  ;;  %108 = vst [vmem:[#allocation2 + $0x4c] sm:$0xf] %v107_v19  ;;  %v113_v22 = vld [vmem:[%s7543_s10 + $0x4c] sm:$0xf] }
   0xf   :  { %v111_v21 = vld [vmem:[%s7543_s10 + $0x68] sm:$0xf]  ;;  %110 = vst [vmem:[#allocation2 + $0x50] sm:$0xf] %v109_v20  ;;  %v115_v23 = vld [vmem:[%s7543_s10 + $0x6c] sm:$0xf] }
  0x10   :  { %112 = vst [vmem:[#allocation2 + $0x54] sm:$0xf] %v111_v21  ;;  %v117_v24 = vld [vmem:[%s7543_s10 + $0x50] sm:$0xf]  ;;  %114 = vst [vmem:[#allocation2 + $0x58] sm:$0xf] %v113_v22 }
  0x11   :  { %116 = vst [vmem:[#allocation2 + $0x5c] sm:$0xf] %v115_v23  ;;  %118 = vst [vmem:[#allocation2 + $0x60] sm:$0xf] %v117_v24  ;;  %v119_v25 = vld [vmem:[%s7543_s10 + $0x70] sm:$0xf] }
  0x12   :  { %v121_v26 = vld [vmem:[%s7543_s10 + $0x54] sm:$0xf]  ;;  %120 = vst [vmem:[#allocation2 + $0x64] sm:$0xf] %v119_v25  ;;  %v125_v28 = vld [vmem:[%s7543_s10 + $0x58] sm:$0xf] }
  0x13   :  { %v123_v27 = vld [vmem:[%s7543_s10 + $0x74] sm:$0xf]  ;;  %122 = vst [vmem:[#allocation2 + $0x68] sm:$0xf] %v121_v26  ;;  %v127_v29 = vld [vmem:[%s7543_s10 + $0x78] sm:$0xf] }
  0x14   :  { %124 = vst [vmem:[#allocation2 + $0x6c] sm:$0xf] %v123_v27  ;;  %v129_v30 = vld [vmem:[%s7543_s10 + $0x5c] sm:$0xf]  ;;  %126 = vst [vmem:[#allocation2 + $0x70] sm:$0xf] %v125_v28 }
  0x15   :  { %128 = vst [vmem:[#allocation2 + $0x74] sm:$0xf] %v127_v29  ;;  %130 = vst [vmem:[#allocation2 + $0x78] sm:$0xf] %v129_v30  ;;  %v131_v31 = vld [vmem:[%s7543_s10 + $0x7c] sm:$0xf] }
  0x16   :  { %132 = vst [vmem:[#allocation2 + $0x7c] sm:$0xf] %v131_v31 }
  0x17   :  { %227 = vsyncadd [#allocation4], 2048  ;;  %v5871_v32 = vld [vmem:[%s7538_s12] sm:$0xff]  ;;  %v5876_v33 = vld [vmem:[%s7538_s12 + $0x8] sm:$0xff] }
  0x18   :  { %v5881_v34 = vld [vmem:[%s7538_s12 + $0x10] sm:$0xff]  ;;  %v5886_v35 = vld [vmem:[%s7538_s12 + $0x18] sm:$0xff]  ;;  %v5891_v36 = vld [vmem:[%s7538_s12 + $0x20] sm:$0xff] }
  0x19   :  { %v5896_v37 = vld [vmem:[%s7538_s12 + $0x28] sm:$0xff]  ;;  %v5901_v38 = vld [vmem:[%s7538_s12 + $0x30] sm:$0xff]  ;;  %v5906_v39 = vld [vmem:[%s7538_s12 + $0x38] sm:$0xff] }
  0x1a   :  { %v5911_v40 = vld [vmem:[%s7538_s12 + $0x40] sm:$0xff]  ;;  %v5916_v41 = vld [vmem:[%s7538_s12 + $0x48] sm:$0xff]  ;;  %v5921_v42 = vld [vmem:[%s7538_s12 + $0x50] sm:$0xff] }
  0x1b   :  { %v5926_v43 = vld [vmem:[%s7538_s12 + $0x58] sm:$0xff]  ;;  %v5931_v44 = vld [vmem:[%s7538_s12 + $0x60] sm:$0xff]  ;;  %v5936_v45 = vld [vmem:[%s7538_s12 + $0x68] sm:$0xff] }
  0x1c   :  { %v5941_v46 = vld [vmem:[%s7538_s12 + $0x70] sm:$0xff]  ;;  %v5946_v47 = vld [vmem:[%s7538_s12 + $0x78] sm:$0xff]  ;;  %v5951_v48 = vld [vmem:[%s7538_s12 + $0x80] sm:$0xff] }
  0x1d   :  { %v5956_v49 = vld [vmem:[%s7538_s12 + $0x88] sm:$0xff]  ;;  %v5961_v50 = vld [vmem:[%s7538_s12 + $0x90] sm:$0xff]  ;;  %v5966_v51 = vld [vmem:[%s7538_s12 + $0x98] sm:$0xff] }
  0x1e   :  { %v5971_v52 = vld [vmem:[%s7538_s12 + $0xa0] sm:$0xff]  ;;  %v5976_v53 = vld [vmem:[%s7538_s12 + $0xa8] sm:$0xff]  ;;  %v5981_v54 = vld [vmem:[%s7538_s12 + $0xb0] sm:$0xff] }
  0x1f   :  { %7548 = vst [vmem:[#allocation12_spill] sm:$0xff] %v5976_v53  ;;  %7549 = vst [vmem:[#allocation13_spill] sm:$0xff] %v5981_v54  ;;  %v5986_v55 = vld [vmem:[%s7538_s12 + $0xb8] sm:$0xff]  ;;  %v5991_v56 = vld [vmem:[%s7538_s12 + $0xc0] sm:$0xff] }
  0x20   :  { %7550 = vst [vmem:[#allocation14_spill] sm:$0xff] %v5986_v55  ;;  %v5996_v57 = vld [vmem:[%s7538_s12 + $0xc8] sm:$0xff]  ;;  %v6001_v58 = vld [vmem:[%s7538_s12 + $0xd0] sm:$0xff]  ;;  %v6006_v59 = vld [vmem:[%s7538_s12 + $0xd8] sm:$0xff] }
  0x21   :  { %v6011_v60 = vld [vmem:[%s7538_s12 + $0xe0] sm:$0xff]  ;;  %v6016_v61 = vld [vmem:[%s7538_s12 + $0xe8] sm:$0xff]  ;;  %v6021_v62 = vld [vmem:[%s7538_s12 + $0xf0] sm:$0xff] }
  0x22   :  { %7551 = vst [vmem:[#allocation15_spill] sm:$0xff] %v6016_v61  ;;  %7552 = vst [vmem:[#allocation16_spill] sm:$0xff] %v6021_v62  ;;  %v6026_v63 = vld [vmem:[%s7538_s12 + $0xf8] sm:$0xff]  ;;  %v6031_v0 = vld [vmem:[%s7538_s12 + $0x100] sm:$0xff] }
  0x23   :  { %7553 = vst [vmem:[#allocation17_spill] sm:$0xff] %v6026_v63  ;;  %7554 = vst [vmem:[#allocation18_spill] sm:$0xff] %v6031_v0  ;;  %v6036_v1 = vld [vmem:[%s7538_s12 + $0x108] sm:$0xff]  ;;  %v6041_v2 = vld [vmem:[%s7538_s12 + $0x110] sm:$0xff] }
  0x24   :  { %7555 = vst [vmem:[#allocation19_spill] sm:$0xff] %v6036_v1  ;;  %7556 = vst [vmem:[#allocation20_spill] sm:$0xff] %v6041_v2  ;;  %v6046_v3 = vld [vmem:[%s7538_s12 + $0x118] sm:$0xff]  ;;  %v6051_v4 = vld [vmem:[%s7538_s12 + $0x120] sm:$0xff] }
  0x25   :  { %7557 = vst [vmem:[#allocation21_spill] sm:$0xff] %v6046_v3  ;;  %7558 = vst [vmem:[#allocation22_spill] sm:$0xff] %v6051_v4  ;;  %v6056_v5 = vld [vmem:[%s7538_s12 + $0x128] sm:$0xff]  ;;  %v6061_v6 = vld [vmem:[%s7538_s12 + $0x130] sm:$0xff] }
  0x26   :  { %7559 = vst [vmem:[#allocation23_spill] sm:$0xff] %v6056_v5  ;;  %7560 = vst [vmem:[#allocation24_spill] sm:$0xff] %v6061_v6  ;;  %v6066_v7 = vld [vmem:[%s7538_s12 + $0x138] sm:$0xff]  ;;  %v6071_v8 = vld [vmem:[%s7538_s12 + $0x140] sm:$0xff] }
  0x27   :  { %7561 = vst [vmem:[#allocation25_spill] sm:$0xff] %v6066_v7  ;;  %7562 = vst [vmem:[#allocation26_spill] sm:$0xff] %v6071_v8  ;;  %v6076_v9 = vld [vmem:[%s7538_s12 + $0x148] sm:$0xff]  ;;  %v6081_v10 = vld [vmem:[%s7538_s12 + $0x150] sm:$0xff] }
  0x28   :  { %7563 = vst [vmem:[#allocation27_spill] sm:$0xff] %v6076_v9  ;;  %7564 = vst [vmem:[#allocation28_spill] sm:$0xff] %v6081_v10  ;;  %v6086_v11 = vld [vmem:[%s7538_s12 + $0x158] sm:$0xff]  ;;  %v6091_v12 = vld [vmem:[%s7538_s12 + $0x160] sm:$0xff] }
  0x29   :  { %7565 = vst [vmem:[#allocation29_spill] sm:$0xff] %v6086_v11  ;;  %7566 = vst [vmem:[#allocation30_spill] sm:$0xff] %v6091_v12  ;;  %v6096_v13 = vld [vmem:[%s7538_s12 + $0x168] sm:$0xff]  ;;  %v6101_v14 = vld [vmem:[%s7538_s12 + $0x170] sm:$0xff] }
  0x2a   :  { %7567 = vst [vmem:[#allocation31_spill] sm:$0xff] %v6096_v13  ;;  %7568 = vst [vmem:[#allocation32_spill] sm:$0xff] %v6101_v14  ;;  %v6106_v15 = vld [vmem:[%s7538_s12 + $0x178] sm:$0xff]  ;;  %v6111_v16 = vld [vmem:[%s7538_s12 + $0x180] sm:$0xff] }
  0x2b   :  { %7569 = vst [vmem:[#allocation33_spill] sm:$0xff] %v6106_v15  ;;  %7570 = vst [vmem:[#allocation34_spill] sm:$0xff] %v6111_v16  ;;  %v6116_v17 = vld [vmem:[%s7538_s12 + $0x188] sm:$0xff]  ;;  %v6121_v18 = vld [vmem:[%s7538_s12 + $0x190] sm:$0xff] }
  0x2c   :  { %7571 = vst [vmem:[#allocation35_spill] sm:$0xff] %v6116_v17  ;;  %7572 = vst [vmem:[#allocation36_spill] sm:$0xff] %v6121_v18  ;;  %v6126_v19 = vld [vmem:[%s7538_s12 + $0x198] sm:$0xff]  ;;  %v6131_v20 = vld [vmem:[%s7538_s12 + $0x1a0] sm:$0xff] }
  0x2d   :  { %7573 = vst [vmem:[#allocation37_spill] sm:$0xff] %v6126_v19  ;;  %7574 = vst [vmem:[#allocation38_spill] sm:$0xff] %v6131_v20  ;;  %v6136_v21 = vld [vmem:[%s7538_s12 + $0x1a8] sm:$0xff]  ;;  %v6141_v22 = vld [vmem:[%s7538_s12 + $0x1b0] sm:$0xff] }
  0x2e   :  { %7575 = vst [vmem:[#allocation39_spill] sm:$0xff] %v6136_v21  ;;  %7576 = vst [vmem:[#allocation40_spill] sm:$0xff] %v6141_v22  ;;  %v6146_v23 = vld [vmem:[%s7538_s12 + $0x1b8] sm:$0xff]  ;;  %v6151_v24 = vld [vmem:[%s7538_s12 + $0x1c0] sm:$0xff] }
  0x2f   :  { %7577 = vst [vmem:[#allocation41_spill] sm:$0xff] %v6146_v23  ;;  %7578 = vst [vmem:[#allocation42_spill] sm:$0xff] %v6151_v24  ;;  %v6156_v25 = vld [vmem:[%s7538_s12 + $0x1c8] sm:$0xff]  ;;  %v6161_v26 = vld [vmem:[%s7538_s12 + $0x1d0] sm:$0xff] }
  0x30   :  { %7579 = vst [vmem:[#allocation43_spill] sm:$0xff] %v6156_v25  ;;  %7580 = vst [vmem:[#allocation44_spill] sm:$0xff] %v6161_v26  ;;  %v6166_v27 = vld [vmem:[%s7538_s12 + $0x1d8] sm:$0xff]  ;;  %v6171_v28 = vld [vmem:[%s7538_s12 + $0x1e0] sm:$0xff] }
  0x31   :  { %7581 = vst [vmem:[#allocation45_spill] sm:$0xff] %v6166_v27  ;;  %7582 = vst [vmem:[#allocation46_spill] sm:$0xff] %v6171_v28  ;;  %v6176_v29 = vld [vmem:[%s7538_s12 + $0x1e8] sm:$0xff]  ;;  %v6181_v30 = vld [vmem:[%s7538_s12 + $0x1f0] sm:$0xff] }
  0x32   :  { %7583 = vst [vmem:[#allocation47_spill] sm:$0xff] %v6176_v29  ;;  %7584 = vst [vmem:[#allocation48_spill] sm:$0xff] %v6181_v30  ;;  %v6186_v31 = vld [vmem:[%s7538_s12 + $0x1f8] sm:$0xff] }
  0x33   :  { %7585 = vst [vmem:[#allocation49_spill] sm:$0xff] %v6186_v31 }
  0x34   :  { %396 = vsyncadd [#allocation4 + $0x1], 8192  ;;  %v422_v23 = vld [vmem:[%s7528_s1] sm:$0x7f]  ;;  %vm506_vm0 = vcmask 1046528   ;;  %v5681_v22 = vmov 0.0  }
  0x35   :  { %4572 = vmatprep.subr.mxu0 %v5681_v22  ;;  %s7586_s17 = sld [smem:[#allocation50_spill]]  ;;  %vm430_vm1 = vcmask 56320   ;;  %vm5682_vm2 = vmmov 0   ;;  %v7545_v31 = vmov 0.0|0.0   ;;  %v7587_v20 = vmov 0.0|0.0   ;;  %v4000_v24 = vld [vmem:[%s7530_s3 + $0x30] sm:$0xff] }
  0x36   :  { %4573 = vmatpush3.msk.msra.mxu0 %vm506_vm0, %v422_v23  ;;  %4574 = vmatprep.mubr.msk.f32.mxu0 %vm5682_vm2, %v5681_v22  ;;  %v732_v23 = vld [vmem:[%s7530_s3] sm:$0xff]  ;;  %vm736_vm3 = vcmask 261120   ;;  %v4001_v7 = vld [vmem:[%s7530_s3 + $0x38] sm:$0xff]  ;;  %vm1728_vm4 = vcmask 523264   ;;  %s5684_s30 = smov 64   ;;  %s5685_s15 = smov 32  }
  0x37   :  { %5331 = vmatprep.subr.bf16.mxu0 %v7545_v31  ;;  %5469 = vmatprep.subr.bf16.mxu1 %v7545_v31  ;;  %v733_v31 = vld [vmem:[%s7530_s3 + $0x8] sm:$0xff]  ;;  %v4088_v62 = vld [vmem:[%s7530_s3 + $0x98] sm:$0xff] }
  0x38   :  { %4672 = vmatprep.mubr.msk.f32.mxu1 %vm5682_vm2, %v5681_v22  ;;  %v5332_v29 = vpack.c.bf16 %v733_v31, %v732_v23 }
  0x3a   :  { %5471 = vmatpush3.bf16.msra.mxu1 %v5332_v29 }
  0x3b   :  { %v397_v21 = vld [vmem:[%s7586_s17] sm:$0xff]  ;;  %v398_v30 = vld [vmem:[%s7586_s17 + $0x8] sm:$0xff]  ;;  %5470 = vmatprep.subr.bf16.mxu1 %v7587_v20  ;;  %v404_v23 = vld [vmem:[%s7586_s17 + $0x38] sm:$0xff] }
  0x3c   :  { %4575 = vmatmul.mubr.msk.f32.vlgmr.msra.gmra.mrb[0].mxu0 %vm430_vm1, %v397_v21  ;;  %v399_v21 = vld [vmem:[%s7586_s17 + $0x10] sm:$0xff]  ;;  %v401_v31 = vld [vmem:[%s7586_s17 + $0x20] sm:$0xff] }
  0x3d   :  { %4577 = vmatprep.mubr.msk.f32.mxu0 %vm5682_vm2, %v5681_v22  ;;  %5333 = vmatpush3.bf16.msra.mxu0 %v5332_v29  ;;  %v402_v29 = vld [vmem:[%s7586_s17 + $0x28] sm:$0xff] }
  0x3e   :  { %5334 = vmatprep.subr.bf16.mxu0 %v7587_v20 }
  0x40   :  { %4578 = vmatmul.mubr.msk.f32.gmra.mrb[2].mxu0 %vm430_vm1, %v398_v30  ;;  %v400_v30 = vld [vmem:[%s7586_s17 + $0x18] sm:$0xff] }
  0x41   :  { %4580 = vmatprep.mubr.msk.f32.mxu0 %vm5682_vm2, %v5681_v22 }
  0x44   :  { %4581 = vmatmul.mubr.msk.f32.gmra.mrb[4].mxu0 %vm430_vm1, %v399_v21  ;;  %v403_v21 = vld [vmem:[%s7586_s17 + $0x30] sm:$0xff] }
  0x45   :  { %4583 = vmatprep.mubr.msk.f32.mxu0 %vm5682_vm2, %v5681_v22 }
  0x48   :  { %4584 = vmatmul.mubr.msk.f32.gmra.mrb[6].mxu0 %vm430_vm1, %v400_v30  ;;  %v405_v30 = vld [vmem:[%s7586_s17 + $0x40] sm:$0xff] }
  0x49   :  { %4586 = vmatprep.mubr.msk.f32.mxu0 %vm5682_vm2, %v5681_v22 }
  0x4c   :  { %4587 = vmatmul.mubr.msk.f32.gmra.mrb[8].mxu0 %vm430_vm1, %v401_v31  ;;  %v406_v31 = vld [vmem:[%s7586_s17 + $0x48] sm:$0xff] }
  0x4d   :  { %4589 = vmatprep.mubr.msk.f32.mxu0 %vm5682_vm2, %v5681_v22 }
  0x50   :  { %4590 = vmatmul.mubr.msk.f32.gmra.mrb[10].mxu0 %vm430_vm1, %v402_v29  ;;  %v407_v29 = vld [vmem:[%s7586_s17 + $0x50] sm:$0xff] }
  0x51   :  { %4592 = vmatprep.mubr.msk.f32.mxu0 %vm5682_vm2, %v5681_v22 }
  0x54   :  { %4593 = vmatmul.mubr.msk.f32.gmra.mrb[12].mxu0 %vm430_vm1, %v403_v21  ;;  %v408_v21 = vld [vmem:[%s7586_s17 + $0x58] sm:$0xff] }
  0x55   :  { %4595 = vmatprep.mubr.msk.f32.mxu0 %vm5682_vm2, %v5681_v22 }
  0x58   :  { %4596 = vmatmul.mubr.msk.f32.gmra.mrb[14].mxu0 %vm430_vm1, %v404_v23  ;;  %v409_v23 = vld [vmem:[%s7586_s17 + $0x60] sm:$0xff] }
  0x59   :  { %4598 = vmatprep.mubr.msk.f32.mxu0 %vm5682_vm2, %v5681_v22 }
  0x5c   :  { %4599 = vmatmul.mubr.msk.f32.gmra.mrb[16].mxu0 %vm430_vm1, %v405_v30  ;;  %v410_v30 = vld [vmem:[%s7586_s17 + $0x68] sm:$0xff] }
  0x5d   :  { %4601 = vmatprep.mubr.msk.f32.mxu0 %vm5682_vm2, %v5681_v22 }
  0x60   :  { %4602 = vmatmul.mubr.msk.f32.gmra.mrb[18].mxu0 %vm430_vm1, %v406_v31  ;;  %v411_v31 = vld [vmem:[%s7586_s17 + $0x70] sm:$0xff] }
  0x61   :  { %4604 = vmatprep.mubr.msk.f32.mxu0 %vm5682_vm2, %v5681_v22 }
  0x64   :  { %4605 = vmatmul.mubr.msk.f32.gmra.mrb[20].mxu0 %vm430_vm1, %v407_v29  ;;  %v412_v29 = vld [vmem:[%s7586_s17 + $0x78] sm:$0xff] }
  0x65   :  { %4607 = vmatprep.mubr.msk.f32.mxu0 %vm5682_vm2, %v5681_v22 }
  0x68   :  { %4608 = vmatmul.mubr.msk.f32.gmra.mrb[22].mxu0 %vm430_vm1, %v408_v21  ;;  %v413_v21 = vld [vmem:[%s7586_s17 + $0x80] sm:$0xff] }
  0x69   :  { %4610 = vmatprep.mubr.msk.f32.mxu0 %vm5682_vm2, %v5681_v22 }
  0x6c   :  { %4611 = vmatmul.mubr.msk.f32.gmra.mrb[24].mxu0 %vm430_vm1, %v409_v23  ;;  %v414_v23 = vld [vmem:[%s7586_s17 + $0x88] sm:$0xff] }
  0x6d   :  { %4613 = vmatprep.mubr.msk.f32.mxu0 %vm5682_vm2, %v5681_v22 }
  0x70   :  { %4614 = vmatmul.mubr.msk.f32.gmra.mrb[26].mxu0 %vm430_vm1, %v410_v30  ;;  %v415_v30 = vld [vmem:[%s7586_s17 + $0x90] sm:$0xff] }
  0x71   :  { %4616 = vmatprep.mubr.msk.f32.mxu0 %vm5682_vm2, %v5681_v22 }
  0x74   :  { %4617 = vmatmul.mubr.msk.f32.gmra.mrb[28].mxu0 %vm430_vm1, %v411_v31  ;;  %v416_v31 = vld [vmem:[%s7586_s17 + $0x98] sm:$0xff] }
  0x75   :  { %4619 = vmatprep.mubr.msk.f32.mxu0 %vm5682_vm2, %v5681_v22 }
  0x78   :  { %4620 = vmatmul.mubr.msk.f32.gmra.mrb[30].mxu0 %vm430_vm1, %v412_v29  ;;  %v417_v29 = vld [vmem:[%s7586_s17 + $0xa0] sm:$0xff] }
  0x79   :  { %4622 = vmatprep.mubr.msk.f32.mxu0 %vm5682_vm2, %v5681_v22 }
  0x7c   :  { %4623 = vmatmul.mubr.msk.f32.gmra.mrb[32].mxu0 %vm430_vm1, %v413_v21  ;;  %v418_v21 = vld [vmem:[%s7586_s17 + $0xa8] sm:$0xff] }
  0x7d   :  { %4625 = vmatprep.mubr.msk.f32.mxu0 %vm5682_vm2, %v5681_v22 }
  0x80   :  { %4626 = vmatmul.mubr.msk.f32.gmra.mrb[34].mxu0 %vm430_vm1, %v414_v23  ;;  %v734_v23 = vld [vmem:[%s7530_s3 + $0x10] sm:$0xff] }
  0x81   :  { %4628 = vmatprep.mubr.msk.f32.mxu0 %vm5682_vm2, %v5681_v22 }
  0x84   :  { %4629 = vmatmul.mubr.msk.f32.gmra.mrb[36].mxu0 %vm430_vm1, %v415_v30  ;;  %v735_v30 = vld [vmem:[%s7530_s3 + $0x18] sm:$0xff] }
  0x85   :  { %4631 = vmatprep.mubr.msk.f32.mxu0 %vm5682_vm2, %v5681_v22 }
  0x88   :  { %4632 = vmatmul.mubr.msk.f32.gmra.mrb[38].mxu0 %vm430_vm1, %v416_v31  ;;  %v5335_v31 = vpack.c.bf16 %v735_v30, %v734_v23  ;;  %v421_v23 = vld [vmem:[%s7586_s17 + $0xc0] sm:$0xff] }
  0x89   :  { %4634 = vmatprep.mubr.msk.f32.mxu0 %vm5682_vm2, %v5681_v22  ;;  %v6367_v30 = vld [vmem:[%s7529_s2] ss:$0 sm:$0xff] }
  0x8a   :  { %5336 = vmatpush3.bf16.msra.mxu0 %v5335_v31  ;;  %5472 = vmatpush3.bf16.msra.mxu1 %v5335_v31 }
  0x8b   :  { %5361 = vmatprep.subr.bf16.mxu0 %v7587_v20  ;;  %5337 = vmatprep.subr.bf16.mxu1 %v7587_v20 }
  0x8c   :  { %4635 = vmatmul.mubr.msk.f32.gmra.mrb[40].mxu0 %vm430_vm1, %v417_v29  ;;  %v419_v29 = vld [vmem:[%s7586_s17 + $0xb0] sm:$0xff] }
  0x8d   :  { %4637 = vmatprep.mubr.msk.f32.mxu0 %vm5682_vm2, %v5681_v22 }
  0x90   :  { %4638 = vmatmul.mubr.msk.f32.gmra.mrb[42].mxu0 %vm430_vm1, %v418_v21  ;;  %v420_v21 = vld [vmem:[%s7586_s17 + $0xb8] sm:$0xff] }
  0x91   :  { %4640 = vmatprep.mubr.msk.f32.mxu0 %vm5682_vm2, %v5681_v22 }
  0x94   :  { %4641 = vmatmul.mubr.msk.f32.gmra.mrb[44].mxu0 %vm430_vm1, %v419_v29 }
  0x95   :  { %4643 = vmatprep.mubr.msk.f32.mxu0 %vm5682_vm2, %v5681_v22 }
  0x98   :  { %4644 = vmatmul.mubr.msk.f32.gmra.mrb[46].mxu0 %vm430_vm1, %v420_v21 }
  0x99   :  { %4646 = vmatprep.mubr.msk.f32.mxu0 %vm5682_vm2, %v5681_v22 }
  0x9c   :  { %4647 = vmatmul.mubr.msk.f32.gmra.mrb[48].mxu0 %vm430_vm1, %v421_v23 }
  0x9d   :  { %4657 = vmatprep.mubr.msk.f32.mxu0 %vm5682_vm2, %v5681_v22 }
 0x10f   :  { %v576_v31 = vpop.f32.mrb[0].mxu0 }
 0x110   :  { %v577_v29 = vadd.f32 %v6367_v30, %v576_v31  ;;  %v4576_v21 = vpop.f32.mrb[1].mxu0 }
 0x112   :  { %v6370_v28 = vmax.f32 %v577_v29, 0.0 }
 0x113   :  { %v581_v19 = vpop.f32.mrb[2].mxu0 }
 0x114   :  { %v582_v27 = vadd.f32 %v6367_v30, %v581_v19  ;;  %v4579_v18 = vpop.f32.mrb[3].mxu0  ;;  %4658 = vmatmul.mubr.msk.f32.vlgmr.msra.gmra.mrb[50].mxu0 %vm736_vm3, %v6370_v28 }
 0x115   :  { %4660 = vmatprep.mubr.msk.f32.mxu0 %vm5682_vm2, %v5681_v22 }
 0x116   :  { %v6377_v23 = vmax.f32 %v582_v27, 0.0 }
 0x117   :  { %v586_v26 = vpop.f32.mrb[4].mxu0 }
 0x118   :  { %v587_v17 = vadd.f32 %v6367_v30, %v586_v26  ;;  %v4582_v31 = vpop.f32.mrb[5].mxu0  ;;  %4661 = vmatmul.mubr.msk.f32.gmra.mrb[52].mxu0 %vm736_vm3, %v6377_v23 }
 0x119   :  { %4663 = vmatprep.mubr.msk.f32.mxu0 %vm5682_vm2, %v5681_v22 }
 0x11a   :  { %v6384_v19 = vmax.f32 %v587_v17, 0.0 }
 0x11b   :  { %v591_v18 = vpop.f32.mrb[6].mxu0 }
 0x11c   :  { %v592_v29 = vadd.f32 %v6367_v30, %v591_v18  ;;  %v4585_v21 = vpop.f32.mrb[7].mxu0  ;;  %4664 = vmatmul.mubr.msk.f32.gmra.mrb[54].mxu0 %vm736_vm3, %v6384_v19  ;;  %v3998_v18 = vld [vmem:[%s7530_s3 + $0x20] sm:$0xff] }
 0x11d   :  { %4666 = vmatprep.mubr.msk.f32.mxu0 %vm5682_vm2, %v5681_v22 }
 0x11e   :  { %v6391_v26 = vmax.f32 %v592_v29, 0.0  ;;  %v3999_v29 = vld [vmem:[%s7530_s3 + $0x28] sm:$0xff] }
 0x11f   :  { %v596_v27 = vpop.f32.mrb[8].mxu0  ;;  %v5338_v16 = vpack.c.bf16 %v3999_v29, %v3998_v18  ;;  %v5341_v18 = vpack.c.bf16 %v4001_v7, %v4000_v24 }
 0x120   :  { %v597_v31 = vadd.f32 %v6367_v30, %v596_v27  ;;  %v4588_v25 = vpop.f32.mrb[9].mxu0  ;;  %4667 = vmatmul.mubr.msk.f32.gmra.mrb[56].mxu0 %vm736_vm3, %v6391_v26 }
 0x121   :  { %4669 = vmatprep.mubr.msk.f32.mxu0 %vm5682_vm2, %v5681_v22 }
 0x122   :  { %v6398_v17 = vmax.f32 %v597_v31, 0.0 }
 0x123   :  { %v601_v21 = vpop.f32.mrb[10].mxu0 }
 0x124   :  { %v602_v27 = vadd.f32 %v6367_v30, %v601_v21  ;;  %v4591_v25 = vpop.f32.mrb[11].mxu0  ;;  %4670 = vmatmul.mubr.msk.f32.gmra.mrb[58].mxu0 %vm736_vm3, %v6398_v17 }
 0x125   :  { %5080 = vmatprep.mubr.msk.f32.mxu0 %vm5682_vm2, %v5681_v22 }
 0x126   :  { %v6411_v31 = vmax.f32 %v602_v27, 0.0 }
 0x127   :  { %v606_v15 = vpop.f32.mrb[12].mxu0 }
 0x128   :  { %v607_v21 = vadd.f32 %v6367_v30, %v606_v15  ;;  %v4594_v25 = vpop.f32.mrb[13].mxu0  ;;  %4673 = vmatmul.mubr.msk.f32.vlgmr.msra.gmra.mrb[0].mxu1 %vm736_vm3, %v6411_v31 }
 0x129   :  { %5339 = vmatpush3.bf16.msra.mxu1 %v5338_v16  ;;  %4675 = vmatprep.mubr.msk.f32.mxu1 %vm5682_vm2, %v5681_v22 }
 0x12a   :  { %v6424_v29 = vmax.f32 %v607_v21, 0.0  ;;  %5340 = vmatprep.subr.bf16.mxu1 %v7587_v20 }
 0x12b   :  { %v611_v27 = vpop.f32.mrb[14].mxu0 }
 0x12c   :  { %v612_v6 = vadd.f32 %v6367_v30, %v611_v27  ;;  %v4597_v14 = vpop.f32.mrb[15].mxu0  ;;  %4676 = vmatmul.mubr.msk.f32.gmra.mrb[2].mxu1 %vm736_vm3, %v6424_v29 }
 0x12d   :  { %4678 = vmatprep.mubr.msk.f32.mxu1 %vm5682_vm2, %v5681_v22  ;;  %5342 = vmatpush3.bf16.msra.mxu1 %v5341_v18 }
 0x12e   :  { %v6432_v15 = vmax.f32 %v612_v6, 0.0  ;;  %5343 = vmatprep.subr.bf16.mxu1 %v7587_v20 }
 0x12f   :  { %v616_v7 = vpop.f32.mrb[16].mxu0 }
 0x130   :  { %v617_v16 = vadd.f32 %v6367_v30, %v616_v7  ;;  %v4600_v24 = vpop.f32.mrb[17].mxu0  ;;  %4679 = vmatmul.mubr.msk.f32.gmra.mrb[4].mxu1 %vm736_vm3, %v6432_v15 }
 0x131   :  { %4681 = vmatprep.mubr.msk.f32.mxu1 %vm5682_vm2, %v5681_v22 }
 0x132   :  { %v6440_v14 = vmax.f32 %v617_v16, 0.0 }
 0x133   :  { %v621_v21 = vpop.f32.mrb[18].mxu0 }
 0x134   :  { %v622_v25 = vadd.f32 %v6367_v30, %v621_v21  ;;  %v4603_v18 = vpop.f32.mrb[19].mxu0  ;;  %4682 = vmatmul.mubr.msk.f32.gmra.mrb[6].mxu1 %vm736_vm3, %v6440_v14 }
 0x135   :  { %4684 = vmatprep.mubr.msk.f32.mxu1 %vm5682_vm2, %v5681_v22 }
 0x136   :  { %v6447_v6 = vmax.f32 %v622_v25, 0.0 }
 0x137   :  { %v626_v27 = vpop.f32.mrb[20].mxu0 }
 0x138   :  { %v627_v7 = vadd.f32 %v6367_v30, %v626_v27  ;;  %v4606_v24 = vpop.f32.mrb[21].mxu0  ;;  %4685 = vmatmul.mubr.msk.f32.gmra.mrb[8].mxu1 %vm736_vm3, %v6447_v6 }
 0x139   :  { %4687 = vmatprep.mubr.msk.f32.mxu1 %vm5682_vm2, %v5681_v22 }
 0x13a   :  { %v6454_v16 = vmax.f32 %v627_v7, 0.0 }
 0x13b   :  { %v631_v21 = vpop.f32.mrb[22].mxu0 }
 0x13c   :  { %v632_v18 = vadd.f32 %v6367_v30, %v631_v21  ;;  %v4609_v5 = vpop.f32.mrb[23].mxu0  ;;  %4688 = vmatmul.mubr.msk.f32.gmra.mrb[10].mxu1 %vm736_vm3, %v6454_v16 }
 0x13d   :  { %4690 = vmatprep.mubr.msk.f32.mxu1 %vm5682_vm2, %v5681_v22 }
 0x13e   :  { %v6461_v25 = vmax.f32 %v632_v18, 0.0 }
 0x13f   :  { %v636_v27 = vpop.f32.mrb[24].mxu0 }
 0x140   :  { %v637_v24 = vadd.f32 %v6367_v30, %v636_v27  ;;  %v4612_v13 = vpop.f32.mrb[25].mxu0  ;;  %4691 = vmatmul.mubr.msk.f32.gmra.mrb[12].mxu1 %vm736_vm3, %v6461_v25 }
 0x141   :  { %4693 = vmatprep.mubr.msk.f32.mxu1 %vm5682_vm2, %v5681_v22 }
 0x142   :  { %v6468_v7 = vmax.f32 %v637_v24, 0.0 }
 0x143   :  { %v641_v5 = vpop.f32.mrb[26].mxu0 }
 0x144   :  { %v642_v21 = vadd.f32 %v6367_v30, %v641_v5  ;;  %v4615_v4 = vpop.f32.mrb[27].mxu0  ;;  %4694 = vmatmul.mubr.msk.f32.gmra.mrb[14].mxu1 %vm736_vm3, %v6468_v7 }
 0x145   :  { %4696 = vmatprep.mubr.msk.f32.mxu1 %vm5682_vm2, %v5681_v22 }
 0x146   :  { %v6475_v18 = vmax.f32 %v642_v21, 0.0 }
 0x147   :  { %v646_v13 = vpop.f32.mrb[28].mxu0 }
 0x148   :  { %v647_v27 = vadd.f32 %v6367_v30, %v646_v13  ;;  %v4618_v12 = vpop.f32.mrb[29].mxu0  ;;  %4697 = vmatmul.mubr.msk.f32.gmra.mrb[16].mxu1 %vm736_vm3, %v6475_v18 }
 0x149   :  { %4699 = vmatprep.mubr.msk.f32.mxu1 %vm5682_vm2, %v5681_v22 }
 0x14a   :  { %v6482_v24 = vmax.f32 %v647_v27, 0.0 }
 0x14b   :  { %v651_v4 = vpop.f32.mrb[30].mxu0 }
 0x14c   :  { %v652_v5 = vadd.f32 %v6367_v30, %v651_v4  ;;  %v4621_v3 = vpop.f32.mrb[31].mxu0  ;;  %4700 = vmatmul.mubr.msk.f32.gmra.mrb[18].mxu1 %vm736_vm3, %v6482_v24 }
 0x14d   :  { %4702 = vmatprep.mubr.msk.f32.mxu1 %vm5682_vm2, %v5681_v22 }
 0x14e   :  { %v6489_v21 = vmax.f32 %v652_v5, 0.0 }
 0x14f   :  { %v656_v12 = vpop.f32.mrb[32].mxu0 }
 0x150   :  { %v657_v13 = vadd.f32 %v6367_v30, %v656_v12  ;;  %v4624_v11 = vpop.f32.mrb[33].mxu0  ;;  %4703 = vmatmul.mubr.msk.f32.gmra.mrb[20].mxu1 %vm736_vm3, %v6489_v21 }
 0x151   :  { %4705 = vmatprep.mubr.msk.f32.mxu1 %vm5682_vm2, %v5681_v22 }
 0x152   :  { %v6496_v27 = vmax.f32 %v657_v13, 0.0 }
 0x153   :  { %v661_v3 = vpop.f32.mrb[34].mxu0 }
 0x154   :  { %v662_v4 = vadd.f32 %v6367_v30, %v661_v3  ;;  %v4627_v2 = vpop.f32.mrb[35].mxu0  ;;  %4706 = vmatmul.mubr.msk.f32.gmra.mrb[22].mxu1 %vm736_vm3, %v6496_v27 }
 0x155   :  { %4708 = vmatprep.mubr.msk.f32.mxu1 %vm5682_vm2, %v5681_v22 }
 0x156   :  { %v6503_v5 = vmax.f32 %v662_v4, 0.0 }
 0x157   :  { %v666_v11 = vpop.f32.mrb[36].mxu0 }
 0x158   :  { %v667_v12 = vadd.f32 %v6367_v30, %v666_v11  ;;  %v4630_v10 = vpop.f32.mrb[37].mxu0  ;;  %4709 = vmatmul.mubr.msk.f32.gmra.mrb[24].mxu1 %vm736_vm3, %v6503_v5 }
 0x159   :  { %4711 = vmatprep.mubr.msk.f32.mxu1 %vm5682_vm2, %v5681_v22 }
 0x15a   :  { %v6510_v13 = vmax.f32 %v667_v12, 0.0 }
 0x15b   :  { %v671_v2 = vpop.f32.mrb[38].mxu0 }
 0x15c   :  { %v672_v3 = vadd.f32 %v6367_v30, %v671_v2  ;;  %v4633_v1 = vpop.f32.mrb[39].mxu0  ;;  %4712 = vmatmul.mubr.msk.f32.gmra.mrb[26].mxu1 %vm736_vm3, %v6510_v13 }
 0x15d   :  { %4714 = vmatprep.mubr.msk.f32.mxu1 %vm5682_vm2, %v5681_v22 }
 0x15e   :  { %v6517_v4 = vmax.f32 %v672_v3, 0.0 }
 0x15f   :  { %v676_v10 = vpop.f32.mrb[40].mxu0 }
 0x160   :  { %v677_v11 = vadd.f32 %v6367_v30, %v676_v10  ;;  %v4636_v9 = vpop.f32.mrb[41].mxu0  ;;  %4715 = vmatmul.mubr.msk.f32.gmra.mrb[28].mxu1 %vm736_vm3, %v6517_v4 }
 0x161   :  { %4717 = vmatprep.mubr.msk.f32.mxu1 %vm5682_vm2, %v5681_v22 }
 0x162   :  { %v6524_v12 = vmax.f32 %v677_v11, 0.0 }
 0x163   :  { %v681_v1 = vpop.f32.mrb[42].mxu0 }
 0x164   :  { %v682_v2 = vadd.f32 %v6367_v30, %v681_v1  ;;  %v4639_v0 = vpop.f32.mrb[43].mxu0  ;;  %4718 = vmatmul.mubr.msk.f32.gmra.mrb[30].mxu1 %vm736_vm3, %v6524_v12 }
 0x165   :  { %4720 = vmatprep.mubr.msk.f32.mxu1 %vm5682_vm2, %v5681_v22 }
 0x166   :  { %v6531_v3 = vmax.f32 %v682_v2, 0.0 }
 0x167   :  { %v686_v9 = vpop.f32.mrb[44].mxu0 }
 0x168   :  { %v687_v10 = vadd.f32 %v6367_v30, %v686_v9  ;;  %v4642_v8 = vpop.f32.mrb[45].mxu0  ;;  %4721 = vmatmul.mubr.msk.f32.gmra.mrb[32].mxu1 %vm736_vm3, %v6531_v3 }
 0x169   :  { %4723 = vmatprep.mubr.msk.f32.mxu1 %vm5682_vm2, %v5681_v22 }
 0x16a   :  { %v6538_v11 = vmax.f32 %v687_v10, 0.0 }
 0x16b   :  { %v691_v0 = vpop.f32.mrb[46].mxu0 }
 0x16c   :  { %v692_v1 = vadd.f32 %v6367_v30, %v691_v0  ;;  %v4645_v55 = vpop.f32.mrb[47].mxu0  ;;  %4724 = vmatmul.mubr.msk.f32.gmra.mrb[34].mxu1 %vm736_vm3, %v6538_v11  ;;  %v4028_v0 = vld [vmem:[%s7530_s3 + $0x48] sm:$0xff] }
 0x16d   :  { %4726 = vmatprep.mubr.msk.f32.mxu1 %vm5682_vm2, %v5681_v22  ;;  %v4027_v55 = vld [vmem:[%s7530_s3 + $0x40] sm:$0xff] }
 0x16e   :  { %v6545_v2 = vmax.f32 %v692_v1, 0.0  ;;  %v4030_v1 = vld [vmem:[%s7530_s3 + $0x58] sm:$0xff] }
 0x16f   :  { %v696_v8 = vpop.f32.mrb[48].mxu0 }
 0x170   :  { %v697_v9 = vadd.f32 %v6367_v30, %v696_v8  ;;  %v4648_v63 = vpop.f32.mrb[49].mxu0  ;;  %4727 = vmatmul.mubr.msk.f32.gmra.mrb[36].mxu1 %vm736_vm3, %v6545_v2  ;;  %v4029_v30 = vld [vmem:[%s7530_s3 + $0x50] sm:$0xff] }
 0x171   :  { %4729 = vmatprep.mubr.msk.f32.mxu1 %vm5682_vm2, %v5681_v22  ;;  %v5344_v63 = vpack.c.bf16 %v4028_v0, %v4027_v55  ;;  %v5347_v8 = vpack.c.bf16 %v4030_v1, %v4029_v30  ;;  %v4057_v55 = vld [vmem:[%s7530_s3 + $0x68] sm:$0xff]  ;;  %v4059_v30 = vld [vmem:[%s7530_s3 + $0x78] sm:$0xff] }
 0x172   :  { %v6552_v10 = vmax.f32 %v697_v9, 0.0  ;;  %v4056_v9 = vld [vmem:[%s7530_s3 + $0x60] sm:$0xff] }
 0x173   :  { %v5350_v0 = vpack.c.bf16 %v4057_v55, %v4056_v9 }
 0x174   :  { %4730 = vmatmul.mubr.msk.f32.gmra.mrb[38].mxu1 %vm736_vm3, %v6552_v10 }
 0x175   :  { %4740 = vmatprep.mubr.msk.f32.mxu1 %vm5682_vm2, %v5681_v22 }
 0x178   :  { %4741 = vmatmul.mubr.msk.f32.vlgmr.msra.gmra.mrb[40].mxu1 %vm736_vm3, %v6370_v28 }
 0x179   :  { %5345 = vmatpush3.bf16.msra.mxu1 %v5344_v63  ;;  %4743 = vmatprep.mubr.msk.f32.mxu1 %vm5682_vm2, %v5681_v22  ;;  %v4058_v63 = vld [vmem:[%s7530_s3 + $0x70] sm:$0xff] }
 0x17a   :  { %5346 = vmatprep.subr.bf16.mxu1 %v7587_v20  ;;  %v5353_v1 = vpack.c.bf16 %v4059_v30, %v4058_v63 }
 0x17c   :  { %4744 = vmatmul.mubr.msk.f32.gmra.mrb[42].mxu1 %vm736_vm3, %v6377_v23 }
 0x17d   :  { %4746 = vmatprep.mubr.msk.f32.mxu1 %vm5682_vm2, %v5681_v22  ;;  %5348 = vmatpush3.bf16.msra.mxu1 %v5347_v8 }
 0x17e   :  { %5349 = vmatprep.subr.bf16.mxu1 %v7587_v20 }
 0x180   :  { %4747 = vmatmul.mubr.msk.f32.gmra.mrb[44].mxu1 %vm736_vm3, %v6384_v19 }
 0x181   :  { %4749 = vmatprep.mubr.msk.f32.mxu1 %vm5682_vm2, %v5681_v22 }
 0x184   :  { %4750 = vmatmul.mubr.msk.f32.gmra.mrb[46].mxu1 %vm736_vm3, %v6391_v26 }
 0x185   :  { %4752 = vmatprep.mubr.msk.f32.mxu1 %vm5682_vm2, %v5681_v22 }
 0x188   :  { %4753 = vmatmul.mubr.msk.f32.gmra.mrb[48].mxu1 %vm736_vm3, %v6398_v17 }
 0x189   :  { %4755 = vmatprep.mubr.msk.f32.mxu1 %vm5682_vm2, %v5681_v22 }
 0x18c   :  { %4756 = vmatmul.mubr.msk.f32.gmra.mrb[50].mxu1 %vm736_vm3, %v6411_v31 }
 0x18d   :  { %4758 = vmatprep.mubr.msk.f32.mxu1 %vm5682_vm2, %v5681_v22 }
 0x190   :  { %4759 = vmatmul.mubr.msk.f32.gmra.mrb[52].mxu1 %vm736_vm3, %v6424_v29 }
 0x191   :  { %4761 = vmatprep.mubr.msk.f32.mxu1 %vm5682_vm2, %v5681_v22 }
 0x194   :  { %4762 = vmatmul.mubr.msk.f32.gmra.mrb[2].mxu1 %vm736_vm3, %v6432_v15 }
 0x195   :  { %4764 = vmatprep.mubr.msk.f32.mxu1 %vm5682_vm2, %v5681_v22 }
 0x198   :  { %4765 = vmatmul.mubr.msk.f32.gmra.mrb[54].mxu1 %vm736_vm3, %v6440_v14 }
 0x199   :  { %4767 = vmatprep.mubr.msk.f32.mxu1 %vm5682_vm2, %v5681_v22 }
 0x19c   :  { %4768 = vmatmul.mubr.msk.f32.gmra.mrb[56].mxu1 %vm736_vm3, %v6447_v6 }
 0x19d   :  { %4770 = vmatprep.mubr.msk.f32.mxu1 %vm5682_vm2, %v5681_v22 }
 0x1a0   :  { %4771 = vmatmul.mubr.msk.f32.gmra.mrb[8].mxu1 %vm736_vm3, %v6454_v16 }
 0x1a1   :  { %4773 = vmatprep.mubr.msk.f32.mxu1 %vm5682_vm2, %v5681_v22 }
 0x1a4   :  { %4774 = vmatmul.mubr.msk.f32.gmra.mrb[58].mxu1 %vm736_vm3, %v6461_v25 }
 0x1a5   :  { %4776 = vmatprep.mubr.msk.f32.mxu1 %vm5682_vm2, %v5681_v22 }
 0x1a8   :  { %4777 = vmatmul.mubr.msk.f32.gmra.mrb[60].mxu1 %vm736_vm3, %v6468_v7 }
 0x1a9   :  { %4779 = vmatprep.mubr.msk.f32.mxu1 %vm5682_vm2, %v5681_v22 }
 0x1ac   :  { %4780 = vmatmul.mubr.msk.f32.gmra.mrb[14].mxu1 %vm736_vm3, %v6475_v18 }
 0x1ad   :  { %4782 = vmatprep.mubr.msk.f32.mxu1 %vm5682_vm2, %v5681_v22 }
 0x1b0   :  { %4783 = vmatmul.mubr.msk.f32.gmra.mrb[62].mxu1 %vm736_vm3, %v6482_v24 }
 0x1b1   :  { %4785 = vmatprep.mubr.msk.f32.mxu1 %vm5682_vm2, %v5681_v22 }
 0x1b4   :  { %4786 = vmatmul.mubr.msk.f32.gmra.mrb[64].mxu1 %vm736_vm3, %v6489_v21 }
 0x1b5   :  { %4788 = vmatprep.mubr.msk.f32.mxu1 %vm5682_vm2, %v5681_v22 }
 0x1b8   :  { %4789 = vmatmul.mubr.msk.f32.gmra.mrb[20].mxu1 %vm736_vm3, %v6496_v27 }
 0x1b9   :  { %4791 = vmatprep.mubr.msk.f32.mxu1 %vm5682_vm2, %v5681_v22 }
 0x1bc   :  { %4792 = vmatmul.mubr.msk.f32.gmra.mrb[66].mxu1 %vm736_vm3, %v6503_v5 }
 0x1bd   :  { %4794 = vmatprep.mubr.msk.f32.mxu1 %vm5682_vm2, %v5681_v22 }
 0x1c0   :  { %4795 = vmatmul.mubr.msk.f32.gmra.mrb[68].mxu1 %vm736_vm3, %v6510_v13 }
 0x1c1   :  { %4797 = vmatprep.mubr.msk.f32.mxu1 %vm5682_vm2, %v5681_v22 }
 0x1c4   :  { %4798 = vmatmul.mubr.msk.f32.gmra.mrb[26].mxu1 %vm736_vm3, %v6517_v4 }
 0x1c5   :  { %4800 = vmatprep.mubr.msk.f32.mxu1 %vm5682_vm2, %v5681_v22 }
 0x1c8   :  { %4801 = vmatmul.mubr.msk.f32.gmra.mrb[70].mxu1 %vm736_vm3, %v6524_v12 }
 0x1c9   :  { %4803 = vmatprep.mubr.msk.f32.mxu1 %vm5682_vm2, %v5681_v22 }
 0x1cc   :  { %4804 = vmatmul.mubr.msk.f32.gmra.mrb[72].mxu1 %vm736_vm3, %v6531_v3 }
 0x1cd   :  { %4806 = vmatprep.mubr.msk.f32.mxu1 %vm5682_vm2, %v5681_v22 }
 0x1d0   :  { %4807 = vmatmul.mubr.msk.f32.gmra.mrb[74].mxu1 %vm736_vm3, %v6538_v11 }
 0x1d1   :  { %4809 = vmatprep.mubr.msk.f32.mxu1 %vm5682_vm2, %v5681_v22 }
 0x1d4   :  { %4810 = vmatmul.mubr.msk.f32.gmra.mrb[76].mxu1 %vm736_vm3, %v6545_v2 }
 0x1d5   :  { %4812 = vmatprep.mubr.msk.f32.mxu1 %vm5682_vm2, %v5681_v22 }
 0x1d8   :  { %4813 = vmatmul.mubr.msk.f32.gmra.mrb[78].mxu1 %vm736_vm3, %v6552_v10 }
 0x1d9   :  { %4823 = vmatprep.mubr.msk.f32.mxu1 %vm5682_vm2, %v5681_v22 }
 0x1dc   :  { %4824 = vmatmul.mubr.msk.f32.vlgmr.msra.gmra.mrb[80].mxu1 %vm736_vm3, %v6370_v28 }
 0x1dd   :  { %5351 = vmatpush3.bf16.msra.mxu1 %v5350_v0  ;;  %4826 = vmatprep.mubr.msk.f32.mxu1 %vm5682_vm2, %v5681_v22 }
 0x1de   :  { %5352 = vmatprep.subr.bf16.mxu1 %v7587_v20 }
 0x1e0   :  { %4827 = vmatmul.mubr.msk.f32.gmra.mrb[82].mxu1 %vm736_vm3, %v6377_v23 }
 0x1e1   :  { %4829 = vmatprep.mubr.msk.f32.mxu1 %vm5682_vm2, %v5681_v22  ;;  %5354 = vmatpush3.bf16.msra.mxu1 %v5353_v1 }
 0x1e2   :  { %5355 = vmatprep.subr.bf16.mxu1 %v7587_v20 }
 0x1e4   :  { %4830 = vmatmul.mubr.msk.f32.gmra.mrb[42].mxu1 %vm736_vm3, %v6384_v19 }
 0x1e5   :  { %4832 = vmatprep.mubr.msk.f32.mxu1 %vm5682_vm2, %v5681_v22 }
 0x1e7   :  { %v6698_v8 = vpop.f32.mrb[50].mxu0 }
 0x1e8   :  { %v4659_v9 = vpop.f32.mrb[51].mxu0  ;;  %4833 = vmatmul.mubr.msk.f32.gmra.mrb[84].mxu1 %vm736_vm3, %v6391_v26 }
 0x1e9   :  { %4835 = vmatprep.mubr.msk.f32.mxu1 %vm5682_vm2, %v5681_v22 }
 0x1eb   :  { %v883_v55 = vpop.f32.mrb[52].mxu0 }
 0x1ec   :  { %v4662_v0 = vpop.f32.mrb[53].mxu0  ;;  %4836 = vmatmul.mubr.msk.f32.gmra.mrb[86].mxu1 %vm736_vm3, %v6398_v17 }
 0x1ed   :  { %4838 = vmatprep.mubr.msk.f32.mxu1 %vm5682_vm2, %v5681_v22 }
 0x1ef   :  { %v887_v63 = vpop.f32.mrb[54].mxu0 }
 0x1f0   :  { %v4665_v30 = vpop.f32.mrb[55].mxu0  ;;  %4839 = vmatmul.mubr.msk.f32.gmra.mrb[48].mxu1 %vm736_vm3, %v6411_v31 }
 0x1f1   :  { %4841 = vmatprep.mubr.msk.f32.mxu1 %vm5682_vm2, %v5681_v22 }
 0x1f3   :  { %v6712_v1 = vpop.f32.mrb[56].mxu0 }
 0x1f4   :  { %v4668_v9 = vpop.f32.mrb[57].mxu0  ;;  %4842 = vmatmul.mubr.msk.f32.gmra.mrb[88].mxu1 %vm736_vm3, %v6424_v29 }
 0x1f5   :  { %4844 = vmatprep.mubr.msk.f32.mxu1 %vm5682_vm2, %v5681_v22 }
 0x1f7   :  { %v896_v55 = vpop.f32.mrb[58].mxu0 }
 0x1f8   :  { %v4671_v0 = vpop.f32.mrb[59].mxu0  ;;  %4845 = vmatmul.mubr.msk.f32.gmra.mrb[90].mxu1 %vm736_vm3, %v6432_v15 }
 0x1f9   :  { %4847 = vmatprep.mubr.msk.f32.mxu1 %vm5682_vm2, %v5681_v22 }
 0x1fb   :  { %v900_v63 = vpop.f32.mrb[0].mxu1 }
 0x1fc   :  { %v4674_v30 = vpop.f32.mrb[1].mxu1  ;;  %4848 = vmatmul.mubr.msk.f32.gmra.mrb[2].mxu1 %vm736_vm3, %v6440_v14 }
 0x1fd   :  { %4850 = vmatprep.mubr.msk.f32.mxu1 %vm5682_vm2, %v5681_v22 }
 0x200   :  { %4851 = vmatmul.mubr.msk.f32.gmra.mrb[92].mxu1 %vm736_vm3, %v6447_v6 }
 0x201   :  { %4853 = vmatprep.mubr.msk.f32.mxu1 %vm5682_vm2, %v5681_v22 }
 0x203   :  { %v909_v9 = vpop.f32.mrb[4].mxu1 }
 0x204   :  { %v4680_v55 = vpop.f32.mrb[5].mxu1  ;;  %4854 = vmatmul.mubr.msk.f32.gmra.mrb[94].mxu1 %vm736_vm3, %v6454_v16 }
 0x205   :  { %4856 = vmatprep.mubr.msk.f32.mxu1 %vm5682_vm2, %v5681_v22 }
 0x207   :  { %v913_v0 = vpop.f32.mrb[6].mxu1 }
 0x208   :  { %v4683_v63 = vpop.f32.mrb[7].mxu1  ;;  %4857 = vmatmul.mubr.msk.f32.gmra.mrb[8].mxu1 %vm736_vm3, %v6461_v25 }
 0x209   :  { %4859 = vmatprep.mubr.msk.f32.mxu1 %vm5682_vm2, %v5681_v22 }
 0x20c   :  { %4860 = vmatmul.mubr.msk.f32.gmra.mrb[96].mxu1 %vm736_vm3, %v6468_v7 }
 0x20d   :  { %4862 = vmatprep.mubr.msk.f32.mxu1 %vm5682_vm2, %v5681_v22 }
 0x20f   :  { %v922_v30 = vpop.f32.mrb[10].mxu1 }
 0x210   :  { %v4689_v9 = vpop.f32.mrb[11].mxu1  ;;  %4863 = vmatmul.mubr.msk.f32.gmra.mrb[98].mxu1 %vm736_vm3, %v6475_v18 }
 0x211   :  { %4865 = vmatprep.mubr.msk.f32.mxu1 %vm5682_vm2, %v5681_v22 }
 0x213   :  { %v926_v55 = vpop.f32.mrb[12].mxu1 }
 0x214   :  { %v4692_v0 = vpop.f32.mrb[13].mxu1  ;;  %4866 = vmatmul.mubr.msk.f32.gmra.mrb[14].mxu1 %vm736_vm3, %v6482_v24 }
 0x215   :  { %4868 = vmatprep.mubr.msk.f32.mxu1 %vm5682_vm2, %v5681_v22 }
 0x218   :  { %4869 = vmatmul.mubr.msk.f32.gmra.mrb[100].mxu1 %vm736_vm3, %v6489_v21 }
 0x219   :  { %4871 = vmatprep.mubr.msk.f32.mxu1 %vm5682_vm2, %v5681_v22 }
 0x21b   :  { %v935_v63 = vpop.f32.mrb[16].mxu1 }
 0x21c   :  { %v4698_v30 = vpop.f32.mrb[17].mxu1  ;;  %4872 = vmatmul.mubr.msk.f32.gmra.mrb[102].mxu1 %vm736_vm3, %v6496_v27 }
 0x21d   :  { %4874 = vmatprep.mubr.msk.f32.mxu1 %vm5682_vm2, %v5681_v22 }
 0x21f   :  { %v939_v9 = vpop.f32.mrb[18].mxu1 }
 0x220   :  { %v4701_v55 = vpop.f32.mrb[19].mxu1  ;;  %4875 = vmatmul.mubr.msk.f32.gmra.mrb[20].mxu1 %vm736_vm3, %v6503_v5 }
 0x221   :  { %4877 = vmatprep.mubr.msk.f32.mxu1 %vm5682_vm2, %v5681_v22 }
 0x224   :  { %4878 = vmatmul.mubr.msk.f32.gmra.mrb[104].mxu1 %vm736_vm3, %v6510_v13 }
 0x225   :  { %4880 = vmatprep.mubr.msk.f32.mxu1 %vm5682_vm2, %v5681_v22 }
 0x227   :  { %v948_v0 = vpop.f32.mrb[22].mxu1 }
 0x228   :  { %v4707_v63 = vpop.f32.mrb[23].mxu1  ;;  %4881 = vmatmul.mubr.msk.f32.gmra.mrb[106].mxu1 %vm736_vm3, %v6517_v4 }
 0x229   :  { %4883 = vmatprep.mubr.msk.f32.mxu1 %vm5682_vm2, %v5681_v22 }
 0x22b   :  { %v952_v30 = vpop.f32.mrb[24].mxu1 }
 0x22c   :  { %v4710_v9 = vpop.f32.mrb[25].mxu1  ;;  %4884 = vmatmul.mubr.msk.f32.gmra.mrb[26].mxu1 %vm736_vm3, %v6524_v12 }
 0x22d   :  { %4886 = vmatprep.mubr.msk.f32.mxu1 %vm5682_vm2, %v5681_v22  ;;  %v4085_v9 = vld [vmem:[%s7530_s3 + $0x80] sm:$0xff] }
 0x230   :  { %4887 = vmatmul.mubr.msk.f32.gmra.mrb[108].mxu1 %vm736_vm3, %v6531_v3 }
 0x231   :  { %4889 = vmatprep.mubr.msk.f32.mxu1 %vm5682_vm2, %v5681_v22 }
 0x233   :  { %v961_v55 = vpop.f32.mrb[28].mxu1 }
 0x234   :  { %v4716_v0 = vpop.f32.mrb[29].mxu1  ;;  %4890 = vmatmul.mubr.msk.f32.gmra.mrb[110].mxu1 %vm736_vm3, %v6538_v11  ;;  %v4086_v55 = vld [vmem:[%s7530_s3 + $0x88] sm:$0xff] }
 0x235   :  { %4892 = vmatprep.mubr.msk.f32.mxu1 %vm5682_vm2, %v5681_v22 }
 0x237   :  { %v965_v63 = vpop.f32.mrb[30].mxu1 }
 0x238   :  { %v4719_v30 = vpop.f32.mrb[31].mxu1  ;;  %4893 = vmatmul.mubr.msk.f32.gmra.mrb[112].mxu1 %vm736_vm3, %v6545_v2  ;;  %v5356_v63 = vpack.c.bf16 %v4086_v55, %v4085_v9 }
 0x239   :  { %4895 = vmatprep.mubr.msk.f32.mxu1 %vm5682_vm2, %v5681_v22  ;;  %v4087_v30 = vld [vmem:[%s7530_s3 + $0x90] sm:$0xff] }
 0x23b   :  { %v969_v0 = vpop.f32.mrb[32].mxu1 }
 0x23c   :  { %v4722_v54 = vpop.f32.mrb[33].mxu1  ;;  %4896 = vmatmul.mubr.msk.f32.gmra.mrb[114].mxu1 %vm736_vm3, %v6552_v10 }
 0x23d   :  { %4906 = vmatprep.mubr.msk.f32.mxu1 %vm5682_vm2, %v5681_v22  ;;  %v5359_v54 = vpack.c.bf16 %v4088_v62, %v4087_v30 }
 0x23f   :  { %v973_v53 = vpop.f32.mrb[34].mxu1 }
 0x240   :  { %v4725_v61 = vpop.f32.mrb[35].mxu1  ;;  %4907 = vmatmul.mubr.msk.f32.vlgmr.msra.gmra.mrb[116].mxu1 %vm736_vm3, %v6370_v28 }
 0x241   :  { %5357 = vmatpush3.bf16.msra.mxu1 %v5356_v63  ;;  %4909 = vmatprep.mubr.msk.f32.mxu1 %vm5682_vm2, %v5681_v22 }
 0x242   :  { %5358 = vmatprep.subr.bf16.mxu1 %v7587_v20 }
 0x243   :  { %v977_v9 = vpop.f32.mrb[36].mxu1 }
 0x244   :  { %v4728_v55 = vpop.f32.mrb[37].mxu1  ;;  %4910 = vmatmul.mubr.msk.f32.gmra.mrb[118].mxu1 %vm736_vm3, %v6377_v23 }
 0x245   :  { %4912 = vmatprep.mubr.msk.f32.mxu1 %vm5682_vm2, %v5681_v22  ;;  %5360 = vmatpush3.bf16.msra.mxu1 %v5359_v54 }
 0x247   :  { %v981_v53 = vpop.f32.mrb[38].mxu1 }
 0x248   :  { %v4731_v61 = vpop.f32.mrb[39].mxu1  ;;  %4913 = vmatmul.mubr.msk.f32.gmra.mrb[120].mxu1 %vm736_vm3, %v6384_v19 }
 0x249   :  { %4915 = vmatprep.mubr.msk.f32.mxu1 %vm5682_vm2, %v5681_v22 }
 0x24b   :  { %v1062_v62 = vpop.f32.mrb[40].mxu1 }
 0x24c   :  { %v4742_v0 = vpop.f32.mrb[41].mxu1  ;;  %4916 = vmatmul.mubr.msk.f32.gmra.mrb[42].mxu1 %vm736_vm3, %v6391_v26 }
 0x24d   :  { %4918 = vmatprep.mubr.msk.f32.mxu1 %vm5682_vm2, %v5681_v22 }
 0x250   :  { %4919 = vmatmul.mubr.msk.f32.gmra.mrb[122].mxu1 %vm736_vm3, %v6398_v17 }
 0x251   :  { %4921 = vmatprep.mubr.msk.f32.mxu1 %vm5682_vm2, %v5681_v22 }
 0x253   :  { %v1071_v63 = vpop.f32.mrb[44].mxu1 }
 0x254   :  { %v4748_v30 = vpop.f32.mrb[45].mxu1  ;;  %4922 = vmatmul.mubr.msk.f32.gmra.mrb[124].mxu1 %vm736_vm3, %v6411_v31 }
 0x255   :  { %4924 = vmatprep.mubr.msk.f32.mxu1 %vm5682_vm2, %v5681_v22 }
 0x257   :  { %v1075_v54 = vpop.f32.mrb[46].mxu1 }
 0x258   :  { %v4751_v9 = vpop.f32.mrb[47].mxu1  ;;  %4925 = vmatmul.mubr.msk.f32.gmra.mrb[48].mxu1 %vm736_vm3, %v6424_v29 }
 0x259   :  { %4927 = vmatprep.mubr.msk.f32.mxu1 %vm5682_vm2, %v5681_v22 }
 0x25c   :  { %4928 = vmatmul.mubr.msk.f32.gmra.mrb[126].mxu1 %vm736_vm3, %v6432_v15 }
 0x25d   :  { %4930 = vmatprep.mubr.msk.f32.mxu1 %vm5682_vm2, %v5681_v22 }
 0x25f   :  { %v1084_v55 = vpop.f32.mrb[50].mxu1 }
 0x260   :  { %v4757_v53 = vpop.f32.mrb[51].mxu1  ;;  %4931 = vmatmul.mubr.msk.f32.gmra.mrb[128].mxu1 %vm736_vm3, %v6440_v14 }
 0x261   :  { %4933 = vmatprep.mubr.msk.f32.mxu1 %vm5682_vm2, %v5681_v22 }
 0x263   :  { %v1088_v61 = vpop.f32.mrb[52].mxu1 }
 0x264   :  { %v4760_v62 = vpop.f32.mrb[53].mxu1  ;;  %4934 = vmatmul.mubr.msk.f32.gmra.mrb[2].mxu1 %vm736_vm3, %v6447_v6 }
 0x265   :  { %4936 = vmatprep.mubr.msk.f32.mxu1 %vm5682_vm2, %v5681_v22 }
 0x268   :  { %4937 = vmatmul.mubr.msk.f32.gmra.mrb[130].mxu1 %vm736_vm3, %v6454_v16 }
 0x269   :  { %4939 = vmatprep.mubr.msk.f32.mxu1 %vm5682_vm2, %v5681_v22 }
 0x26b   :  { %v1097_v0 = vpop.f32.mrb[54].mxu1 }
 0x26c   :  { %v4766_v63 = vpop.f32.mrb[55].mxu1  ;;  %4940 = vmatmul.mubr.msk.f32.gmra.mrb[132].mxu1 %vm736_vm3, %v6461_v25 }
 0x26d   :  { %4942 = vmatprep.mubr.msk.f32.mxu1 %vm5682_vm2, %v5681_v22 }
 0x26f   :  { %v1101_v30 = vpop.f32.mrb[56].mxu1 }
 0x270   :  { %v4769_v54 = vpop.f32.mrb[57].mxu1  ;;  %4943 = vmatmul.mubr.msk.f32.gmra.mrb[8].mxu1 %vm736_vm3, %v6468_v7 }
 0x271   :  { %4945 = vmatprep.mubr.msk.f32.mxu1 %vm5682_vm2, %v5681_v22 }
 0x274   :  { %4946 = vmatmul.mubr.msk.f32.gmra.mrb[134].mxu1 %vm736_vm3, %v6475_v18 }
 0x275   :  { %4948 = vmatprep.mubr.msk.f32.mxu1 %vm5682_vm2, %v5681_v22 }
 0x277   :  { %v1110_v9 = vpop.f32.mrb[58].mxu1 }
 0x278   :  { %v4775_v55 = vpop.f32.mrb[59].mxu1  ;;  %4949 = vmatmul.mubr.msk.f32.gmra.mrb[136].mxu1 %vm736_vm3, %v6482_v24 }
 0x279   :  { %4951 = vmatprep.mubr.msk.f32.mxu1 %vm5682_vm2, %v5681_v22 }
 0x27b   :  { %v1114_v53 = vpop.f32.mrb[60].mxu1 }
 0x27c   :  { %v4778_v61 = vpop.f32.mrb[61].mxu1  ;;  %4952 = vmatmul.mubr.msk.f32.gmra.mrb[14].mxu1 %vm736_vm3, %v6489_v21 }
 0x27d   :  { %4954 = vmatprep.mubr.msk.f32.mxu1 %vm5682_vm2, %v5681_v22 }
 0x280   :  { %4955 = vmatmul.mubr.msk.f32.gmra.mrb[138].mxu1 %vm736_vm3, %v6496_v27 }
 0x281   :  { %4957 = vmatprep.mubr.msk.f32.mxu1 %vm5682_vm2, %v5681_v22 }
 0x283   :  { %v1123_v62 = vpop.f32.mrb[62].mxu1 }
 0x284   :  { %v4784_v0 = vpop.f32.mrb[63].mxu1  ;;  %4958 = vmatmul.mubr.msk.f32.gmra.mrb[140].mxu1 %vm736_vm3, %v6503_v5 }
 0x285   :  { %4960 = vmatprep.mubr.msk.f32.mxu1 %vm5682_vm2, %v5681_v22 }
 0x287   :  { %v1127_v63 = vpop.f32.mrb[64].mxu1 }
 0x288   :  { %v4787_v30 = vpop.f32.mrb[65].mxu1  ;;  %4961 = vmatmul.mubr.msk.f32.gmra.mrb[20].mxu1 %vm736_vm3, %v6510_v13 }
 0x289   :  { %4963 = vmatprep.mubr.msk.f32.mxu1 %vm5682_vm2, %v5681_v22 }
 0x28c   :  { %4964 = vmatmul.mubr.msk.f32.gmra.mrb[142].mxu1 %vm736_vm3, %v6517_v4 }
 0x28d   :  { %4966 = vmatprep.mubr.msk.f32.mxu1 %vm5682_vm2, %v5681_v22 }
 0x28f   :  { %v1136_v54 = vpop.f32.mrb[66].mxu1 }
 0x290   :  { %v4793_v9 = vpop.f32.mrb[67].mxu1  ;;  %4967 = vmatmul.mubr.msk.f32.gmra.mrb[144].mxu1 %vm736_vm3, %v6524_v12 }
 0x291   :  { %4969 = vmatprep.mubr.msk.f32.mxu1 %vm5682_vm2, %v5681_v22 }
 0x293   :  { %v1140_v55 = vpop.f32.mrb[68].mxu1 }
 0x294   :  { %v4796_v53 = vpop.f32.mrb[69].mxu1  ;;  %4970 = vmatmul.mubr.msk.f32.gmra.mrb[26].mxu1 %vm736_vm3, %v6531_v3 }
 0x295   :  { %4972 = vmatprep.mubr.msk.f32.mxu1 %vm5682_vm2, %v5681_v22 }
 0x298   :  { %4973 = vmatmul.mubr.msk.f32.gmra.mrb[146].mxu1 %vm736_vm3, %v6538_v11 }
 0x299   :  { %4975 = vmatprep.mubr.msk.f32.mxu1 %vm5682_vm2, %v5681_v22 }
 0x29b   :  { %v1149_v61 = vpop.f32.mrb[70].mxu1 }
 0x29c   :  { %v4802_v62 = vpop.f32.mrb[71].mxu1  ;;  %4976 = vmatmul.mubr.msk.f32.gmra.mrb[148].mxu1 %vm736_vm3, %v6545_v2 }
 0x29d   :  { %4978 = vmatprep.mubr.msk.f32.mxu1 %vm5682_vm2, %v5681_v22 }
 0x29f   :  { %v1153_v0 = vpop.f32.mrb[72].mxu1 }
 0x2a0   :  { %v4805_v63 = vpop.f32.mrb[73].mxu1  ;;  %4979 = vmatmul.mubr.msk.f32.gmra.mrb[150].mxu1 %vm736_vm3, %v6552_v10 }
 0x2a1   :  { %4989 = vmatprep.mubr.msk.f32.mxu1 %vm5682_vm2, %v5681_v22 }
 0x2a3   :  { %v1157_v30 = vpop.f32.mrb[74].mxu1 }
 0x2a4   :  { %v4808_v54 = vpop.f32.mrb[75].mxu1  ;;  %4990 = vmatmul.mubr.msk.f32.vlgmr.msra.gmra.mrb[152].mxu1 %vm736_vm3, %v6370_v28 }
 0x2a5   :  { %4992 = vmatprep.mubr.msk.f32.mxu1 %vm5682_vm2, %v5681_v22 }
 0x2a7   :  { %v1161_v9 = vpop.f32.mrb[76].mxu1 }
 0x2a8   :  { %v4811_v55 = vpop.f32.mrb[77].mxu1  ;;  %4993 = vmatmul.mubr.msk.f32.gmra.mrb[154].mxu1 %vm736_vm3, %v6377_v23 }
 0x2a9   :  { %4995 = vmatprep.mubr.msk.f32.mxu1 %vm5682_vm2, %v5681_v22 }
 0x2ab   :  { %v1165_v53 = vpop.f32.mrb[78].mxu1 }
 0x2ac   :  { %v4814_v61 = vpop.f32.mrb[79].mxu1  ;;  %4996 = vmatmul.mubr.msk.f32.gmra.mrb[156].mxu1 %vm736_vm3, %v6384_v19 }
 0x2ad   :  { %4998 = vmatprep.mubr.msk.f32.mxu1 %vm5682_vm2, %v5681_v22 }
 0x2af   :  { %v1246_v28 = vpop.f32.mrb[80].mxu1 }
 0x2b0   :  { %v4825_v62 = vpop.f32.mrb[81].mxu1  ;;  %4999 = vmatmul.mubr.msk.f32.gmra.mrb[158].mxu1 %vm736_vm3, %v6391_v26 }
 0x2b1   :  { %5001 = vmatprep.mubr.msk.f32.mxu1 %vm5682_vm2, %v5681_v22  ;;  %v1759_v62 = vld [vmem:[%s7532_s5 + $0x18] sm:$0xff] }
 0x2b3   :  { %v1250_v23 = vpop.f32.mrb[82].mxu1 }
 0x2b4   :  { %v4828_v0 = vpop.f32.mrb[83].mxu1  ;;  %5002 = vmatmul.mubr.msk.f32.gmra.mrb[42].mxu1 %vm736_vm3, %v6398_v17 }
 0x2b5   :  { %5004 = vmatprep.mubr.msk.f32.mxu1 %vm5682_vm2, %v5681_v22 }
 0x2b8   :  { %5005 = vmatmul.mubr.msk.f32.gmra.mrb[160].mxu1 %vm736_vm3, %v6411_v31 }
 0x2b9   :  { %5007 = vmatprep.mubr.msk.f32.mxu1 %vm5682_vm2, %v5681_v22 }
 0x2bb   :  { %v1259_v19 = vpop.f32.mrb[84].mxu1 }
 0x2bc   :  { %v4834_v63 = vpop.f32.mrb[85].mxu1  ;;  %5008 = vmatmul.mubr.msk.f32.gmra.mrb[162].mxu1 %vm736_vm3, %v6424_v29 }
 0x2bd   :  { %5010 = vmatprep.mubr.msk.f32.mxu1 %vm5682_vm2, %v5681_v22  ;;  %v1761_v63 = vld [vmem:[%s7532_s5 + $0x28] sm:$0xff] }
 0x2bf   :  { %v1263_v26 = vpop.f32.mrb[86].mxu1 }
 0x2c0   :  { %v4837_v30 = vpop.f32.mrb[87].mxu1  ;;  %5011 = vmatmul.mubr.msk.f32.gmra.mrb[48].mxu1 %vm736_vm3, %v6432_v15 }
 0x2c1   :  { %5013 = vmatprep.mubr.msk.f32.mxu1 %vm5682_vm2, %v5681_v22 }
 0x2c4   :  { %5014 = vmatmul.mubr.msk.f32.gmra.mrb[164].mxu1 %vm736_vm3, %v6440_v14 }
 0x2c5   :  { %5016 = vmatprep.mubr.msk.f32.mxu1 %vm5682_vm2, %v5681_v22 }
 0x2c7   :  { %v1272_v17 = vpop.f32.mrb[88].mxu1 }
 0x2c8   :  { %v4843_v31 = vpop.f32.mrb[89].mxu1  ;;  %5017 = vmatmul.mubr.msk.f32.gmra.mrb[166].mxu1 %vm736_vm3, %v6447_v6 }
 0x2c9   :  { %5019 = vmatprep.mubr.msk.f32.mxu1 %vm5682_vm2, %v5681_v22  ;;  %v1762_v31 = vld [vmem:[%s7532_s5 + $0x30] sm:$0xff] }
 0x2cb   :  { %v1276_v29 = vpop.f32.mrb[90].mxu1 }
 0x2cc   :  { %v4846_v54 = vpop.f32.mrb[91].mxu1  ;;  %5020 = vmatmul.mubr.msk.f32.gmra.mrb[2].mxu1 %vm736_vm3, %v6454_v16  ;;  %v1763_v29 = vld [vmem:[%s7532_s5 + $0x38] sm:$0xff] }
 0x2cd   :  { %5022 = vmatprep.mubr.msk.f32.mxu1 %vm5682_vm2, %v5681_v22 }
 0x2d0   :  { %5023 = vmatmul.mubr.msk.f32.gmra.mrb[168].mxu1 %vm736_vm3, %v6461_v25 }
 0x2d1   :  { %5025 = vmatprep.mubr.msk.f32.mxu1 %vm5682_vm2, %v5681_v22 }
 0x2d3   :  { %v1285_v15 = vpop.f32.mrb[92].mxu1 }
 0x2d4   :  { %v4852_v14 = vpop.f32.mrb[93].mxu1  ;;  %5026 = vmatmul.mubr.msk.f32.gmra.mrb[170].mxu1 %vm736_vm3, %v6468_v7  ;;  %v5371_v15 = vpack.c.bf16 %v1763_v29, %v1762_v31 }
 0x2d5   :  { %5028 = vmatprep.mubr.msk.f32.mxu1 %vm5682_vm2, %v5681_v22 }
 0x2d7   :  { %v1289_v6 = vpop.f32.mrb[94].mxu1 }
 0x2d8   :  { %v4855_v9 = vpop.f32.mrb[95].mxu1  ;;  %5029 = vmatmul.mubr.msk.f32.gmra.mrb[8].mxu1 %vm736_vm3, %v6475_v18 }
 0x2d9   :  { %5031 = vmatprep.mubr.msk.f32.mxu1 %vm5682_vm2, %v5681_v22 }
 0x2dc   :  { %5032 = vmatmul.mubr.msk.f32.gmra.mrb[172].mxu1 %vm736_vm3, %v6482_v24 }
 0x2dd   :  { %5034 = vmatprep.mubr.msk.f32.mxu1 %vm5682_vm2, %v5681_v22 }
 0x2df   :  { %v1298_v16 = vpop.f32.mrb[96].mxu1 }
 0x2e0   :  { %v4861_v25 = vpop.f32.mrb[97].mxu1  ;;  %5035 = vmatmul.mubr.msk.f32.gmra.mrb[174].mxu1 %vm736_vm3, %v6489_v21 }
 0x2e1   :  { %5037 = vmatprep.mubr.msk.f32.mxu1 %vm5682_vm2, %v5681_v22 }
 0x2e3   :  { %v1302_v7 = vpop.f32.mrb[98].mxu1 }
 0x2e4   :  { %v4864_v55 = vpop.f32.mrb[99].mxu1  ;;  %5038 = vmatmul.mubr.msk.f32.gmra.mrb[14].mxu1 %vm736_vm3, %v6496_v27 }
 0x2e5   :  { %5040 = vmatprep.mubr.msk.f32.mxu1 %vm5682_vm2, %v5681_v22 }
 0x2e8   :  { %5041 = vmatmul.mubr.msk.f32.gmra.mrb[176].mxu1 %vm736_vm3, %v6503_v5 }
 0x2e9   :  { %5043 = vmatprep.mubr.msk.f32.mxu1 %vm5682_vm2, %v5681_v22 }
 0x2eb   :  { %v1311_v18 = vpop.f32.mrb[100].mxu1 }
 0x2ec   :  { %v4870_v24 = vpop.f32.mrb[101].mxu1  ;;  %5044 = vmatmul.mubr.msk.f32.gmra.mrb[178].mxu1 %vm736_vm3, %v6510_v13 }
 0x2ed   :  { %5046 = vmatprep.mubr.msk.f32.mxu1 %vm5682_vm2, %v5681_v22 }
 0x2ef   :  { %v1315_v21 = vpop.f32.mrb[102].mxu1 }
 0x2f0   :  { %v4873_v53 = vpop.f32.mrb[103].mxu1  ;;  %5047 = vmatmul.mubr.msk.f32.gmra.mrb[20].mxu1 %vm736_vm3, %v6517_v4  ;;  %v1756_v4 = vld [vmem:[%s7532_s5] sm:$0xff] }
 0x2f1   :  { %5049 = vmatprep.mubr.msk.f32.mxu1 %vm5682_vm2, %v5681_v22 }
 0x2f4   :  { %5050 = vmatmul.mubr.msk.f32.gmra.mrb[180].mxu1 %vm736_vm3, %v6524_v12  ;;  %v1757_v12 = vld [vmem:[%s7532_s5 + $0x8] sm:$0xff] }
 0x2f5   :  { %5052 = vmatprep.mubr.msk.f32.mxu1 %vm5682_vm2, %v5681_v22  ;;  %v5362_v28 = vpack.c.bf16 %v1757_v12, %v1756_v4 }
 0x2f7   :  { %v1324_v27 = vpop.f32.mrb[104].mxu1  ;;  %5363 = vmatpush3.bf16.msra.mxu0 %v5362_v28 }
 0x2f8   :  { %v4879_v5 = vpop.f32.mrb[105].mxu1  ;;  %5053 = vmatmul.mubr.msk.f32.gmra.mrb[182].mxu1 %vm736_vm3, %v6531_v3  ;;  %5364 = vmatprep.subr.bf16.mxu0 %v7587_v20 }
 0x2f9   :  { %5055 = vmatprep.mubr.msk.f32.mxu1 %vm5682_vm2, %v5681_v22 }
 0x2fb   :  { %v1328_v13 = vpop.f32.mrb[106].mxu1 }
 0x2fc   :  { %v4882_v61 = vpop.f32.mrb[107].mxu1  ;;  %5056 = vmatmul.mubr.msk.f32.gmra.mrb[26].mxu1 %vm736_vm3, %v6538_v11 }
 0x2fd   :  { %5058 = vmatprep.mubr.msk.f32.mxu1 %vm5682_vm2, %v5681_v22 }
 0x300   :  { %5059 = vmatmul.mubr.msk.f32.gmra.mrb[184].mxu1 %vm736_vm3, %v6545_v2  ;;  %v1758_v2 = vld [vmem:[%s7532_s5 + $0x10] sm:$0xff] }
 0x301   :  { %5061 = vmatprep.mubr.msk.f32.mxu1 %vm5682_vm2, %v5681_v22  ;;  %v5365_v0 = vpack.c.bf16 %v1759_v62, %v1758_v2 }
 0x303   :  { %v1337_v3 = vpop.f32.mrb[108].mxu1  ;;  %5366 = vmatpush3.bf16.msra.mxu0 %v5365_v0 }
 0x304   :  { %v4888_v11 = vpop.f32.mrb[109].mxu1  ;;  %5062 = vmatmul.mubr.msk.f32.gmra.mrb[186].mxu1 %vm736_vm3, %v6552_v10  ;;  %5367 = vmatprep.subr.bf16.mxu0 %v7587_v20  ;;  %v1760_v10 = vld [vmem:[%s7532_s5 + $0x20] sm:$0xff] }
 0x305   :  { %v5368_v30 = vpack.c.bf16 %v1761_v63, %v1760_v10 }
 0x307   :  { %v1341_v23 = vpop.f32.mrb[110].mxu1  ;;  %5369 = vmatpush3.bf16.msra.mxu0 %v5368_v30 }
 0x308   :  { %v4891_v19 = vpop.f32.mrb[111].mxu1  ;;  %5370 = vmatprep.subr.bf16.mxu0 %v7587_v20 }
 0x30b   :  { %v1345_v26 = vpop.f32.mrb[112].mxu1  ;;  %5372 = vmatpush3.bf16.msra.mxu0 %v5371_v15 }
 0x30c   :  { %v4894_v17 = vpop.f32.mrb[113].mxu1  ;;  %5373 = vmatprep.subr.bf16.mxu0 %v7587_v20 }
 0x30f   :  { %v1349_v54 = vpop.f32.mrb[114].mxu1 }
 0x310   :  { %v4897_v14 = vpop.f32.mrb[115].mxu1 }
 0x313   :  { %v1430_v6 = vpop.f32.mrb[116].mxu1 }
 0x314   :  { %v4908_v9 = vpop.f32.mrb[117].mxu1 }
 0x317   :  { %v1434_v16 = vpop.f32.mrb[118].mxu1 }
 0x318   :  { %v4911_v25 = vpop.f32.mrb[119].mxu1 }
 0x31b   :  { %v1438_v7 = vpop.f32.mrb[120].mxu1 }
 0x31c   :  { %v4914_v55 = vpop.f32.mrb[121].mxu1 }
 0x323   :  { %v1447_v18 = vpop.f32.mrb[122].mxu1 }
 0x324   :  { %v4920_v24 = vpop.f32.mrb[123].mxu1 }
 0x327   :  { %v1451_v21 = vpop.f32.mrb[124].mxu1 }
 0x328   :  { %v4923_v53 = vpop.f32.mrb[125].mxu1  ;;  %v7032_v21 = vld [vmem:[%s7531_s4] ss:$0 sm:$0xff] }
 0x32f   :  { %v1460_v27 = vpop.f32.mrb[126].mxu1 }
 0x330   :  { %v4929_v5 = vpop.f32.mrb[127].mxu1 }
 0x331   :  { %v984_v5 = vadd.f32 %v7032_v21, %v6698_v8 }
 0x333   :  { %v1464_v13 = vpop.f32.mrb[128].mxu1 }
 0x334   :  { %v4932_v61 = vpop.f32.mrb[129].mxu1 }
 0x33b   :  { %v1473_v4 = vpop.f32.mrb[130].mxu1 }
 0x33c   :  { %v4938_v12 = vpop.f32.mrb[131].mxu1 }
 0x33f   :  { %v1477_v3 = vpop.f32.mrb[132].mxu1 }
 0x340   :  { %v4941_v28 = vpop.f32.mrb[133].mxu1 }
 0x347   :  { %v1486_v11 = vpop.f32.mrb[134].mxu1 }
 0x348   :  { %v4947_v2 = vpop.f32.mrb[135].mxu1  ;;  %v4122_v11 = vld [vmem:[%s7532_s5 + $0x40] sm:$0xff] }
 0x349   :  { %v4123_v2 = vld [vmem:[%s7532_s5 + $0x48] sm:$0xff] }
 0x34a   :  { %v5374_v8 = vpack.c.bf16 %v4123_v2, %v4122_v11 }
 0x34b   :  { %v1490_v62 = vpop.f32.mrb[136].mxu1 }
 0x34c   :  { %v4950_v23 = vpop.f32.mrb[137].mxu1 }
 0x353   :  { %v1499_v0 = vpop.f32.mrb[138].mxu1 }
 0x354   :  { %v4956_v19 = vpop.f32.mrb[139].mxu1  ;;  %v985_v0 = vadd.f32 %v7032_v21, %v6712_v1 }
 0x355   :  { %v4124_v19 = vld [vmem:[%s7532_s5 + $0x50] sm:$0xff] }
 0x357   :  { %v1503_v10 = vpop.f32.mrb[140].mxu1 }
 0x358   :  { %v4959_v63 = vpop.f32.mrb[141].mxu1  ;;  %v4125_v10 = vld [vmem:[%s7532_s5 + $0x58] sm:$0xff] }
 0x359   :  { %v5377_v1 = vpack.c.bf16 %v4125_v10, %v4124_v19 }
 0x35f   :  { %v1512_v26 = vpop.f32.mrb[142].mxu1 }
 0x360   :  { %v4965_v30 = vpop.f32.mrb[143].mxu1 }
 0x363   :  { %v1516_v17 = vpop.f32.mrb[144].mxu1 }
 0x364   :  { %v4968_v31 = vpop.f32.mrb[145].mxu1 }
 0x36b   :  { %v1525_v29 = vpop.f32.mrb[146].mxu1 }
 0x36c   :  { %v4974_v54 = vpop.f32.mrb[147].mxu1  ;;  %v4126_v29 = vld [vmem:[%s7532_s5 + $0x60] sm:$0xff] }
 0x36d   :  { %v4127_v54 = vld [vmem:[%s7532_s5 + $0x68] sm:$0xff] }
 0x36f   :  { %v1529_v15 = vpop.f32.mrb[148].mxu1 }
 0x370   :  { %v4977_v14 = vpop.f32.mrb[149].mxu1 }
 0x373   :  { %v1533_v6 = vpop.f32.mrb[150].mxu1 }
 0x374   :  { %v4980_v9 = vpop.f32.mrb[151].mxu1  ;;  %v5380_v6 = vpack.c.bf16 %v4127_v54, %v4126_v29 }
 0x375   :  { %v4128_v9 = vld [vmem:[%s7532_s5 + $0x70] sm:$0xff] }
 0x377   :  { %v1614_v16 = vpop.f32.mrb[152].mxu1 }
 0x378   :  { %v4991_v25 = vpop.f32.mrb[153].mxu1  ;;  %v4129_v16 = vld [vmem:[%s7532_s5 + $0x78] sm:$0xff] }
 0x37b   :  { %v1618_v7 = vpop.f32.mrb[154].mxu1 }
 0x37c   :  { %v4994_v55 = vpop.f32.mrb[155].mxu1 }
 0x37d   :  { %v5383_v55 = vpack.c.bf16 %v4129_v16, %v4128_v9 }
 0x37f   :  { %v1622_v18 = vpop.f32.mrb[156].mxu1 }
 0x380   :  { %v4997_v24 = vpop.f32.mrb[157].mxu1 }
 0x383   :  { %v1626_v53 = vpop.f32.mrb[158].mxu1 }
 0x384   :  { %v5000_v27 = vpop.f32.mrb[159].mxu1 }
 0x387   :  { %v1630_v13 = vpop.f32.mrb[42].mxu1 }
 0x388   :  { %v5474_v61 = vadd.f32 %v1630_v13, %v984_v5  ;;  %v5003_v4 = vpop.f32.mrb[43].mxu1 }
 0x38a   :  { %v1727_v12 = vmax.f32 %v5474_v61, 0.0 }
 0x38b   :  { %v1635_v3 = vpop.f32.mrb[160].mxu1 }
 0x38c   :  { %1729 = vst.msk [vmem:[#allocation5] sm:$0xff] %vm1728_vm4, %v1727_v12  ;;  %v5006_v28 = vpop.f32.mrb[161].mxu1 }
 0x38f   :  { %v1639_v62 = vpop.f32.mrb[162].mxu1 }
 0x390   :  { %v5009_v23 = vpop.f32.mrb[163].mxu1 }
 0x393   :  { %v1643_v63 = vpop.f32.mrb[48].mxu1  ;;  %v7051_v26 = vld [vmem:[#allocation5] sm:$0xff] }
 0x394   :  { %v5476_v30 = vadd.f32 %v1643_v63, %v985_v0  ;;  %v5012_v17 = vpop.f32.mrb[49].mxu1  ;;  %5081 = vmatmul.mubr.msk.f32.vlgmr.msra.gmra.mrb[60].mxu0 %vm1728_vm4, %v7051_v26 }
 0x395   :  { %5083 = vmatprep.mubr.msk.f32.mxu0 %vm5682_vm2, %v5681_v22  ;;  %5375 = vmatpush3.bf16.msra.mxu0 %v5374_v8 }
 0x396   :  { %v1730_v31 = vmax.f32 %v5476_v30, 0.0  ;;  %5376 = vmatprep.subr.bf16.mxu0 %v7587_v20 }
 0x397   :  { %v1648_v15 = vpop.f32.mrb[164].mxu1 }
 0x398   :  { %1731 = vst.msk [vmem:[#allocation5 + $0x8] sm:$0xff] %vm1728_vm4, %v1730_v31  ;;  %v5015_v14 = vpop.f32.mrb[165].mxu1 }
 0x399   :  { %5378 = vmatpush3.bf16.msra.mxu0 %v5377_v1 }
 0x39a   :  { %5379 = vmatprep.subr.bf16.mxu0 %v7587_v20 }
 0x39b   :  { %v1652_v25 = vpop.f32.mrb[166].mxu1 }
 0x39c   :  { %v5018_v7 = vpop.f32.mrb[167].mxu1 }
 0x39d   :  { %5381 = vmatpush3.bf16.msra.mxu0 %v5380_v6 }
 0x39e   :  { %5382 = vmatprep.subr.bf16.mxu0 %v7587_v20 }
 0x39f   :  { %v1656_v18 = vpop.f32.mrb[2].mxu1  ;;  %v7073_v24 = vld [vmem:[#allocation5 + $0x8] sm:$0xff] }
 0x3a0   :  { %v5477_v53 = vadd.f32 %v7032_v21, %v1656_v18  ;;  %v5021_v27 = vpop.f32.mrb[3].mxu1  ;;  %5084 = vmatmul.mubr.msk.f32.gmra.mrb[62].mxu0 %vm1728_vm4, %v7073_v24 }
 0x3a1   :  { %5086 = vmatprep.mubr.msk.f32.mxu0 %vm5682_vm2, %v5681_v22  ;;  %5384 = vmatpush3.bf16.msra.mxu0 %v5383_v55 }
 0x3a2   :  { %v1732_v5 = vmax.f32 %v5477_v53, 0.0  ;;  %5385 = vmatprep.subr.bf16.mxu0 %v7587_v20 }
 0x3a3   :  { %v1661_v13 = vpop.f32.mrb[168].mxu1 }
 0x3a4   :  { %1733 = vst.msk [vmem:[#allocation5 + $0x10] sm:$0xff] %vm1728_vm4, %v1732_v5  ;;  %v5024_v61 = vpop.f32.mrb[169].mxu1 }
 0x3a7   :  { %v1665_v4 = vpop.f32.mrb[170].mxu1 }
 0x3a8   :  { %v5027_v12 = vpop.f32.mrb[171].mxu1 }
 0x3ab   :  { %v1669_v3 = vpop.f32.mrb[8].mxu1  ;;  %v7082_v28 = vld [vmem:[#allocation5 + $0x10] sm:$0xff] }
 0x3ac   :  { %v5478_v11 = vadd.f32 %v7032_v21, %v1669_v3  ;;  %v5030_v2 = vpop.f32.mrb[9].mxu1  ;;  %5087 = vmatmul.mubr.msk.f32.gmra.mrb[64].mxu0 %vm1728_vm4, %v7082_v28 }
 0x3ad   :  { %5089 = vmatprep.mubr.msk.f32.mxu0 %vm5682_vm2, %v5681_v22 }
 0x3ae   :  { %v1734_v62 = vmax.f32 %v5478_v11, 0.0 }
 0x3af   :  { %v1674_v23 = vpop.f32.mrb[172].mxu1 }
 0x3b0   :  { %1735 = vst.msk [vmem:[#allocation5 + $0x18] sm:$0xff] %vm1728_vm4, %v1734_v62  ;;  %v5033_v8 = vpop.f32.mrb[173].mxu1  ;;  %v4137_v62 = vld [vmem:[%s7532_s5 + $0x80] sm:$0xff] }
 0x3b3   :  { %v1678_v0 = vpop.f32.mrb[174].mxu1 }
 0x3b4   :  { %v5036_v19 = vpop.f32.mrb[175].mxu1  ;;  %v4139_v0 = vld [vmem:[%s7532_s5 + $0x90] sm:$0xff] }
 0x3b5   :  { %v4140_v19 = vld [vmem:[%s7532_s5 + $0x98] sm:$0xff] }
 0x3b7   :  { %v1682_v10 = vpop.f32.mrb[14].mxu1  ;;  %v7090_v63 = vld [vmem:[#allocation5 + $0x18] sm:$0xff] }
 0x3b8   :  { %v5479_v30 = vadd.f32 %v7032_v21, %v1682_v10  ;;  %v5039_v17 = vpop.f32.mrb[15].mxu1  ;;  %5090 = vmatmul.mubr.msk.f32.gmra.mrb[66].mxu0 %vm1728_vm4, %v7090_v63  ;;  %v5389_v10 = vpack.c.bf16 %v4140_v19, %v4139_v0  ;;  %v2243_v0 = vld [vmem:[%s7535_s8] sm:$0xff]  ;;  %v2244_v19 = vld [vmem:[%s7535_s8 + $0x8] sm:$0xff] }
 0x3b9   :  { %5092 = vmatprep.mubr.msk.f32.mxu0 %vm5682_vm2, %v5681_v22  ;;  %v4142_v17 = vld [vmem:[%s7532_s5 + $0xa8] sm:$0xff] }
 0x3ba   :  { %v1736_v1 = vmax.f32 %v5479_v30, 0.0  ;;  %v4141_v30 = vld [vmem:[%s7532_s5 + $0xa0] sm:$0xff] }
 0x3bb   :  { %v1687_v31 = vpop.f32.mrb[176].mxu1 }
 0x3bc   :  { %1737 = vst.msk [vmem:[#allocation5 + $0x20] sm:$0xff] %vm1728_vm4, %v1736_v1  ;;  %v5042_v29 = vpop.f32.mrb[177].mxu1  ;;  %v5392_v1 = vpack.c.bf16 %v4142_v17, %v4141_v30  ;;  %v4143_v31 = vld [vmem:[%s7532_s5 + $0xb0] sm:$0xff] }
 0x3bd   :  { %v4144_v29 = vld [vmem:[%s7532_s5 + $0xb8] sm:$0xff] }
 0x3bf   :  { %v1691_v54 = vpop.f32.mrb[178].mxu1 }
 0x3c0   :  { %v5045_v15 = vpop.f32.mrb[179].mxu1  ;;  %v5395_v54 = vpack.c.bf16 %v4144_v29, %v4143_v31  ;;  %v2245_v29 = vld [vmem:[%s7535_s8 + $0x10] sm:$0xff] }
 0x3c1   :  { %v2130_v15 = vld [vmem:[%s7534_s7 + $0x18] sm:$0xff] }
 0x3c3   :  { %v1695_v14 = vpop.f32.mrb[20].mxu1  ;;  %v7098_v6 = vld [vmem:[#allocation5 + $0x20] sm:$0xff] }
 0x3c4   :  { %v5480_v9 = vadd.f32 %v7032_v21, %v1695_v14  ;;  %v5048_v16 = vpop.f32.mrb[21].mxu1  ;;  %5093 = vmatmul.mubr.msk.f32.gmra.mrb[68].mxu0 %vm1728_vm4, %v7098_v6 }
 0x3c5   :  { %5095 = vmatprep.mubr.msk.f32.mxu0 %vm5682_vm2, %v5681_v22 }
 0x3c6   :  { %v1738_v25 = vmax.f32 %v5480_v9, 0.0 }
 0x3c7   :  { %v1700_v7 = vpop.f32.mrb[180].mxu1 }
 0x3c8   :  { %1739 = vst.msk [vmem:[#allocation5 + $0x28] sm:$0xff] %vm1728_vm4, %v1738_v25  ;;  %v5051_v55 = vpop.f32.mrb[181].mxu1 }
 0x3cb   :  { %v1704_v18 = vpop.f32.mrb[182].mxu1 }
 0x3cc   :  { %v5054_v53 = vpop.f32.mrb[183].mxu1 }
 0x3cf   :  { %v1708_v27 = vpop.f32.mrb[26].mxu1  ;;  %v1747_v5 = vld [vmem:[#allocation5 + $0x28] sm:$0xff] }
 0x3d0   :  { %v5481_v13 = vadd.f32 %v7032_v21, %v1708_v27  ;;  %v5057_v61 = vpop.f32.mrb[27].mxu1  ;;  %5096 = vmatmul.mubr.msk.f32.gmra.mrb[70].mxu0 %vm1728_vm4, %v1747_v5  ;;  %v4138_v21 = vld [vmem:[%s7532_s5 + $0x88] sm:$0xff] }
 0x3d1   :  { %5098 = vmatprep.mubr.msk.f32.mxu0 %vm5682_vm2, %v5681_v22  ;;  %v5386_v8 = vpack.c.bf16 %v4138_v21, %v4137_v62 }
 0x3d2   :  { %v1740_v4 = vmax.f32 %v5481_v13, 0.0 }
 0x3d3   :  { %v1713_v12 = vpop.f32.mrb[184].mxu1 }
 0x3d4   :  { %1741 = vst.msk [vmem:[#allocation5 + $0x30] sm:$0xff] %vm1728_vm4, %v1740_v4  ;;  %v5060_v3 = vpop.f32.mrb[185].mxu1  ;;  %v4114_v4 = vld [vmem:[%s7533_s6] ss:$0 sm:$0xff] }
 0x3d7   :  { %v1717_v11 = vpop.f32.mrb[186].mxu1 }
 0x3d8   :  { %v5063_v2 = vpop.f32.mrb[187].mxu1 }
 0x3db   :  { %v1748_v23 = vld [vmem:[#allocation5 + $0x30] sm:$0xff] }
 0x3dc   :  { %5099 = vmatmul.mubr.msk.f32.gmra.mrb[72].mxu0 %vm1728_vm4, %v1748_v23 }
 0x3dd   :  { %5117 = vmatprep.mubr.msk.f32.mxu0 %vm5682_vm2, %v5681_v22 }
 0x3e0   :  { %5118 = vmatmul.mubr.msk.f32.vlgmr.msra.gmra.mrb[74].mxu0 %vm1728_vm4, %v7051_v26 }
 0x3e1   :  { %5387 = vmatpush3.bf16.msra.mxu0 %v5386_v8  ;;  %5120 = vmatprep.mubr.msk.f32.mxu0 %vm5682_vm2, %v5681_v22 }
 0x3e2   :  { %5388 = vmatprep.subr.bf16.mxu0 %v7587_v20 }
 0x3e4   :  { %5121 = vmatmul.mubr.msk.f32.gmra.mrb[60].mxu0 %vm1728_vm4, %v7073_v24 }
 0x3e5   :  { %5123 = vmatprep.mubr.msk.f32.mxu0 %vm5682_vm2, %v5681_v22  ;;  %5390 = vmatpush3.bf16.msra.mxu0 %v5389_v10 }
 0x3e6   :  { %5391 = vmatprep.subr.bf16.mxu0 %v7587_v20 }
 0x3e8   :  { %5124 = vmatmul.mubr.msk.f32.gmra.mrb[62].mxu0 %vm1728_vm4, %v7082_v28 }
 0x3e9   :  { %5126 = vmatprep.mubr.msk.f32.mxu0 %vm5682_vm2, %v5681_v22  ;;  %5393 = vmatpush3.bf16.msra.mxu0 %v5392_v1  ;;  %v7219_v1 = vpack.c.bf16 %v2244_v19, %v2243_v0 }
 0x3ea   :  { %5394 = vmatprep.subr.bf16.mxu0 %v7587_v20 }
 0x3ec   :  { %5127 = vmatmul.mubr.msk.f32.gmra.mrb[64].mxu0 %vm1728_vm4, %v7090_v63 }
 0x3ed   :  { %5129 = vmatprep.mubr.msk.f32.mxu0 %vm5682_vm2, %v5681_v22  ;;  %5396 = vmatpush3.bf16.msra.mxu0 %v5395_v54  ;;  %v2246_v54 = vld [vmem:[%s7535_s8 + $0x18] sm:$0xff] }
 0x3ee   :  { %5397 = vmatprep.subr.bf16.mxu0 %v7587_v20 }
 0x3f0   :  { %5130 = vmatmul.mubr.msk.f32.gmra.mrb[66].mxu0 %vm1728_vm4, %v7098_v6 }
 0x3f1   :  { %5132 = vmatprep.mubr.msk.f32.mxu0 %vm5682_vm2, %v5681_v22 }
 0x3f4   :  { %5133 = vmatmul.mubr.msk.f32.gmra.mrb[68].mxu0 %vm1728_vm4, %v1747_v5 }
 0x3f5   :  { %5135 = vmatprep.mubr.msk.f32.mxu0 %vm5682_vm2, %v5681_v22 }
 0x3f8   :  { %5136 = vmatmul.mubr.msk.f32.gmra.mrb[76].mxu0 %vm1728_vm4, %v1748_v23 }
 0x3f9   :  { %5154 = vmatprep.mubr.msk.f32.mxu0 %vm5682_vm2, %v5681_v22 }
 0x3fc   :  { %5155 = vmatmul.mubr.msk.f32.vlgmr.msra.gmra.mrb[78].mxu0 %vm1728_vm4, %v7051_v26  ;;  %v2127_v26 = vld [vmem:[%s7534_s7] sm:$0xff] }
 0x3fd   :  { %5157 = vmatprep.mubr.msk.f32.mxu0 %vm5682_vm2, %v5681_v22 }
 0x400   :  { %5158 = vmatmul.mubr.msk.f32.gmra.mrb[80].mxu0 %vm1728_vm4, %v7073_v24  ;;  %v2128_v24 = vld [vmem:[%s7534_s7 + $0x8] sm:$0xff] }
 0x401   :  { %5160 = vmatprep.mubr.msk.f32.mxu0 %vm5682_vm2, %v5681_v22 }
 0x404   :  { %5161 = vmatmul.mubr.msk.f32.gmra.mrb[60].mxu0 %vm1728_vm4, %v7082_v28  ;;  %v5398_v28 = vpack.c.bf16 %v2128_v24, %v2127_v26 }
 0x405   :  { %5163 = vmatprep.mubr.msk.f32.mxu0 %vm5682_vm2, %v5681_v22 }
 0x406   :  { %5399 = vmatpush3.bf16.msra.mxu0 %v5398_v28 }
 0x407   :  { %5400 = vmatprep.subr.bf16.mxu0 %v7587_v20 }
 0x408   :  { %5164 = vmatmul.mubr.msk.f32.gmra.mrb[62].mxu0 %vm1728_vm4, %v7090_v63  ;;  %v2129_v63 = vld [vmem:[%s7534_s7 + $0x10] sm:$0xff] }
 0x409   :  { %5166 = vmatprep.mubr.msk.f32.mxu0 %vm5682_vm2, %v5681_v22  ;;  %v5401_v14 = vpack.c.bf16 %v2130_v15, %v2129_v63  ;;  %v7232_v15 = vpack.c.bf16 %v2246_v54, %v2245_v29 }
 0x40b   :  { %5402 = vmatpush3.bf16.msra.mxu0 %v5401_v14 }
 0x40c   :  { %5167 = vmatmul.mubr.msk.f32.gmra.mrb[64].mxu0 %vm1728_vm4, %v7098_v6  ;;  %5403 = vmatprep.subr.bf16.mxu0 %v7587_v20 }
 0x40d   :  { %5169 = vmatprep.mubr.msk.f32.mxu0 %vm5682_vm2, %v5681_v22 }
 0x410   :  { %5170 = vmatmul.mubr.msk.f32.gmra.mrb[66].mxu0 %vm1728_vm4, %v1747_v5 }
 0x411   :  { %5172 = vmatprep.mubr.msk.f32.mxu0 %vm5682_vm2, %v5681_v22 }
 0x414   :  { %5173 = vmatmul.mubr.msk.f32.gmra.mrb[68].mxu0 %vm1728_vm4, %v1748_v23 }
 0x415   :  { %5183 = vmatprep.mubr.msk.f32.mxu0 %vm5682_vm2, %v5681_v22 }
 0x4a3   :  { %v1876_v6 = vpop.f32.mrb[70].mxu0 }
 0x4a4   :  { %v5097_v9 = vpop.f32.mrb[71].mxu0 }
 0x4af   :  { %v1880_v16 = vpop.f32.mrb[72].mxu0 }
 0x4b0   :  { %v5100_v25 = vpop.f32.mrb[73].mxu0 }
 0x4b3   :  { %v1963_v7 = vpop.f32.mrb[74].mxu0 }
 0x4b4   :  { %v5119_v55 = vpop.f32.mrb[75].mxu0 }
 0x4cb   :  { %v1992_v18 = vpop.f32.mrb[76].mxu0 }
 0x4cc   :  { %v5137_v53 = vpop.f32.mrb[77].mxu0 }
 0x4cf   :  { %v2075_v27 = vpop.f32.mrb[78].mxu0 }
 0x4d0   :  { %v5156_v5 = vpop.f32.mrb[79].mxu0  ;;  %v7261_v27 = vld [vmem:[%s7536_s9] ss:$0 sm:$0xff] }
 0x4d3   :  { %v2079_v13 = vpop.f32.mrb[80].mxu0 }
 0x4d4   :  { %v5159_v61 = vpop.f32.mrb[81].mxu0 }
 0x4d7   :  { %v2083_v12 = vpop.f32.mrb[60].mxu0 }
 0x4d8   :  { %v5482_v3 = vadd.f32 %v4114_v4, %v2083_v12  ;;  %v5162_v11 = vpop.f32.mrb[61].mxu0 }
 0x4da   :  { %v2112_v2 = vmax.f32 %v5482_v3, 0.0 }
 0x4db   :  { %v2088_v62 = vpop.f32.mrb[62].mxu0 }
 0x4dc   :  { %2113 = vst.msk [vmem:[#allocation6] sm:$0xff] %vm736_vm3, %v2112_v2  ;;  %v5483_v21 = vadd.f32 %v4114_v4, %v2088_v62  ;;  %v5165_v23 = vpop.f32.mrb[63].mxu0 }
 0x4de   :  { %v2114_v8 = vmax.f32 %v5483_v21, 0.0 }
 0x4df   :  { %v2093_v10 = vpop.f32.mrb[64].mxu0 }
 0x4e0   :  { %2115 = vst.msk [vmem:[#allocation6 + $0x8] sm:$0xff] %vm736_vm3, %v2114_v8  ;;  %v5484_v30 = vadd.f32 %v4114_v4, %v2093_v10  ;;  %v5168_v17 = vpop.f32.mrb[65].mxu0 }
 0x4e2   :  { %v2116_v31 = vmax.f32 %v5484_v30, 0.0 }
 0x4e3   :  { %v2098_v26 = vpop.f32.mrb[66].mxu0  ;;  %v2122_v24 = vld [vmem:[#allocation6] sm:$0xff] }
 0x4e4   :  { %2117 = vst.msk [vmem:[#allocation6 + $0x10] sm:$0xff] %vm736_vm3, %v2116_v31  ;;  %v5485_v28 = vadd.f32 %v4114_v4, %v2098_v26  ;;  %v5171_v63 = vpop.f32.mrb[67].mxu0  ;;  %5184 = vmatmul.mubr.msk.f32.vlgmr.msra.gmra.mrb[82].mxu0 %vm736_vm3, %v2122_v24 }
 0x4e5   :  { %5405 = vmatpush3.bf16.msra.mxu0 %v7219_v1  ;;  %5186 = vmatprep.mubr.msk.f32.mxu0 %vm5682_vm2, %v5681_v22 }
 0x4e6   :  { %v2118_v14 = vmax.f32 %v5485_v28, 0.0  ;;  %5406 = vmatprep.subr.bf16.mxu0 %v7587_v20 }
 0x4e7   :  { %v2103_v6 = vpop.f32.mrb[68].mxu0  ;;  %v2123_v9 = vld [vmem:[#allocation6 + $0x8] sm:$0xff] }
 0x4e8   :  { %2119 = vst.msk [vmem:[#allocation6 + $0x18] sm:$0xff] %vm736_vm3, %v2118_v14  ;;  %v5486_v16 = vadd.f32 %v4114_v4, %v2103_v6  ;;  %v5174_v25 = vpop.f32.mrb[69].mxu0  ;;  %5187 = vmatmul.mubr.msk.f32.gmra.mrb[84].mxu0 %vm736_vm3, %v2123_v9 }
 0x4e9   :  { %5189 = vmatprep.mubr.msk.f32.mxu0 %vm5682_vm2, %v5681_v22  ;;  %5408 = vmatpush3.bf16.msra.mxu0 %v7232_v15 }
 0x4ea   :  { %v2120_v7 = vmax.f32 %v5486_v16, 0.0  ;;  %5409 = vmatprep.subr.bf16.mxu0 %v7587_v20 }
 0x4eb   :  { %v2124_v55 = vld [vmem:[#allocation6 + $0x10] sm:$0xff] }
 0x4ec   :  { %2121 = vst.msk [vmem:[#allocation6 + $0x20] sm:$0xff] %vm736_vm3, %v2120_v7  ;;  %5190 = vmatmul.mubr.msk.f32.gmra.mrb[86].mxu0 %vm736_vm3, %v2124_v55 }
 0x4ed   :  { %5192 = vmatprep.mubr.msk.f32.mxu0 %vm5682_vm2, %v5681_v22 }
 0x4ef   :  { %v2125_v18 = vld [vmem:[#allocation6 + $0x18] sm:$0xff] }
 0x4f0   :  { %5193 = vmatmul.mubr.msk.f32.gmra.mrb[88].mxu0 %vm736_vm3, %v2125_v18 }
 0x4f1   :  { %5195 = vmatprep.mubr.msk.f32.mxu0 %vm5682_vm2, %v5681_v22 }
 0x4f3   :  { %v2126_v53 = vld [vmem:[#allocation6 + $0x20] sm:$0xff] }
 0x4f4   :  { %5196 = vmatmul.mubr.msk.f32.gmra.mrb[90].mxu0 %vm736_vm3, %v2126_v53 }
 0x4f5   :  { %5206 = vmatprep.mubr.msk.f32.mxu0 %vm5682_vm2, %v5681_v22 }
 0x4f8   :  { %5207 = vmatmul.mubr.f32.vlgmr.msra.gmra.mrb[82].mxu0 %v5681_v22 }
 0x4f9   :  { %5411 = vmatpush3.bf16.msra.mxu0 %v7219_v1  ;;  %5217 = vmatprep.mubr.msk.f32.mxu0 %vm5682_vm2, %v5681_v22 }
 0x4fa   :  { %5412 = vmatprep.subr.bf16.mxu0 %v7587_v20 }
 0x4fd   :  { %5414 = vmatpush3.bf16.msra.mxu0 %v7232_v15 }
 0x4fe   :  { %5415 = vmatprep.subr.bf16.mxu0 %v7587_v20 }
 0x5cb   :  { %v2316_v5 = vpop.f32.mrb[82].mxu0 }
 0x5cc   :  { %v5487_v13 = vadd.f32 %v7261_v27, %v2316_v5  ;;  %v5208_v61 = vpop.f32.mrb[83].mxu0 }
 0x5ce   :  { %5595 = vtanh.f32 %v5487_v13  ;;  %v4158_v12 = vmul.f32 -1.442695, %v5487_v13 }
 0x5d0   :  { %5597 = vpow2.f32 %v4158_v12 }
 0x5d8   :  { %v5596_v4 = vpop.eup %5595 }
 0x5d9   :  { %2330 = vrot.lane.b32.xlu0 %v5596_v4, %s5684_s30 }
 0x5da   :  { %v5598_v3 = vpop.eup %5597 }
 0x5db   :  { %v2324_v11 = vadd.f32 1.0, %v5598_v3 }
 0x5dd   :  { %5599 = vrcp.f32 %v2324_v11 }
 0x5e7   :  { %v5600_v2 = vpop.eup %5599 }
 0x5e8   :  { %v2328_v23 = vmul.f32 0.0, %v5600_v2 }
 0x64b   :  { %v2331_v62 = vpop.permute.xlu0 %2330 }
 0x64c   :  { %v2333_v21 = vmul.f32 %v5600_v2, %v2331_v62 }
 0x64e   :  { %2335 = vrot.lane.b32.xlu0 %v2333_v21, %s5685_s15 }
 0x6c0   :  { %v2336_v8 = vpop.permute.xlu0 %2335 }
 0x6c1   :  { %v2338_v0 = vadd.f32 %v2336_v8, %v2328_v23 }
 0x6c3   :  { %5601 = vtanh.f32 %v2338_v0 }
 0x6cd   :  { %v5602_v19 = vpop.eup %5601 }
 0x6ce   :  { %2341 = vrot.lane.b32.xlu1 %v5602_v19, %s5684_s30 }
 0x740   :  { %v2342_v10 = vpop.permute.xlu1 %2341 }
 0x741   :  { %v2344_v30 = vmul.f32 %v5600_v2, %v2342_v10 }
 0x743   :  { %2346 = vrot.lane.b32.xlu1 %v2344_v30, %s5685_s15 }
 0x7b5   :  { %v2347_v17 = vpop.permute.xlu1 %2346 }
 0x7b6   :  { %2349 = vst.msk [vmem:[#allocation6] sm:$0xff] %vm736_vm3, %v2347_v17  ;;  %5218 = vmatmul.mubr.msk.f32.vlgmr.msra.gmra.mrb[84].mxu0 %vm736_vm3, %v2347_v17 }
 0x7b7   :  { %5417 = vmatpush3.bf16.msra.mxu0 %v7219_v1  ;;  %5228 = vmatprep.mubr.msk.f32.mxu0 %vm5682_vm2, %v5681_v22 }
 0x7b8   :  { %5418 = vmatprep.subr.bf16.mxu0 %v7587_v20 }
 0x7bb   :  { %5420 = vmatpush3.bf16.msra.mxu0 %v7232_v15 }
 0x7bc   :  { %5421 = vmatprep.subr.bf16.mxu0 %v7587_v20 }
 0x889   :  { %v2422_v31 = vpop.f32.mrb[84].mxu0 }
 0x88a   :  { %v5488_v29 = vadd.f32 %v7261_v27, %v2422_v31  ;;  %v5219_v54 = vpop.f32.mrb[85].mxu0 }
 0x88c   :  { %5603 = vtanh.f32 %v5488_v29  ;;  %v4160_v24 = vmul.f32 -1.442695, %v5488_v29 }
 0x88e   :  { %5605 = vpow2.f32 %v4160_v24 }
 0x896   :  { %v5604_v26 = vpop.eup %5603 }
 0x897   :  { %2436 = vrot.lane.b32.xlu0 %v5604_v26, %s5684_s30 }
 0x898   :  { %v5606_v28 = vpop.eup %5605 }
 0x899   :  { %v2430_v63 = vadd.f32 1.0, %v5606_v28 }
 0x89b   :  { %5607 = vrcp.f32 %v2430_v63 }
 0x8a5   :  { %v5608_v14 = vpop.eup %5607 }
 0x8a6   :  { %v2434_v16 = vmul.f32 %v5608_v14, %v2338_v0 }
 0x909   :  { %v2437_v6 = vpop.permute.xlu0 %2436 }
 0x90a   :  { %v2439_v9 = vmul.f32 %v5608_v14, %v2437_v6 }
 0x90c   :  { %2441 = vrot.lane.b32.xlu1 %v2439_v9, %s5685_s15 }
 0x97e   :  { %v2442_v25 = vpop.permute.xlu1 %2441 }
 0x97f   :  { %v2444_v7 = vadd.f32 %v2442_v25, %v2434_v16 }
 0x981   :  { %5609 = vtanh.f32 %v2444_v7 }
 0x98b   :  { %v5610_v55 = vpop.eup %5609 }
 0x98c   :  { %2447 = vrot.lane.b32.xlu0 %v5610_v55, %s5684_s30 }
 0x9fe   :  { %v2448_v18 = vpop.permute.xlu0 %2447 }
 0x9ff   :  { %v2450_v53 = vmul.f32 %v5608_v14, %v2448_v18 }
 0xa01   :  { %2452 = vrot.lane.b32.xlu1 %v2450_v53, %s5685_s15  ;;  %v4167_v53 = vld [vmem:[%s7534_s7 + $0x20] sm:$0xff] }
 0xa73   :  { %v2453_v5 = vpop.permute.xlu1 %2452 }
 0xa74   :  { %2455 = vst.msk [vmem:[#allocation6 + $0x8] sm:$0xff] %vm736_vm3, %v2453_v5  ;;  %5229 = vmatmul.mubr.msk.f32.vlgmr.msra.gmra.mrb[86].mxu0 %vm736_vm3, %v2453_v5  ;;  %v4168_v5 = vld [vmem:[%s7534_s7 + $0x28] sm:$0xff] }
 0xa75   :  { %5423 = vmatpush3.bf16.msra.mxu0 %v7219_v1  ;;  %5239 = vmatprep.mubr.msk.f32.mxu0 %vm5682_vm2, %v5681_v22 }
 0xa76   :  { %5424 = vmatprep.subr.bf16.mxu0 %v7587_v20 }
 0xa79   :  { %5426 = vmatpush3.bf16.msra.mxu0 %v7232_v15 }
 0xa7a   :  { %5427 = vmatprep.subr.bf16.mxu0 %v7587_v20 }
 0xb47   :  { %v2528_v13 = vpop.f32.mrb[86].mxu0 }
 0xb48   :  { %v5489_v61 = vadd.f32 %v7261_v27, %v2528_v13  ;;  %v5230_v4 = vpop.f32.mrb[87].mxu0  ;;  %v5434_v13 = vpack.c.bf16 %v4168_v5, %v4167_v53 }
 0xb49   :  { %v4170_v4 = vld [vmem:[%s7534_s7 + $0x38] sm:$0xff] }
 0xb4a   :  { %5611 = vtanh.f32 %v5489_v61  ;;  %v4162_v3 = vmul.f32 -1.442695, %v5489_v61  ;;  %v4169_v61 = vld [vmem:[%s7534_s7 + $0x30] sm:$0xff] }
 0xb4c   :  { %5613 = vpow2.f32 %v4162_v3  ;;  %v5437_v3 = vpack.c.bf16 %v4170_v4, %v4169_v61 }
 0xb54   :  { %v5612_v12 = vpop.eup %5611 }
 0xb55   :  { %2542 = vrot.lane.b32.xlu0 %v5612_v12, %s5684_s30 }
 0xb56   :  { %v5614_v11 = vpop.eup %5613 }
 0xb57   :  { %v2536_v2 = vadd.f32 1.0, %v5614_v11  ;;  %v2774_v11 = vld [vmem:[#allocation6] sm:$0xff] }
 0xb59   :  { %5615 = vrcp.f32 %v2536_v2  ;;  %v2775_v2 = vld [vmem:[#allocation6 + $0x8] sm:$0xff] }
 0xb63   :  { %v5616_v62 = vpop.eup %5615 }
 0xb64   :  { %v2540_v8 = vmul.f32 %v5616_v62, %v2444_v7 }
 0xbc7   :  { %v2543_v21 = vpop.permute.xlu0 %2542 }
 0xbc8   :  { %v2545_v23 = vmul.f32 %v5616_v62, %v2543_v21 }
 0xbca   :  { %2547 = vrot.lane.b32.xlu1 %v2545_v23, %s5685_s15 }
 0xc3c   :  { %v2548_v0 = vpop.permute.xlu1 %2547 }
 0xc3d   :  { %v2550_v19 = vadd.f32 %v2548_v0, %v2540_v8 }
 0xc3f   :  { %5617 = vtanh.f32 %v2550_v19 }
 0xc49   :  { %v5618_v10 = vpop.eup %5617 }
 0xc4a   :  { %2553 = vrot.lane.b32.xlu0 %v5618_v10, %s5684_s30 }
 0xcbc   :  { %v2554_v30 = vpop.permute.xlu0 %2553 }
 0xcbd   :  { %v2556_v17 = vmul.f32 %v5616_v62, %v2554_v30 }
 0xcbf   :  { %2558 = vrot.lane.b32.xlu1 %v2556_v17, %s5685_s15 }
 0xd31   :  { %v2559_v31 = vpop.permute.xlu1 %2558 }
 0xd32   :  { %2561 = vst.msk [vmem:[#allocation6 + $0x10] sm:$0xff] %vm736_vm3, %v2559_v31  ;;  %5240 = vmatmul.mubr.msk.f32.vlgmr.msra.gmra.mrb[88].mxu0 %vm736_vm3, %v2559_v31 }
 0xd33   :  { %5429 = vmatpush3.bf16.msra.mxu0 %v7219_v1  ;;  %5250 = vmatprep.mubr.msk.f32.mxu0 %vm5682_vm2, %v5681_v22 }
 0xd34   :  { %5430 = vmatprep.subr.bf16.mxu0 %v7587_v20 }
 0xd37   :  { %5432 = vmatpush3.bf16.msra.mxu0 %v7232_v15 }
 0xd38   :  { %5433 = vmatprep.subr.bf16.mxu0 %v7587_v20 }
 0xd39   :  { %v2776_v62 = vld [vmem:[#allocation6 + $0x10] sm:$0xff] }
 0xe05   :  { %v2634_v29 = vpop.f32.mrb[88].mxu0 }
 0xe06   :  { %v5490_v54 = vadd.f32 %v7261_v27, %v2634_v29  ;;  %v5241_v26 = vpop.f32.mrb[89].mxu0 }
 0xe08   :  { %5619 = vtanh.f32 %v5490_v54  ;;  %v4164_v28 = vmul.f32 -1.442695, %v5490_v54 }
 0xe0a   :  { %5621 = vpow2.f32 %v4164_v28 }
 0xe12   :  { %v5620_v24 = vpop.eup %5619 }
 0xe13   :  { %2648 = vrot.lane.b32.xlu0 %v5620_v24, %s5684_s30 }
 0xe14   :  { %v5622_v1 = vpop.eup %5621 }
 0xe15   :  { %v2642_v63 = vadd.f32 1.0, %v5622_v1  ;;  %v4179_v1 = vld [vmem:[%s7535_s8 + $0x28] sm:$0xff] }
 0xe17   :  { %5623 = vrcp.f32 %v2642_v63 }
 0xe21   :  { %v5624_v14 = vpop.eup %5623 }
 0xe22   :  { %v2646_v15 = vmul.f32 %v5624_v14, %v2550_v19 }
 0xe85   :  { %v2649_v6 = vpop.permute.xlu0 %2648 }
 0xe86   :  { %v2651_v9 = vmul.f32 %v5624_v14, %v2649_v6  ;;  %v4180_v6 = vld [vmem:[%s7535_s8 + $0x30] sm:$0xff] }
 0xe88   :  { %2653 = vrot.lane.b32.xlu1 %v2651_v9, %s5685_s15  ;;  %v4181_v9 = vld [vmem:[%s7535_s8 + $0x38] sm:$0xff] }
 0xefa   :  { %v2654_v16 = vpop.permute.xlu1 %2653 }
 0xefb   :  { %v2656_v25 = vadd.f32 %v2654_v16, %v2646_v15  ;;  %v7357_v15 = vpack.c.bf16 %v4181_v9, %v4180_v6 }
 0xefd   :  { %5625 = vtanh.f32 %v2656_v25 }
 0xf07   :  { %v5626_v7 = vpop.eup %5625 }
 0xf08   :  { %2659 = vrot.lane.b32.xlu0 %v5626_v7, %s5684_s30 }
 0xf7a   :  { %v2660_v55 = vpop.permute.xlu0 %2659 }
 0xf7b   :  { %v2662_v18 = vmul.f32 %v5624_v14, %v2660_v55 }
 0xf7d   :  { %2664 = vrot.lane.b32.xlu1 %v2662_v18, %s5685_s15  ;;  %v7376_v18 = vld [vmem:[%s7536_s9 + $0x1] ss:$0 sm:$0xff] }
 0xfef   :  { %v2665_v12 = vpop.permute.xlu1 %2664 }
 0xff0   :  { %2667 = vst.msk [vmem:[#allocation6 + $0x18] sm:$0xff] %vm736_vm3, %v2665_v12  ;;  %5251 = vmatmul.mubr.msk.f32.vlgmr.msra.gmra.mrb[90].mxu0 %vm736_vm3, %v2665_v12 }
 0xff1   :  { %5435 = vmatpush3.bf16.msra.mxu0 %v5434_v13  ;;  %5261 = vmatprep.mubr.msk.f32.mxu0 %vm5682_vm2, %v5681_v22 }
 0xff2   :  { %5436 = vmatprep.subr.bf16.mxu0 %v7587_v20 }
 0xff5   :  { %5438 = vmatpush3.bf16.msra.mxu0 %v5437_v3 }
 0xff6   :  { %5439 = vmatprep.subr.bf16.mxu0 %v7587_v20 }
 0xff7   :  { %v2777_v21 = vld [vmem:[#allocation6 + $0x18] sm:$0xff] }
 0xff8   :  { %5262 = vmatmul.mubr.msk.f32.vlgmr.msra.gmra.mrb[92].mxu0 %vm736_vm3, %v2774_v11 }
 0xff9   :  { %5264 = vmatprep.mubr.msk.f32.mxu0 %vm5682_vm2, %v5681_v22 }
 0xffc   :  { %5265 = vmatmul.mubr.msk.f32.gmra.mrb[94].mxu0 %vm736_vm3, %v2775_v2 }
 0xffd   :  { %5267 = vmatprep.mubr.msk.f32.mxu0 %vm5682_vm2, %v5681_v22 }
0x1000   :  { %5268 = vmatmul.mubr.msk.f32.gmra.mrb[96].mxu0 %vm736_vm3, %v2776_v62 }
0x1001   :  { %5270 = vmatprep.mubr.msk.f32.mxu0 %vm5682_vm2, %v5681_v22 }
0x1004   :  { %5271 = vmatmul.mubr.msk.f32.gmra.mrb[98].mxu0 %vm736_vm3, %v2777_v21 }
0x1005   :  { %5273 = vmatprep.mubr.msk.f32.mxu0 %vm5682_vm2, %v5681_v22 }
0x10c3   :  { %v2740_v23 = vpop.f32.mrb[90].mxu0 }
0x10c4   :  { %v5491_v8 = vadd.f32 %v7261_v27, %v2740_v23  ;;  %v5252_v0 = vpop.f32.mrb[91].mxu0  ;;  %v4178_v27 = vld [vmem:[%s7535_s8 + $0x20] sm:$0xff] }
0x10c5   :  { %v7346_v63 = vpack.c.bf16 %v4179_v1, %v4178_v27 }
0x10c6   :  { %5627 = vtanh.f32 %v5491_v8  ;;  %v4166_v10 = vmul.f32 -1.442695, %v5491_v8 }
0x10c7   :  { %5441 = vmatpush3.bf16.msra.mxu0 %v7346_v63 }
0x10c8   :  { %5629 = vpow2.f32 %v4166_v10  ;;  %5442 = vmatprep.subr.bf16.mxu0 %v7587_v20 }
0x10cb   :  { %5444 = vmatpush3.bf16.msra.mxu0 %v7357_v15 }
0x10cc   :  { %5445 = vmatprep.subr.bf16.mxu0 %v7587_v20 }
0x10d0   :  { %v5628_v19 = vpop.eup %5627 }
0x10d1   :  { %2754 = vrot.lane.b32.xlu0 %v5628_v19, %s5684_s30 }
0x10d2   :  { %v5630_v30 = vpop.eup %5629 }
0x10d3   :  { %v2748_v17 = vadd.f32 1.0, %v5630_v30 }
0x10d5   :  { %5631 = vrcp.f32 %v2748_v17 }
0x10df   :  { %v5632_v31 = vpop.eup %5631 }
0x10e0   :  { %v2752_v26 = vmul.f32 %v5632_v31, %v2656_v25 }
0x1143   :  { %v2755_v29 = vpop.permute.xlu0 %2754 }
0x1144   :  { %v2757_v54 = vmul.f32 %v5632_v31, %v2755_v29 }
0x1146   :  { %2759 = vrot.lane.b32.xlu1 %v2757_v54, %s5685_s15 }
0x11b8   :  { %v2760_v24 = vpop.permute.xlu1 %2759 }
0x11b9   :  { %v2762_v28 = vadd.f32 %v2760_v24, %v2752_v26 }
0x11bb   :  { %5633 = vtanh.f32 %v2762_v28 }
0x11c5   :  { %v5634_v14 = vpop.eup %5633 }
0x11c6   :  { %2765 = vrot.lane.b32.xlu0 %v5634_v14, %s5684_s30 }
0x1238   :  { %v2766_v16 = vpop.permute.xlu0 %2765 }
0x1239   :  { %v2768_v25 = vmul.f32 %v5632_v31, %v2766_v16 }
0x123b   :  { %2770 = vrot.lane.b32.xlu1 %v2768_v25, %s5685_s15 }
0x12ad   :  { %v2771_v7 = vpop.permute.xlu1 %2770 }
0x12ae   :  { %2773 = vst.msk [vmem:[#allocation6 + $0x20] sm:$0xff] %vm736_vm3, %v2771_v7 }
0x12b5   :  { %v2778_v55 = vld [vmem:[#allocation6 + $0x20] sm:$0xff] }
0x12b6   :  { %5274 = vmatmul.mubr.msk.f32.gmra.mrb[100].mxu0 %vm736_vm3, %v2778_v55 }
0x12b7   :  { %5284 = vmatprep.mubr.msk.f32.mxu0 %vm5682_vm2, %v5681_v22 }
0x12ba   :  { %5285 = vmatmul.mubr.f32.vlgmr.msra.gmra.mrb[92].mxu0 %v5681_v22 }
0x12bb   :  { %5447 = vmatpush3.bf16.msra.mxu0 %v7346_v63  ;;  %5295 = vmatprep.mubr.msk.f32.mxu0 %vm5682_vm2, %v5681_v22 }
0x12bc   :  { %5448 = vmatprep.subr.bf16.mxu0 %v7587_v20 }
0x12bf   :  { %5450 = vmatpush3.bf16.msra.mxu0 %v7357_v15 }
0x12c0   :  { %5451 = vmatprep.subr.bf16.mxu0 %v7587_v20 }
0x138d   :  { %v2968_v53 = vpop.f32.mrb[92].mxu0 }
0x138e   :  { %v5492_v5 = vadd.f32 %v7376_v18, %v2968_v53  ;;  %v5286_v13 = vpop.f32.mrb[93].mxu0 }
0x1390   :  { %5635 = vtanh.f32 %v5492_v5  ;;  %v4182_v4 = vmul.f32 -1.442695, %v5492_v5 }
0x1392   :  { %5637 = vpow2.f32 %v4182_v4 }
0x139a   :  { %v5636_v61 = vpop.eup %5635 }
0x139b   :  { %2982 = vrot.lane.b32.xlu0 %v5636_v61, %s5684_s30 }
0x139c   :  { %v5638_v12 = vpop.eup %5637 }
0x139d   :  { %v2976_v3 = vadd.f32 1.0, %v5638_v12 }
0x139f   :  { %5639 = vrcp.f32 %v2976_v3 }
0x13a9   :  { %v5640_v11 = vpop.eup %5639 }
0x13aa   :  { %v2980_v21 = vmul.f32 0.0, %v5640_v11 }
0x140d   :  { %v2983_v2 = vpop.permute.xlu0 %2982 }
0x140e   :  { %v2985_v62 = vmul.f32 %v5640_v11, %v2983_v2 }
0x1410   :  { %2987 = vrot.lane.b32.xlu1 %v2985_v62, %s5685_s15 }
0x1482   :  { %v2988_v23 = vpop.permute.xlu1 %2987 }
0x1483   :  { %v2990_v8 = vadd.f32 %v2988_v23, %v2980_v21 }
0x1485   :  { %5641 = vtanh.f32 %v2990_v8 }
0x148f   :  { %v5642_v0 = vpop.eup %5641 }
0x1490   :  { %2993 = vrot.lane.b32.xlu0 %v5642_v0, %s5684_s30 }
0x1502   :  { %v2994_v19 = vpop.permute.xlu0 %2993 }
0x1503   :  { %v2996_v10 = vmul.f32 %v5640_v11, %v2994_v19 }
0x1505   :  { %2998 = vrot.lane.b32.xlu1 %v2996_v10, %s5685_s15 }
0x1577   :  { %v2999_v30 = vpop.permute.xlu1 %2998 }
0x1578   :  { %5296 = vmatmul.mubr.msk.f32.vlgmr.msra.gmra.mrb[94].mxu0 %vm736_vm3, %v2999_v30 }
0x1579   :  { %5453 = vmatpush3.bf16.msra.mxu0 %v7346_v63  ;;  %5306 = vmatprep.mubr.msk.f32.mxu0 %vm5682_vm2, %v5681_v22 }
0x157a   :  { %5454 = vmatprep.subr.bf16.mxu0 %v7587_v20 }
0x157d   :  { %5456 = vmatpush3.bf16.msra.mxu0 %v7357_v15 }
0x157e   :  { %5457 = vmatprep.subr.bf16.mxu0 %v7587_v20 }
0x164b   :  { %v3068_v17 = vpop.f32.mrb[94].mxu0 }
0x164c   :  { %v5493_v31 = vadd.f32 %v7376_v18, %v3068_v17  ;;  %v5297_v29 = vpop.f32.mrb[95].mxu0 }
0x164e   :  { %5643 = vtanh.f32 %v5493_v31  ;;  %v4184_v26 = vmul.f32 -1.442695, %v5493_v31 }
0x1650   :  { %5645 = vpow2.f32 %v4184_v26 }
0x1658   :  { %v5644_v54 = vpop.eup %5643 }
0x1659   :  { %3082 = vrot.lane.b32.xlu0 %v5644_v54, %s5684_s30 }
0x165a   :  { %v5646_v24 = vpop.eup %5645 }
0x165b   :  { %v3076_v28 = vadd.f32 1.0, %v5646_v24 }
0x165d   :  { %5647 = vrcp.f32 %v3076_v28 }
0x1667   :  { %v5648_v27 = vpop.eup %5647 }
0x1668   :  { %v3080_v6 = vmul.f32 %v5648_v27, %v2990_v8 }
0x16cb   :  { %v3083_v1 = vpop.permute.xlu0 %3082 }
0x16cc   :  { %v3085_v14 = vmul.f32 %v5648_v27, %v3083_v1 }
0x16ce   :  { %3087 = vrot.lane.b32.xlu1 %v3085_v14, %s5685_s15 }
0x1740   :  { %v3088_v9 = vpop.permute.xlu1 %3087 }
0x1741   :  { %v3090_v16 = vadd.f32 %v3088_v9, %v3080_v6 }
0x1743   :  { %5649 = vtanh.f32 %v3090_v16 }
0x174d   :  { %v5650_v25 = vpop.eup %5649 }
0x174e   :  { %3093 = vrot.lane.b32.xlu0 %v5650_v25, %s5684_s30 }
0x17c0   :  { %v3094_v7 = vpop.permute.xlu0 %3093 }
0x17c1   :  { %v3096_v55 = vmul.f32 %v5648_v27, %v3094_v7 }
0x17c3   :  { %3098 = vrot.lane.b32.xlu1 %v3096_v55, %s5685_s15 }
0x1835   :  { %v3099_v53 = vpop.permute.xlu1 %3098 }
0x1836   :  { %5307 = vmatmul.mubr.msk.f32.vlgmr.msra.gmra.mrb[96].mxu0 %vm736_vm3, %v3099_v53 }
0x1837   :  { %5459 = vmatpush3.bf16.msra.mxu0 %v7346_v63  ;;  %5317 = vmatprep.mubr.msk.f32.mxu0 %vm5682_vm2, %v5681_v22 }
0x1838   :  { %5460 = vmatprep.subr.bf16.mxu0 %v7587_v20 }
0x183b   :  { %5462 = vmatpush3.bf16.msra.mxu0 %v7357_v15 }
0x183c   :  { %5463 = vmatprep.subr.bf16.mxu0 %v7587_v20 }
0x1909   :  { %v3168_v5 = vpop.f32.mrb[96].mxu0 }
0x190a   :  { %v5494_v13 = vadd.f32 %v7376_v18, %v3168_v5  ;;  %v5308_v61 = vpop.f32.mrb[97].mxu0 }
0x190c   :  { %5651 = vtanh.f32 %v5494_v13  ;;  %v4186_v12 = vmul.f32 -1.442695, %v5494_v13 }
0x190e   :  { %5653 = vpow2.f32 %v4186_v12 }
0x1916   :  { %v5652_v4 = vpop.eup %5651 }
0x1917   :  { %3182 = vrot.lane.b32.xlu0 %v5652_v4, %s5684_s30 }
0x1918   :  { %v5654_v3 = vpop.eup %5653 }
0x1919   :  { %v3176_v11 = vadd.f32 1.0, %v5654_v3 }
0x191b   :  { %5655 = vrcp.f32 %v3176_v11 }
0x1925   :  { %v5656_v2 = vpop.eup %5655 }
0x1926   :  { %v3180_v23 = vmul.f32 %v5656_v2, %v3090_v16 }
0x1989   :  { %v3183_v62 = vpop.permute.xlu0 %3182 }
0x198a   :  { %v3185_v21 = vmul.f32 %v5656_v2, %v3183_v62 }
0x198c   :  { %3187 = vrot.lane.b32.xlu1 %v3185_v21, %s5685_s15 }
0x19fe   :  { %v3188_v8 = vpop.permute.xlu1 %3187 }
0x19ff   :  { %v3190_v0 = vadd.f32 %v3188_v8, %v3180_v23 }
0x1a01   :  { %5657 = vtanh.f32 %v3190_v0 }
0x1a0b   :  { %v5658_v19 = vpop.eup %5657 }
0x1a0c   :  { %3193 = vrot.lane.b32.xlu0 %v5658_v19, %s5684_s30 }
0x1a7e   :  { %v3194_v10 = vpop.permute.xlu0 %3193 }
0x1a7f   :  { %v3196_v30 = vmul.f32 %v5656_v2, %v3194_v10 }
0x1a81   :  { %3198 = vrot.lane.b32.xlu1 %v3196_v30, %s5685_s15 }
0x1af3   :  { %v3199_v17 = vpop.permute.xlu1 %3198 }
0x1af4   :  { %5318 = vmatmul.mubr.msk.f32.vlgmr.msra.gmra.mrb[98].mxu0 %vm736_vm3, %v3199_v17 }
0x1af5   :  { %5465 = vmatpush3.bf16.msra.mxu0 %v7346_v63  ;;  %5328 = vmatprep.mubr.msk.f32.mxu0 %vm5682_vm2, %v5681_v22 }
0x1af6   :  { %5466 = vmatprep.subr.bf16.mxu0 %v7587_v20 }
0x1af9   :  { %5468 = vmatpush3.bf16.msra.mxu0 %v7357_v15 }
0x1bc7   :  { %v3268_v31 = vpop.f32.mrb[98].mxu0 }
0x1bc8   :  { %v5495_v29 = vadd.f32 %v7376_v18, %v3268_v31  ;;  %v5319_v54 = vpop.f32.mrb[99].mxu0 }
0x1bca   :  { %5659 = vtanh.f32 %v5495_v29  ;;  %v4188_v24 = vmul.f32 -1.442695, %v5495_v29 }
0x1bcc   :  { %5661 = vpow2.f32 %v4188_v24 }
0x1bd4   :  { %v5660_v26 = vpop.eup %5659 }
0x1bd5   :  { %3282 = vrot.lane.b32.xlu0 %v5660_v26, %s5684_s30 }
0x1bd6   :  { %v5662_v28 = vpop.eup %5661 }
0x1bd7   :  { %v3276_v27 = vadd.f32 1.0, %v5662_v28 }
0x1bd9   :  { %5663 = vrcp.f32 %v3276_v27 }
0x1be3   :  { %v5664_v63 = vpop.eup %5663 }
0x1be4   :  { %v3280_v20 = vmul.f32 %v5664_v63, %v3190_v0 }
0x1c47   :  { %v3283_v1 = vpop.permute.xlu0 %3282 }
0x1c48   :  { %v3285_v22 = vmul.f32 %v5664_v63, %v3283_v1 }
0x1c4a   :  { %3287 = vrot.lane.b32.xlu1 %v3285_v22, %s5685_s15 }
0x1cbc   :  { %v3288_v15 = vpop.permute.xlu1 %3287 }
0x1cbd   :  { %v3290_v14 = vadd.f32 %v3288_v15, %v3280_v20 }
0x1cbf   :  { %5665 = vtanh.f32 %v3290_v14 }
0x1cc9   :  { %v5666_v6 = vpop.eup %5665 }
0x1cca   :  { %3293 = vrot.lane.b32.xlu0 %v5666_v6, %s5684_s30 }
0x1d3c   :  { %v3294_v9 = vpop.permute.xlu0 %3293 }
0x1d3d   :  { %v3296_v16 = vmul.f32 %v5664_v63, %v3294_v9 }
0x1d3f   :  { %3298 = vrot.lane.b32.xlu1 %v3296_v16, %s5685_s15 }
0x1db1   :  { %v3299_v25 = vpop.permute.xlu1 %3298 }
0x1db2   :  { %5329 = vmatmul.mubr.msk.f32.vlgmr.msra.gmra.mrb[100].mxu0 %vm736_vm3, %v3299_v25 }
0x1e85   :  { %v3368_v7 = vpop.f32.mrb[100].mxu0 }
0x1e86   :  { %v5496_v55 = vadd.f32 %v7376_v18, %v3368_v7  ;;  %v5330_v53 = vpop.f32.mrb[101].mxu0 }
0x1e88   :  { %5667 = vtanh.f32 %v5496_v55  ;;  %v4190_v13 = vmul.f32 -1.442695, %v5496_v55 }
0x1e8a   :  { %5669 = vpow2.f32 %v4190_v13 }
0x1e92   :  { %v5668_v5 = vpop.eup %5667 }
0x1e93   :  { %3382 = vrot.lane.b32.xlu0 %v5668_v5, %s5684_s30 }
0x1e94   :  { %v5670_v61 = vpop.eup %5669 }
0x1e95   :  { %v3376_v4 = vadd.f32 1.0, %v5670_v61 }
0x1e97   :  { %5671 = vrcp.f32 %v3376_v4 }
0x1ea1   :  { %v5672_v12 = vpop.eup %5671 }
0x1ea2   :  { %v3380_v2 = vmul.f32 %v5672_v12, %v3290_v14 }
0x1f05   :  { %v3383_v3 = vpop.permute.xlu0 %3382 }
0x1f06   :  { %v3385_v11 = vmul.f32 %v5672_v12, %v3383_v3 }
0x1f08   :  { %3387 = vrot.lane.b32.xlu1 %v3385_v11, %s5685_s15 }
0x1f7a   :  { %v3388_v62 = vpop.permute.xlu1 %3387 }
0x1f7b   :  { %v3390_v21 = vadd.f32 %v3388_v62, %v3380_v2 }
0x1f7d   :  { %5673 = vtanh.f32 %v3390_v21 }
0x1f87   :  { %v5674_v18 = vpop.eup %5673 }
0x1f88   :  { %3393 = vrot.lane.b32.xlu0 %v5674_v18, %s5684_s30 }
0x1ffa   :  { %v3394_v23 = vpop.permute.xlu0 %3393 }
0x1ffb   :  { %v3396_v8 = vmul.f32 %v5672_v12, %v3394_v23 }
0x1ffc   :  { %5677 = dma.done.wait [#allocation4], 2048 }
0x1ffd   :  { %5678 = vsyncadd [#allocation4], 4294965248  ;;  %v3405_v0 = vpack.c.bf16 %v3396_v8, %v3396_v8 }
0x1ffe   :  { %5679 = dma.done.wait [#allocation4 + $0x1], 8192 }
0x1fff   :  { %5680 = vsyncadd [#allocation4 + $0x1], 4294959104  ;;  %v5686_v19 = vmov 0   ;;  %3465 = vrot.lane.b32.xlu0 %v3405_v0, %s5685_s15  ;;  %v3407_v10 = vld [vmem:[#allocation2 + $0x8] sm:$0xff]  ;;  %v3406_v30 = vld [vmem:[#allocation2] sm:$0xff] }
0x2000   :  { %3502 = vmatprep.mubr.bf16.mxu0 %v5686_v19  ;;  %5675 = vset.pattern.permute.xlu1 %v5686_v19  ;;  %v3415_v17 = vld [vmem:[#allocation2 + $0x48] sm:$0xff]  ;;  %v3414_v31 = vld [vmem:[#allocation2 + $0x40] sm:$0xff]  ;;  %v3409_v29 = vld [vmem:[#allocation2 + $0x18] sm:$0xff] }
0x2001   :  { %5676 = vset.pattern.permute.xlu0 %v5686_v19  ;;  %3470 = vmatprep.subr.bf16.mxu0 %v3407_v10  ;;  %v3408_v54 = vld [vmem:[#allocation2 + $0x10] sm:$0xff]  ;;  %v3417_v24 = vld [vmem:[#allocation2 + $0x58] sm:$0xff]  ;;  %v3411_v27 = vld [vmem:[#allocation2 + $0x28] sm:$0xff] }
0x2002   :  { %3471 = vmatpush1.bf16.msra.mxu0 %v3406_v30  ;;  %v3416_v28 = vld [vmem:[#allocation2 + $0x50] sm:$0xff]  ;;  %v3410_v63 = vld [vmem:[#allocation2 + $0x20] sm:$0xff]  ;;  %v3419_v1 = vld [vmem:[#allocation2 + $0x68] sm:$0xff] }
0x2003   :  { %3472 = vmatprep.subr.bf16.mxu0 %v3415_v17  ;;  %v3418_v22 = vld [vmem:[#allocation2 + $0x60] sm:$0xff]  ;;  %v3413_v20 = vld [vmem:[#allocation2 + $0x38] sm:$0xff]  ;;  %v3412_v15 = vld [vmem:[#allocation2 + $0x30] sm:$0xff] }
0x2004   :  { %v3421_v14 = vld [vmem:[#allocation2 + $0x78] sm:$0xff]  ;;  %v3420_v6 = vld [vmem:[#allocation2 + $0x70] sm:$0xff]  ;;  %v7590_v23 = vld [vmem:[#allocation16_spill] sm:$0xff] }
0x2005   :  { %v7588_v21 = vld [vmem:[#allocation15_spill] sm:$0xff]  ;;  %v7591_v8 = vld [vmem:[#allocation13_spill] sm:$0xff]  ;;  %v7593_v10 = vld [vmem:[#allocation14_spill] sm:$0xff] }
0x2006   :  { %3473 = vmatpush1.bf16.msra.mxu0 %v3414_v31  ;;  %v7594_v17 = vld [vmem:[#allocation26_spill] sm:$0xff] }
0x2007   :  { %3511 = vmatprep.subr.bf16.mxu0 %v3409_v29  ;;  %v7595_v29 = vld [vmem:[#allocation18_spill] sm:$0xff] }
0x2071   :  { %v3466_v26 = vpop.permute.xlu0 %3465 }
0x2072   :  { %4191 = vmatmul.mubr.msk.bf16.vlgmr.msra.gmra.mrb[104].mxu0 %vm736_vm3, %v3466_v26 }
0x2073   :  { %3512 = vmatpush1.bf16.msra.mxu0 %v3408_v54  ;;  %3543 = vmatprep.mubr.bf16.mxu0 %v5686_v19  ;;  %v7596_v54 = vld [vmem:[#allocation27_spill] sm:$0xff] }
0x2074   :  { %3513 = vmatprep.subr.bf16.mxu0 %v3417_v24  ;;  %v7598_v24 = vld [vmem:[#allocation28_spill] sm:$0xff] }
0x2077   :  { %3514 = vmatpush1.bf16.msra.mxu0 %v3416_v28  ;;  %v7599_v28 = vld [vmem:[#allocation20_spill] sm:$0xff] }
0x2078   :  { %3552 = vmatprep.subr.bf16.mxu0 %v3411_v27  ;;  %v7600_v27 = vld [vmem:[#allocation29_spill] sm:$0xff] }
0x207a   :  { %4192 = vmatmul.mubr.msk.bf16.vlgmr.msra.gmra.mrb[108].mxu0 %vm736_vm3, %v3466_v26 }
0x207b   :  { %3553 = vmatpush1.bf16.msra.mxu0 %v3410_v63  ;;  %3584 = vmatprep.mubr.bf16.mxu0 %v5686_v19  ;;  %v7601_v63 = vld [vmem:[#allocation21_spill] sm:$0xff] }
0x207c   :  { %3554 = vmatprep.subr.bf16.mxu0 %v3419_v1 }
0x207f   :  { %3555 = vmatpush1.bf16.msra.mxu0 %v3418_v22  ;;  %v7602_v22 = vld [vmem:[#allocation30_spill] sm:$0xff] }
0x2080   :  { %3593 = vmatprep.subr.bf16.mxu0 %v3413_v20 }
0x2082   :  { %4193 = vmatmul.mubr.msk.bf16.vlgmr.msra.gmra.mrb[112].mxu0 %vm736_vm3, %v3466_v26 }
0x2083   :  { %3594 = vmatpush1.bf16.msra.mxu0 %v3412_v15  ;;  %3625 = vmatprep.mubr.bf16.mxu0 %v5686_v19  ;;  %v7592_v19 = vld [vmem:[#allocation17_spill] sm:$0xff]  ;;  %v7603_v15 = vld [vmem:[#allocation22_spill] sm:$0xff] }
0x2084   :  { %3595 = vmatprep.subr.bf16.mxu0 %v3421_v14 }
0x2087   :  { %3596 = vmatpush1.bf16.msra.mxu0 %v3420_v6  ;;  %v7604_v6 = vld [vmem:[#allocation31_spill] sm:$0xff] }
0x2088   :  { %4484 = vmatprep.subr.bf16.mxu0 %v5911_v40 }
0x208a   :  { %4194 = vmatmul.mubr.msk.bf16.vlgmr.msra.gmra.mrb[116].mxu0 %vm736_vm3, %v3466_v26  ;;  %v7597_v26 = vld [vmem:[#allocation19_spill] sm:$0xff] }
0x208b   :  { %4485 = vmatpush3.bf16.msra.mxu0 %v5871_v32  ;;  %v3424_v32 = vlaneseq }
0x208c   :  { %4486 = vmatprep.subr.bf16.mxu0 %v5916_v41 }
0x208f   :  { %4487 = vmatpush3.bf16.msra.mxu0 %v5876_v33  ;;  %v7445_v33 = vshrl.u32 %v3424_v32, 7 }
0x2090   :  { %4488 = vmatprep.subr.bf16.mxu0 %v5921_v42 }
0x2091   :  { %v3442_v1 = vsub.s32 4, %v7445_v33  ;;  %v3454_v20 = vsub.s32 7, %v7445_v33 }
0x2093   :  { %4489 = vmatpush3.bf16.msra.mxu0 %v5881_v34  ;;  %v3426_v34 = vsub.s32 0, %v7445_v33 }
0x2094   :  { %4490 = vmatprep.subr.bf16.mxu0 %v5926_v43 }
0x2097   :  { %4491 = vmatpush3.bf16.msra.mxu0 %v5886_v35  ;;  %v7451_v35 = vld [vmem:[%s7537_s11] sm:$0xff] }
0x2098   :  { %4492 = vmatprep.subr.bf16.mxu0 %v5931_v44  ;;  %v3438_v44 = vsub.s32 3, %v7445_v33  ;;  %v3443_v14 = vrot.slane %v7451_v35, %v3442_v1  ;;  %v3455_v32 = vrot.slane %v7451_v35, %v3454_v20  ;;  %v4196_v1 = vld [vmem:[%s7540_s14] ss:$0 sm:$0xff] }
0x209a   :  { %v3439_v9 = vrot.slane %v7451_v35, %v3438_v44 }
0x209b   :  { %4493 = vmatpush3.bf16.msra.mxu0 %v5891_v36  ;;  %v3430_v36 = vsub.s32 1, %v7445_v33 }
0x209c   :  { %4494 = vmatprep.subr.bf16.mxu0 %v5936_v45 }
0x209f   :  { %4495 = vmatpush3.bf16.msra.mxu0 %v5896_v37  ;;  %v3427_v37 = vrot.slane %v7451_v35, %v3426_v34  ;;  %v7605_v34 = vld [vmem:[#allocation23_spill] sm:$0xff] }
0x20a0   :  { %4496 = vmatprep.subr.bf16.mxu0 %v5941_v46 }
0x20a3   :  { %4497 = vmatpush3.bf16.msra.mxu0 %v5901_v38  ;;  %v3431_v38 = vrot.slane %v7451_v35, %v3430_v36 }
0x20a4   :  { %4498 = vmatprep.subr.bf16.mxu0 %v5946_v47 }
0x20a7   :  { %4499 = vmatpush3.bf16.msra.mxu0 %v5906_v39 }
0x20a8   :  { %4506 = vmatprep.subr.bf16.mxu0 %v5991_v56 }
0x2145   :  { %v3504_v40 = vpop.f32.mrb[104].mxu0 }
0x2146   :  { %v3505_v39 = vadd.f32 %v3504_v40, %v3427_v37  ;;  %v3506_v41 = vpop.f32.mrb[105].mxu0  ;;  %v7606_v37 = vld [vmem:[#allocation32_spill] sm:$0xff] }
0x2147   :  { %v3507_v42 = vadd.f32 %v3506_v41, %v3431_v38  ;;  %v3508_v43 = vpop.f32.mrb[106].mxu0  ;;  %v7607_v40 = vld [vmem:[#allocation24_spill] sm:$0xff]  ;;  %v7608_v41 = vld [vmem:[#allocation33_spill] sm:$0xff] }
0x2148   :  { %v3634_v45 = vmax.f32 %v3505_v39, 0.0  ;;  %v3509_v46 = vpop.f32.mrb[107].mxu0  ;;  %v7609_v43 = vld [vmem:[#allocation25_spill] sm:$0xff] }
0x2149   :  { %v3635_v47 = vmax.f32 %v3507_v42, 0.0 }
0x214a   :  { %v3642_v16 = vpack.c.bf16 %v3634_v45, %v3634_v45  ;;  %v7610_v45 = vld [vmem:[#allocation42_spill] sm:$0xff] }
0x214b   :  { %v3643_v56 = vpack.c.bf16 %v3635_v47, %v3635_v47  ;;  %v7611_v47 = vld [vmem:[#allocation34_spill] sm:$0xff] }
0x214d   :  { %v3545_v25 = vpop.f32.mrb[108].mxu0  ;;  %3753 = vmatprep.mubr.bf16.mxu0 %v3643_v56  ;;  %v7612_v56 = vld [vmem:[#allocation43_spill] sm:$0xff] }
0x214e   :  { %v3547_v7 = vpop.f32.mrb[109].mxu0  ;;  %3754 = vmatmul.mubr.bf16.vlgmr.msra.gmra.mrb[120].mxu0 %v3642_v16  ;;  %v7614_v16 = vld [vmem:[#allocation44_spill] sm:$0xff] }
0x214f   :  { %v3548_v55 = vadd.f32 %v3547_v7, %v3439_v9  ;;  %4507 = vmatpush3.bf16.msra.mxu0 %v5951_v48  ;;  %v3549_v53 = vpop.f32.mrb[110].mxu0  ;;  %v3434_v48 = vsub.s32 2, %v7445_v33  ;;  %v7613_v9 = vld [vmem:[#allocation35_spill] sm:$0xff]  ;;  %v7616_v7 = vld [vmem:[#allocation45_spill] sm:$0xff] }
0x2150   :  { %v3550_v5 = vpop.f32.mrb[111].mxu0  ;;  %4508 = vmatprep.subr.bf16.mxu0 %v5996_v57  ;;  %v3446_v57 = vsub.s32 5, %v7445_v33  ;;  %v3450_v53 = vsub.s32 6, %v7445_v33  ;;  %v7625_v33 = vld [vmem:[#allocation41_spill] sm:$0xff] }
0x2151   :  { %v3637_v13 = vmax.f32 %v3548_v55, 0.0  ;;  %v7617_v55 = vld [vmem:[#allocation37_spill] sm:$0xff]  ;;  %v7618_v5 = vld [vmem:[#allocation46_spill] sm:$0xff] }
0x2153   :  { %v3645_v61 = vpack.c.bf16 %v3637_v13, %v3637_v13  ;;  %4509 = vmatpush3.bf16.msra.mxu0 %v5956_v49  ;;  %v7619_v13 = vld [vmem:[#allocation38_spill] sm:$0xff] }
0x2154   :  { %4510 = vmatprep.subr.bf16.mxu0 %v6001_v58 }
0x2155   :  { %v3586_v4 = vpop.f32.mrb[112].mxu0  ;;  %3793 = vmatprep.mubr.bf16.mxu0 %v3645_v61  ;;  %v3451_v61 = vrot.slane %v7451_v35, %v3450_v53 }
0x2156   :  { %v3588_v12 = vpop.f32.mrb[113].mxu0  ;;  %v3587_v36 = vadd.f32 %v3586_v4, %v3443_v14  ;;  %v7620_v4 = vld [vmem:[#allocation47_spill] sm:$0xff] }
0x2157   :  { %4511 = vmatpush3.bf16.msra.mxu0 %v5961_v50  ;;  %v3590_v3 = vpop.f32.mrb[114].mxu0  ;;  %v3435_v50 = vrot.slane %v7451_v35, %v3434_v48  ;;  %v7623_v48 = vld [vmem:[#allocation40_spill] sm:$0xff] }
0x2158   :  { %v3591_v11 = vpop.f32.mrb[115].mxu0  ;;  %4512 = vmatprep.subr.bf16.mxu0 %v6006_v59  ;;  %v3447_v59 = vrot.slane %v7451_v35, %v3446_v57  ;;  %v3638_v39 = vmax.f32 %v3587_v36, 0.0 }
0x2159   :  { %v3546_v18 = vadd.f32 %v3545_v25, %v3435_v50  ;;  %v7615_v25 = vld [vmem:[#allocation36_spill] sm:$0xff] }
0x215a   :  { %v3646_v44 = vpack.c.bf16 %v3638_v39, %v3638_v39  ;;  %v7622_v11 = vld [vmem:[#allocation48_spill] sm:$0xff] }
0x215b   :  { %4513 = vmatpush3.bf16.msra.mxu0 %v5966_v51  ;;  %v7589_v51 = vld [vmem:[#allocation12_spill] sm:$0xff]  ;;  %v3636_v0 = vmax.f32 %v3546_v18, 0.0 }
0x215c   :  { %4514 = vmatprep.subr.bf16.mxu0 %v6011_v60  ;;  %v3589_v60 = vadd.f32 %v3588_v12, %v3447_v59  ;;  %v7621_v12 = vld [vmem:[#allocation39_spill] sm:$0xff] }
0x215d   :  { %v7468_v49 = vpop.f32.mrb[116].mxu0  ;;  %v3644_v30 = vpack.c.bf16 %v3636_v0, %v3636_v0 }
0x215e   :  { %v3629_v58 = vpop.f32.mrb[117].mxu0  ;;  %v3628_v3 = vadd.f32 %v7468_v49, %v3451_v61  ;;  %v4195_v49 = vld [vmem:[%s7539_s13] ss:$0 sm:$0xff] }
0x215f   :  { %4515 = vmatpush3.bf16.msra.mxu0 %v5971_v52  ;;  %v3631_v2 = vpop.f32.mrb[118].mxu0  ;;  %v3639_v52 = vmax.f32 %v3589_v60, 0.0  ;;  %v3630_v38 = vadd.f32 %v3629_v58, %v3455_v32  ;;  %v7624_v58 = vld [vmem:[#allocation49_spill] sm:$0xff] }
0x2160   :  { %v3632_v62 = vpop.f32.mrb[119].mxu0  ;;  %4516 = vmatprep.subr.bf16.mxu0 %v7588_v21  ;;  %v3640_v57 = vmax.f32 %v3628_v3, 0.0 }
0x2161   :  { %v3647_v31 = vpack.c.bf16 %v3639_v52, %v3639_v52  ;;  %v3641_v42 = vmax.f32 %v3630_v38, 0.0 }
0x2162   :  { %v3648_v2 = vpack.c.bf16 %v3640_v57, %v3640_v57 }
0x2163   :  { %4517 = vmatpush3.bf16.msra.mxu0 %v7589_v51  ;;  %v3649_v46 = vpack.c.bf16 %v3641_v42, %v3641_v42 }
0x2164   :  { %4518 = vmatprep.subr.bf16.mxu0 %v7590_v23 }
0x2167   :  { %4519 = vmatpush3.bf16.msra.mxu0 %v7591_v8 }
0x2168   :  { %4520 = vmatprep.subr.bf16.mxu0 %v7592_v19 }
0x216b   :  { %4521 = vmatpush3.bf16.msra.mxu0 %v7593_v10 }
0x216c   :  { %4528 = vmatprep.subr.bf16.mxu0 %v7594_v17 }
0x216e   :  { %3794 = vmatmul.mubr.bf16.vlgmr.msra.gmra.mrb[124].mxu0 %v3644_v30 }
0x216f   :  { %4529 = vmatpush3.bf16.msra.mxu0 %v7595_v29  ;;  %3833 = vmatprep.mubr.bf16.mxu0 %v3647_v31 }
0x2170   :  { %4530 = vmatprep.subr.bf16.mxu0 %v7596_v54 }
0x2173   :  { %4531 = vmatpush3.bf16.msra.mxu0 %v7597_v26 }
0x2174   :  { %4532 = vmatprep.subr.bf16.mxu0 %v7598_v24 }
0x2177   :  { %4533 = vmatpush3.bf16.msra.mxu0 %v7599_v28 }
0x2178   :  { %4534 = vmatprep.subr.bf16.mxu0 %v7600_v27 }
0x217b   :  { %4535 = vmatpush3.bf16.msra.mxu0 %v7601_v63 }
0x217c   :  { %4536 = vmatprep.subr.bf16.mxu0 %v7602_v22 }
0x217f   :  { %4537 = vmatpush3.bf16.msra.mxu0 %v7603_v15  ;;  %v4197_v15 = vld [vmem:[#allocation7] ss:$0 sm:$0xff] }
0x2180   :  { %4538 = vmatprep.subr.bf16.mxu0 %v7604_v6 }
0x2183   :  { %4539 = vmatpush3.bf16.msra.mxu0 %v7605_v34 }
0x2184   :  { %4540 = vmatprep.subr.bf16.mxu0 %v7606_v37 }
0x2187   :  { %4541 = vmatpush3.bf16.msra.mxu0 %v7607_v40 }
0x2188   :  { %4542 = vmatprep.subr.bf16.mxu0 %v7608_v41 }
0x218b   :  { %4543 = vmatpush3.bf16.msra.mxu0 %v7609_v43 }
0x218c   :  { %4550 = vmatprep.subr.bf16.mxu0 %v7610_v45 }
0x218e   :  { %3834 = vmatmul.mubr.bf16.vlgmr.msra.gmra.mrb[128].mxu0 %v3646_v44 }
0x218f   :  { %4551 = vmatpush3.bf16.msra.mxu0 %v7611_v47  ;;  %3873 = vmatprep.mubr.bf16.mxu0 %v3649_v46 }
0x2190   :  { %4552 = vmatprep.subr.bf16.mxu0 %v7612_v56 }
0x2193   :  { %4553 = vmatpush3.bf16.msra.mxu0 %v7613_v9 }
0x2194   :  { %4554 = vmatprep.subr.bf16.mxu0 %v7614_v16 }
0x2197   :  { %4555 = vmatpush3.bf16.msra.mxu0 %v7615_v25 }
0x2198   :  { %4556 = vmatprep.subr.bf16.mxu0 %v7616_v7 }
0x219b   :  { %4557 = vmatpush3.bf16.msra.mxu0 %v7617_v55 }
0x219c   :  { %4558 = vmatprep.subr.bf16.mxu0 %v7618_v5 }
0x219f   :  { %4559 = vmatpush3.bf16.msra.mxu0 %v7619_v13 }
0x21a0   :  { %4560 = vmatprep.subr.bf16.mxu0 %v7620_v4 }
0x21a3   :  { %4561 = vmatpush3.bf16.msra.mxu0 %v7621_v12 }
0x21a4   :  { %4562 = vmatprep.subr.bf16.mxu0 %v7622_v11 }
0x21a7   :  { %4563 = vmatpush3.bf16.msra.mxu0 %v7623_v48 }
0x21a8   :  { %4564 = vmatprep.subr.bf16.mxu0 %v7624_v58 }
0x21ab   :  { %4565 = vmatpush3.bf16.msra.mxu0 %v7625_v33 }
0x21ae   :  { %3874 = vmatmul.mubr.bf16.vlgmr.msra.gmra.mrb[132].mxu0 %v3648_v2 }
0x2221   :  { %v4500_v50 = vpop.f32.mrb[120].mxu0 }
0x2222   :  { %v4501_v62 = vpop.f32.mrb[121].mxu0 }
0x2223   :  { %v4502_v35 = vadd.f32 %v4501_v62, %v4500_v50  ;;  %v4503_v21 = vpop.f32.mrb[122].mxu0 }
0x2224   :  { %v4504_v59 = vpop.f32.mrb[123].mxu0 }
0x2225   :  { %v3756_v23 = vadd.f32 %v4502_v35, %v4195_v49 }
0x2241   :  { %v4522_v51 = vpop.f32.mrb[124].mxu0 }
0x2242   :  { %v4523_v18 = vpop.f32.mrb[125].mxu0 }
0x2243   :  { %v4524_v60 = vadd.f32 %v4523_v18, %v4522_v51  ;;  %v4525_v8 = vpop.f32.mrb[126].mxu0 }
0x2244   :  { %v4526_v0 = vpop.f32.mrb[127].mxu0 }
0x2245   :  { %v3796_v19 = vadd.f32 %v4524_v60, %v3756_v23 }
0x2261   :  { %v4544_v52 = vpop.f32.mrb[128].mxu0 }
0x2262   :  { %v4545_v10 = vpop.f32.mrb[129].mxu0 }
0x2263   :  { %v4546_v30 = vadd.f32 %v4545_v10, %v4544_v52  ;;  %v4547_v17 = vpop.f32.mrb[130].mxu0 }
0x2264   :  { %v4548_v31 = vpop.f32.mrb[131].mxu0 }
0x2265   :  { %v3836_v29 = vadd.f32 %v4546_v30, %v3796_v19 }
0x2281   :  { %v4566_v54 = vpop.f32.mrb[132].mxu0 }
0x2282   :  { %v4567_v26 = vpop.f32.mrb[133].mxu0 }
0x2283   :  { %v4568_v24 = vadd.f32 %v4567_v26, %v4566_v54  ;;  %v4569_v28 = vpop.f32.mrb[134].mxu0 }
0x2284   :  { %v4570_v27 = vpop.f32.mrb[135].mxu0 }
0x2285   :  { %v3876_v63 = vadd.f32 %v4568_v24, %v3836_v29 }
0x2287   :  { %v3881_v22 = vmax.f32 %v3876_v63, 0.0 }
0x2289   :  { %v3889_v20 = vmul.f32 %v4196_v1, %v3881_v22 }
0x228b   :  { %3890 = vadd.xlane.f32.xlu0 %v3889_v20 }
0x2318   :  { %v3891_v14 = vpop.xlane.xlu0 %3890 }
0x2319   :  { %v3899_v6 = vadd.f32 %v4197_v15, %v3891_v14 }
0x231b   :  { %3902 = vperm.xlu1 %5675, %v3899_v6  }
0x239a   :  { %v3903_v32 = vpop.permute.xlu1 %3902 }
0x239b   :  { %3905 = vst [vmem:[%s7542_s16] sm:$0xff] %v3903_v32 }
0x239c   :  { %3910 = vsyncmov [#allocation4] }
0x239f   :  { %s3911_s29 = vpop.sfrf %3910 }
0x23a0   :  { %p4198_p0 = scmp.ne.s32.totalorder %s3911_s29, 0 }
0x23a2   :  { %3915 = shalt.err (%p4198_p0)  }
0x23a3   :  { %3917 = vsyncmov [#allocation4 + $0x1] }
0x23a6   :  { %s3918_s30 = vpop.sfrf %3917 }
0x23a7   :  { %p4199_p1 = scmp.ne.s32.totalorder %s3918_s30, 0 }
0x23a9   :  { %3922 = shalt.err (%p4199_p1)  }

</bundles_post_ra>
